<compile_context>
chip_gen: v7x
topology: tpu7x:2x2x1
jax: 0.10.0
libtpu: 0.0.40
codegen_flags: <defaults>
</compile_context>

<pallas_src>
import functools

import jax
import jax.numpy as jnp
from jax.experimental import pallas as pl
from jax.experimental.pallas import tpu as pltpu


def _round_up(x, m):
    return ((x + m - 1) // m) * m


# -----------------------------------------------------------------------------
# Tiled linear:  o = x @ w + b    (bf16 MXU operands, f32 accumulation)
# Weights/bias are pre-padded + pre-cast ONCE (prepare_params); only the
# activation is padded/cast per call.
# -----------------------------------------------------------------------------
def _linear_cfg(K, N, *, tn=512, tk=512):
    tn = min(tn, _round_up(N, 128))
    tk = min(tk, _round_up(K, 128))
    return tn, tk


def _prep_linear_weight(w, b, *, tn=512, tk=512):
    """w: (K, N) f32, b: (N,) f32 -> padded bf16 weight (Kp, Np), padded f32 bias (1, Np)."""
    K, N = w.shape
    tn, tk = _linear_cfg(K, N, tn=tn, tk=tk)
    Kp, Np = _round_up(K, tk), _round_up(N, tn)
    wp = jnp.pad(w, ((0, Kp - K), (0, Np - N))).astype(jnp.bfloat16)
    bp = jnp.pad(b, (0, Np - N)).astype(jnp.float32).reshape(1, Np)
    return wp, bp


def _linear_kernel(x_ref, w_ref, b_ref, o_ref, acc_ref):
    k = pl.program_id(2)

    @pl.when(k == 0)
    def _():
        acc_ref[...] = jnp.zeros_like(acc_ref)

    # bf16 operands on the MXU, f32 accumulator in VMEM scratch.
    acc_ref[...] += jnp.dot(x_ref[...], w_ref[...],
                            preferred_element_type=jnp.float32)

    @pl.when(k == pl.num_programs(2) - 1)
    def _():
        o_ref[...] = (acc_ref[...] + b_ref[...]).astype(o_ref.dtype)


def linear_pallas(x, w_pad, b_pad, *, n_out, tn, tk, tm=256, out_dtype=jnp.float32):
    """x: (M, K); w_pad: (Kp, Np) bf16 pre-padded; b_pad: (1, Np) f32 -> (M, n_out)."""
    M, K = x.shape
    Kp, Np = w_pad.shape
    tm = min(tm, _round_up(M, 8))
    Mp = _round_up(M, tm)
    xp = jnp.pad(x, ((0, Mp - M), (0, Kp - K))).astype(jnp.bfloat16)

    out = pl.pallas_call(
        _linear_kernel,
        out_shape=jax.ShapeDtypeStruct((Mp, Np), out_dtype),
        grid_spec=pltpu.PrefetchScalarGridSpec(
            num_scalar_prefetch=0,
            grid=(Mp // tm, Np // tn, Kp // tk),
            in_specs=[
                pl.BlockSpec((tm, tk), lambda i, j, k: (i, k)),
                pl.BlockSpec((tk, tn), lambda i, j, k: (k, j)),
                pl.BlockSpec((1, tn), lambda i, j, k: (0, j)),
            ],
            out_specs=pl.BlockSpec((tm, tn), lambda i, j, k: (i, j)),
            scratch_shapes=[pltpu.VMEM((tm, tn), jnp.float32)],
        ),
        compiler_params=pltpu.CompilerParams(
            dimension_semantics=("parallel", "parallel", "arbitrary"),
            vmem_limit_bytes=32 * 1024 * 1024,
        ),
    )(xp, w_pad, b_pad)
    return out[:M, :n_out]


# -----------------------------------------------------------------------------
# Fused LSTM1 + LSTM2 recurrence, time-major, time-blocked, batch-blocked.
#   xw1_ref: (tb, bb, 4H) bf16  encode-half gate pre-projection (frame @ W_ih1^T + bias1)
#   xw2_ref: (tb, bb, 4H) bf16  decode-half gate pre-projection (caption @ W_ih2[:,H:]^T + bias2)
#   whh1/wih2h/whh2: (H, 4H) bf16 recurrent / h1-input weights (transposed)
#   b1/b2: (1, 4H) f32 folded biases (fallback for the half that has zero input)
#   h2_out_ref: (tb, bb, H) f32 — decode-half hidden states only
#   h1/c1/h2/c2 scratch: (bb, H) f32 carried state
# -----------------------------------------------------------------------------
def _sigmoid(x):
    # one EUP op (tanh) instead of exp + reciprocal
    return 0.5 * jnp.tanh(0.5 * x) + 0.5


def _fused_lstm_kernel(xw1_ref, xw2_ref, whh1_ref, wih2h_ref, whh2_ref,
                       b1_ref, b2_ref, h2_out_ref,
                       h1_s, c1_s, h2_s, c2_s, *, hidden, tb, n_enc_blocks):
    H = hidden
    tblk = pl.program_id(1)

    @pl.when(tblk == 0)
    def _():
        h1_s[...] = jnp.zeros_like(h1_s)
        c1_s[...] = jnp.zeros_like(c1_s)
        h2_s[...] = jnp.zeros_like(h2_s)
        c2_s[...] = jnp.zeros_like(c2_s)

    bb = h1_s.shape[0]
    whh1 = whh1_ref[...]      # (H, 4H)  bf16
    wih2h = wih2h_ref[...]    # (H, 4H)  bf16
    whh2 = whh2_ref[...]      # (H, 4H)  bf16

    # Branchless encode/decode selection (every block is entirely in one half).
    enc_f = (tblk < n_enc_blocks).astype(jnp.float32)
    dec_f = 1.0 - enc_f
    bias1 = jnp.broadcast_to(b1_ref[...], (bb, 4 * H))
    bias2 = jnp.broadcast_to(b2_ref[...], (bb, 4 * H))
    b1h = bias1 * dec_f   # used when LSTM1 input is the zero padding (decode half)
    b2h = bias2 * enc_f   # used when caption input is the zero padding (encode half)

    def gates_to_hc(g, c_prev):
        # PyTorch gate order: i, f, g, o.
        i = _sigmoid(g[:, 0 * H:1 * H])
        f = _sigmoid(g[:, 1 * H:2 * H])
        gg = jnp.tanh(g[:, 2 * H:3 * H])
        o = _sigmoid(g[:, 3 * H:4 * H])
        c_new = f * c_prev + i * gg
        return o * jnp.tanh(c_new), c_new

    def step(i, carry):
        h1, c1, h2, c2 = carry
        # ---- LSTM1 (input = video feature for t < T, zeros afterwards) ----
        x1 = xw1_ref[i].astype(jnp.float32) * enc_f + b1h
        g1 = x1 + jnp.dot(h1.astype(jnp.bfloat16), whh1,
                          preferred_element_type=jnp.float32)
        h1, c1 = gates_to_hc(g1, c1)
        # ---- LSTM2 (input = [h1_t ; caption_emb_t], caption is zeros for t < T) ----
        x2 = xw2_ref[i].astype(jnp.float32) * dec_f + b2h
        g2 = (x2
              + jnp.dot(h1.astype(jnp.bfloat16), wih2h,
                        preferred_element_type=jnp.float32)
              + jnp.dot(h2.astype(jnp.bfloat16), whh2,
                        preferred_element_type=jnp.float32))
        h2, c2 = gates_to_hc(g2, c2)
        h2_out_ref[i] = h2
        return (h1, c1, h2, c2)

    h1, c1, h2, c2 = jax.lax.fori_loop(
        0, tb, step, (h1_s[...], c1_s[...], h2_s[...], c2_s[...]),
        unroll=min(tb, 8))
    h1_s[...] = h1
    c1_s[...] = c1
    h2_s[...] = h2
    c2_s[...] = c2


def _recurrence_vmem_budget(tb, bb, H):
    xw_blocks = 2 * 2 * tb * bb * 4 * H * 2          # two bf16 streams, double-buffered
    out_blocks = 2 * tb * bb * H * 4                 # f32 output, double-buffered
    weights = 3 * H * 4 * H * 2                      # three bf16 (H,4H) weights
    carries = 4 * bb * H * 4
    biases = 2 * 4 * H * 4
    need = xw_blocks + out_blocks + weights + carries + biases
    return min(56 * 1024 * 1024, max(16 * 1024 * 1024, int(1.75 * need)))


def fused_lstm_pallas(xw1_enc, xw2_dec, whh1_b, wih2h_b, whh2_b, bias1, bias2,
                      *, hidden, tb, n_enc_blocks, n_batch_blocks):
    """Run the fused two-layer recurrence; returns decode-half h2 (S_dec_pad, B, H) f32."""
    T_enc, B, fourH = xw1_enc.shape
    S_dec = xw2_dec.shape[0]
    H = hidden
    assert fourH == 4 * H and T_enc % tb == 0 and S_dec % tb == 0
    nb = n_batch_blocks
    bb = B // nb
    n_time_blocks = (T_enc + S_dec) // tb
    vmem_limit = _recurrence_vmem_budget(tb, bb, H)

    kernel = functools.partial(_fused_lstm_kernel, hidden=H, tb=tb,
                               n_enc_blocks=n_enc_blocks)
    return pl.pallas_call(
        kernel,
        out_shape=jax.ShapeDtypeStruct((S_dec, B, H), jnp.float32),
        grid_spec=pltpu.PrefetchScalarGridSpec(
            num_scalar_prefetch=0,
            grid=(nb, n_time_blocks),
            in_specs=[
                # encode-half stream: clamped to its last block for decode iterations (ignored)
                pl.BlockSpec((tb, bb, 4 * H),
                             lambda b, t: (jnp.minimum(t, n_enc_blocks - 1), b, 0)),
                # decode-half stream: clamped to block 0 for encode iterations (ignored)
                pl.BlockSpec((tb, bb, 4 * H),
                             lambda b, t: (jnp.maximum(t - n_enc_blocks, 0), b, 0)),
                pl.BlockSpec((H, 4 * H), lambda b, t: (0, 0)),
                pl.BlockSpec((H, 4 * H), lambda b, t: (0, 0)),
                pl.BlockSpec((H, 4 * H), lambda b, t: (0, 0)),
                pl.BlockSpec((1, 4 * H), lambda b, t: (0, 0)),
                pl.BlockSpec((1, 4 * H), lambda b, t: (0, 0)),
            ],
            # decode-half-only output: encode iterations revisit block 0 (overwritten later)
            out_specs=pl.BlockSpec((tb, bb, H),
                                   lambda b, t: (jnp.maximum(t - n_enc_blocks, 0), b, 0)),
            scratch_shapes=[pltpu.VMEM((bb, H), jnp.float32)] * 4,
        ),
        compiler_params=pltpu.CompilerParams(
            dimension_semantics=("parallel", "arbitrary"),
            vmem_limit_bytes=vmem_limit,
        ),
    )(xw1_enc, xw2_dec, whh1_b, wih2h_b, whh2_b, bias1, bias2)


# -----------------------------------------------------------------------------
# One-time weight preparation (pre-transpose, pre-pad, pre-cast to bf16)
# -----------------------------------------------------------------------------
def prepare_params(params, *, hidden):
    H = hidden
    bias1 = params["b_ih1"] + params["b_hh1"]
    bias2 = params["b_ih2"] + params["b_hh2"]
    prep = {}
    prep["wv"], prep["bv"] = _prep_linear_weight(params["Wv"].T, params["bv"])
    prep["wih1"], prep["bih1"] = _prep_linear_weight(params["W_ih1"].T, bias1)
    prep["wih2c"], prep["bih2c"] = _prep_linear_weight(params["W_ih2"][:, H:].T, bias2)
    prep["wlast"], prep["blast"] = _prep_linear_weight(params["Wlast"].T, params["blast"])
    prep["whh1"] = params["W_hh1"].T.astype(jnp.bfloat16)          # (H, 4H)
    prep["wih2h"] = params["W_ih2"][:, :H].T.astype(jnp.bfloat16)  # (H, 4H)
    prep["whh2"] = params["W_hh2"].T.astype(jnp.bfloat16)          # (H, 4H)
    prep["bias1"] = bias1.reshape(1, 4 * H).astype(jnp.float32)
    prep["bias2"] = bias2.reshape(1, 4 * H).astype(jnp.float32)
    prep["emb"] = params["emb"]
    return prep


# -----------------------------------------------------------------------------
# S2VT forward (training branch: caption provided, teacher forcing)
# -----------------------------------------------------------------------------
def s2vt_forward(prep, data, caption, *, timestep, hidden, vocab,
                 video_embed, caption_embed, time_block=16):
    """data: (B, T, cnn_out) f32; caption: (B, T) int32 -> logits (B, T-1, vocab) f32."""
    B, T, C = data.shape
    assert T == timestep
    H = hidden
    Ev, Ec, V = video_embed, caption_embed, vocab

    # Time block must divide T so each grid block is entirely encode- or decode-half.
    tb = min(time_block, T)
    while T % tb:
        tb -= 1
    S = 2 * T - 1
    S_pad = _round_up(S, tb)
    n_enc_blocks = T // tb
    S_dec_pad = S_pad - T

    # --- video embedding (Linear cnn_out -> Ev), real frames only ---
    tn, tk = _linear_cfg(C, Ev)
    feat = linear_pallas(data.reshape(B * T, C), prep["wv"], prep["bv"],
                         n_out=Ev, tn=tn, tk=tk, out_dtype=jnp.bfloat16)
    # dropout_video_embed -> identity (deterministic forward)
    feat_tm = jnp.transpose(feat.reshape(B, T, Ev), (1, 0, 2))        # (T, B, Ev)

    # --- LSTM1 gate pre-projection (encode half only; decode half is just bias1) ---
    tn, tk = _linear_cfg(Ev, 4 * H)
    xw1 = linear_pallas(feat_tm.reshape(T * B, Ev), prep["wih1"], prep["bih1"],
                        n_out=4 * H, tn=tn, tk=tk, out_dtype=jnp.bfloat16)
    xw1_enc = xw1.reshape(T, B, 4 * H)

    # --- caption embedding (shifted right) + LSTM2 caption gate pre-projection ---
    cap_idx_tm = caption[:, :-1].T                                     # (T-1, B)
    cap_emb_tm = prep["emb"][cap_idx_tm]                               # (T-1, B, Ec)
    # dropout_caption_embed -> identity
    tn, tk = _linear_cfg(Ec, 4 * H)
    xw2 = linear_pallas(cap_emb_tm.reshape((T - 1) * B, Ec),
                        prep["wih2c"], prep["bih2c"],
                        n_out=4 * H, tn=tn, tk=tk, out_dtype=jnp.bfloat16)
    xw2_dec = jnp.concatenate(
        [xw2.reshape(T - 1, B, 4 * H),
         jnp.zeros((S_dec_pad - (T - 1), B, 4 * H), jnp.bfloat16)], axis=0)

    # --- fused two-layer recurrence (h1 never leaves VMEM; decode-half h2 only) ---
    nb = 2 if B % 16 == 0 else 1     # batch-parallel axis for v7x's two TensorCores
    h2_dec = fused_lstm_pallas(xw1_enc, xw2_dec,
                               prep["whh1"], prep["wih2h"], prep["whh2"],
                               prep["bias1"], prep["bias2"],
                               hidden=H, tb=tb, n_enc_blocks=n_enc_blocks,
                               n_batch_blocks=nb)                       # (S_dec_pad, B, H)

    # --- decode half -> vocab logits ---
    dec = jnp.transpose(h2_dec[:T - 1], (1, 0, 2))                      # (B, T-1, H)
    tn, tk = _linear_cfg(H, V)
    logits = linear_pallas(dec.reshape(B * (T - 1), H), prep["wlast"], prep["blast"],
                           n_out=V, tn=tn, tk=tk, out_dtype=jnp.float32)
    return logits.reshape(B, T - 1, V)


# -----------------------------------------------------------------------------
# Pure-JAX f32 reference (mirrors the PyTorch training branch) for tolerance check
# -----------------------------------------------------------------------------
def s2vt_reference(params, data, caption, *, timestep, hidden):
    B, T, _ = data.shape
    H = hidden
    feat = data @ params["Wv"].T + params["bv"]
    Ev = feat.shape[-1]
    lstm1_in = jnp.concatenate([feat, jnp.zeros((B, T - 1, Ev))], axis=1)

    def lstm(x_seq, w_ih, w_hh, b_ih, b_hh):
        def step(carry, x_t):
            h, c = carry
            g = x_t @ w_ih.T + b_ih + h @ w_hh.T + b_hh
            i = jax.nn.sigmoid(g[:, :H]); f = jax.nn.sigmoid(g[:, H:2 * H])
            gg = jnp.tanh(g[:, 2 * H:3 * H]); o = jax.nn.sigmoid(g[:, 3 * H:])
            c = f * c + i * gg
            h = o * jnp.tanh(c)
            return (h, c), h
        init = (jnp.zeros((B, H)), jnp.zeros((B, H)))
        _, hs = jax.lax.scan(step, init, jnp.transpose(x_seq, (1, 0, 2)))
        return jnp.transpose(hs, (1, 0, 2))

    h1 = lstm(lstm1_in, params["W_ih1"], params["W_hh1"], params["b_ih1"], params["b_hh1"])
    cap = params["emb"][caption[:, :-1]]
    Ec = cap.shape[-1]
    cap_in = jnp.concatenate([jnp.zeros((B, T, Ec)), cap], axis=1)
    lstm2_in = jnp.concatenate([h1, cap_in], axis=2)
    h2 = lstm(lstm2_in, params["W_ih2"], params["W_hh2"], params["b_ih2"], params["b_hh2"])
    return h2[:, T:, :] @ params["Wlast"].T + params["blast"]


# -----------------------------------------------------------------------------
# Deterministic parameter init (shapes follow the PyTorch module __init__)
# -----------------------------------------------------------------------------
def init_params(key, *, cnn_out, Ev, Ec, H, vocab):
    def u(k, shape, scale=0.1):
        return jax.random.uniform(k, shape, jnp.float32, -scale, scale)

    ks = jax.random.split(key, 12)
    return {
        "Wv": u(ks[0], (Ev, cnn_out)),
        "bv": u(ks[1], (Ev,)),
        "W_ih1": u(ks[2], (4 * H, Ev)),
        "W_hh1": u(ks[3], (4 * H, H)),
        "b_ih1": u(ks[4], (4 * H,)),
        "b_hh1": u(ks[5], (4 * H,)),
        "W_ih2": u(ks[6], (4 * H, H + Ec)),   # input layout is [h1 ; caption_emb]
        "W_hh2": u(ks[7], (4 * H, H)),
        "b_ih2": u(ks[8], (4 * H,)),
        "b_hh2": u(ks[9], (4 * H,)),
        "emb": u(ks[10], (vocab, Ec)),
        "Wlast": u(ks[11], (vocab, H)),
        "blast": jnp.zeros((vocab,), jnp.float32),
    }


if __name__ == "__main__":
    # Small shapes consistent with the module's forward contract.
    B, T = 2, 8
    CNN_OUT, EV, EC, H, VOCAB = 64, 32, 32, 32, 48

    key = jax.random.PRNGKey(0)
    k_data, k_cap, k_par = jax.random.split(key, 3)

    data = jax.random.normal(k_data, (B, T, CNN_OUT), jnp.float32)
    caption = jax.random.randint(k_cap, (B, T), 0, VOCAB, jnp.int32)
    params = init_params(k_par, cnn_out=CNN_OUT, Ev=EV, Ec=EC, H=H, vocab=VOCAB)

    prep = prepare_params(params, hidden=H)
    fwd = jax.jit(functools.partial(
        s2vt_forward, timestep=T, hidden=H, vocab=VOCAB,
        video_embed=EV, caption_embed=EC, time_block=16))
    logits = fwd(prep, data, caption)
    jax.block_until_ready(logits)

    assert logits.shape == (B, T - 1, VOCAB), logits.shape
    assert logits.dtype == jnp.float32
    assert bool(jnp.all(jnp.isfinite(logits)))

    # tolerance check vs a pure f32 reference (bf16 MXU operands introduce small error)
    ref = s2vt_reference(params, data, caption, timestep=T, hidden=H)
    max_err = float(jnp.max(jnp.abs(logits - ref)))
    assert max_err < 5e-2, max_err

    print("KERNEL_OK")
</pallas_src>

<mosaic_0001>
module attributes {stable_mosaic.version = 11 : i64} {
  func.func @_linear_kernel(%arg0: i32, %arg1: i32, %arg2: i32, %arg3: memref<16x128xbf16, #tpu.memory_space<vmem>>, %arg4: memref<128x128xbf16, #tpu.memory_space<vmem>>, %arg5: memref<1x128xf32, #tpu.memory_space<vmem>>, %arg6: memref<16x128xbf16, #tpu.memory_space<vmem>>, %arg7: memref<16x128xf32, #tpu.memory_space<vmem>>) attributes {dimension_semantics = [#tpu.dimension_semantics<parallel>, #tpu.dimension_semantics<parallel>, #tpu.dimension_semantics<arbitrary>], iteration_bounds = array<i64: 1, 1, 1>, scalar_prefetch = 0 : i64, scratch_operands = 1 : i64, tpu.core_type = #tpu.core_type<tc>, window_params = [{transform_indices = @transform_0, window_bounds = array<i64: 16, 128>}, {transform_indices = @transform_1, window_bounds = array<i64: 128, 128>}, {transform_indices = @transform_2, window_bounds = array<i64: 1, 128>}, {transform_indices = @transform_3, window_bounds = array<i64: 16, 128>}]} {
    %c0_i32 = arith.constant 0 : i32
    %0 = arith.cmpi eq, %arg2, %c0_i32 : i32
    %1 = arith.extui %0 : i1 to i32
    %c0_i32_0 = arith.constant 0 : i32
    %2 = arith.cmpi ne, %1, %c0_i32_0 : i32
    scf.if %2 {
      %cst_10 = arith.constant 0.000000e+00 : f32
      %12 = vector.broadcast %cst_10 : f32 to vector<16x128xf32>
      %c0_11 = arith.constant 0 : index
      %c0_12 = arith.constant 0 : index
      %13 = vector.load %arg7[%c0_11, %c0_12] : memref<16x128xf32, #tpu.memory_space<vmem>>, vector<16x128xf32>
      tpu.vector_store %arg7[%c0_11, %c0_12], %12 {strides = array<i32>} : memref<16x128xf32, #tpu.memory_space<vmem>>, vector<16x128xf32>,
    } else {
    }
    %c0 = arith.constant 0 : index
    %c0_1 = arith.constant 0 : index
    %3 = vector.load %arg7[%c0, %c0_1] : memref<16x128xf32, #tpu.memory_space<vmem>>, vector<16x128xf32>
    %c0_2 = arith.constant 0 : index
    %c0_3 = arith.constant 0 : index
    %4 = vector.load %arg3[%c0_2, %c0_3] : memref<16x128xbf16, #tpu.memory_space<vmem>>, vector<16x128xbf16>
    %c0_4 = arith.constant 0 : index
    %c0_5 = arith.constant 0 : index
    %5 = vector.load %arg4[%c0_4, %c0_5] : memref<128x128xbf16, #tpu.memory_space<vmem>>, vector<128x128xbf16>
    %cst = arith.constant dense<0.000000e+00> : vector<16x128xf32>
    %6 = tpu.matmul %4, %5, %cst {dimension_numbers = #tpu.dot_dimension_numbers<[1], [0], [0], [1], [0, 0, 1, 1], [], []>} : vector<16x128xbf16>, vector<128x128xbf16>, vector<16x128xf32> -> vector<16x128xf32>
    %7 = arith.addf %3, %6 : vector<16x128xf32>
    %c0_6 = arith.constant 0 : index
    %c0_7 = arith.constant 0 : index
    %8 = vector.load %arg7[%c0_6, %c0_7] : memref<16x128xf32, #tpu.memory_space<vmem>>, vector<16x128xf32>
    tpu.vector_store %arg7[%c0_6, %c0_7], %7 {strides = array<i32>} : memref<16x128xf32, #tpu.memory_space<vmem>>, vector<16x128xf32>,
    %c0_i32_8 = arith.constant 0 : i32
    %9 = arith.cmpi eq, %arg2, %c0_i32_8 : i32
    %10 = arith.extui %9 : i1 to i32
    %c0_i32_9 = arith.constant 0 : i32
    %11 = arith.cmpi ne, %10, %c0_i32_9 : i32
    scf.if %11 {
      %c0_10 = arith.constant 0 : index
      %c0_11 = arith.constant 0 : index
      %12 = vector.load %arg7[%c0_10, %c0_11] : memref<16x128xf32, #tpu.memory_space<vmem>>, vector<16x128xf32>
      %c0_12 = arith.constant 0 : index
      %c0_13 = arith.constant 0 : index
      %13 = vector.load %arg5[%c0_12, %c0_13] : memref<1x128xf32, #tpu.memory_space<vmem>>, vector<1x128xf32>
      %14 = vector.broadcast %13 : vector<1x128xf32> to vector<16x128xf32>
      %15 = arith.addf %12, %14 : vector<16x128xf32>
      %16 = arith.truncf %15 : vector<16x128xf32> to vector<16x128xbf16>
      %c0_14 = arith.constant 0 : index
      %c0_15 = arith.constant 0 : index
      %17 = vector.load %arg6[%c0_14, %c0_15] : memref<16x128xbf16, #tpu.memory_space<vmem>>, vector<16x128xbf16>
      tpu.vector_store %arg6[%c0_14, %c0_15], %16 {strides = array<i32>} : memref<16x128xbf16, #tpu.memory_space<vmem>>, vector<16x128xbf16>,
    } else {
    }
    return
  }
  func.func @transform_0(%arg0: i32, %arg1: i32, %arg2: i32) -> (i32, i32) {
    %c0_i32 = arith.constant 0 : i32
    return %arg0, %arg2 : i32, i32
  }
  func.func @transform_1(%arg0: i32, %arg1: i32, %arg2: i32) -> (i32, i32) {
    %c0_i32 = arith.constant 0 : i32
    return %arg2, %arg1 : i32, i32
  }
  func.func @transform_2(%arg0: i32, %arg1: i32, %arg2: i32) -> (i32, i32) {
    %c0_i32 = arith.constant 0 : i32
    %c0_i32_0 = arith.constant 0 : i32
    return %c0_i32, %arg1 : i32, i32
  }
  func.func @transform_3(%arg0: i32, %arg1: i32, %arg2: i32) -> (i32, i32) {
    %c0_i32 = arith.constant 0 : i32
    return %arg0, %arg1 : i32, i32
  }
}

module attributes {stable_mosaic.version = 11 : i64} {
  func.func @_linear_kernel(%arg0: i32, %arg1: i32, %arg2: i32, %arg3: memref<16x128xbf16, #tpu.memory_space<vmem>>, %arg4: memref<128x128xbf16, #tpu.memory_space<vmem>>, %arg5: memref<1x128xf32, #tpu.memory_space<vmem>>, %arg6: memref<16x128xf32, #tpu.memory_space<vmem>>, %arg7: memref<16x128xf32, #tpu.memory_space<vmem>>) attributes {dimension_semantics = [#tpu.dimension_semantics<parallel>, #tpu.dimension_semantics<parallel>, #tpu.dimension_semantics<arbitrary>], iteration_bounds = array<i64: 1, 1, 1>, scalar_prefetch = 0 : i64, scratch_operands = 1 : i64, tpu.core_type = #tpu.core_type<tc>, window_params = [{transform_indices = @transform_0, window_bounds = array<i64: 16, 128>}, {transform_indices = @transform_1, window_bounds = array<i64: 128, 128>}, {transform_indices = @transform_2, window_bounds = array<i64: 1, 128>}, {transform_indices = @transform_3, window_bounds = array<i64: 16, 128>}]} {
    %c0_i32 = arith.constant 0 : i32
    %0 = arith.cmpi eq, %arg2, %c0_i32 : i32
    %1 = arith.extui %0 : i1 to i32
    %c0_i32_0 = arith.constant 0 : i32
    %2 = arith.cmpi ne, %1, %c0_i32_0 : i32
    scf.if %2 {
      %cst_10 = arith.constant 0.000000e+00 : f32
      %12 = vector.broadcast %cst_10 : f32 to vector<16x128xf32>
      %c0_11 = arith.constant 0 : index
      %c0_12 = arith.constant 0 : index
      %13 = vector.load %arg7[%c0_11, %c0_12] : memref<16x128xf32, #tpu.memory_space<vmem>>, vector<16x128xf32>
      tpu.vector_store %arg7[%c0_11, %c0_12], %12 {strides = array<i32>} : memref<16x128xf32, #tpu.memory_space<vmem>>, vector<16x128xf32>,
    } else {
    }
    %c0 = arith.constant 0 : index
    %c0_1 = arith.constant 0 : index
    %3 = vector.load %arg7[%c0, %c0_1] : memref<16x128xf32, #tpu.memory_space<vmem>>, vector<16x128xf32>
    %c0_2 = arith.constant 0 : index
    %c0_3 = arith.constant 0 : index
    %4 = vector.load %arg3[%c0_2, %c0_3] : memref<16x128xbf16, #tpu.memory_space<vmem>>, vector<16x128xbf16>
    %c0_4 = arith.constant 0 : index
    %c0_5 = arith.constant 0 : index
    %5 = vector.load %arg4[%c0_4, %c0_5] : memref<128x128xbf16, #tpu.memory_space<vmem>>, vector<128x128xbf16>
    %cst = arith.constant dense<0.000000e+00> : vector<16x128xf32>
    %6 = tpu.matmul %4, %5, %cst {dimension_numbers = #tpu.dot_dimension_numbers<[1], [0], [0], [1], [0, 0, 1, 1], [], []>} : vector<16x128xbf16>, vector<128x128xbf16>, vector<16x128xf32> -> vector<16x128xf32>
    %7 = arith.addf %3, %6 : vector<16x128xf32>
    %c0_6 = arith.constant 0 : index
    %c0_7 = arith.constant 0 : index
    %8 = vector.load %arg7[%c0_6, %c0_7] : memref<16x128xf32, #tpu.memory_space<vmem>>, vector<16x128xf32>
    tpu.vector_store %arg7[%c0_6, %c0_7], %7 {strides = array<i32>} : memref<16x128xf32, #tpu.memory_space<vmem>>, vector<16x128xf32>,
    %c0_i32_8 = arith.constant 0 : i32
    %9 = arith.cmpi eq, %arg2, %c0_i32_8 : i32
    %10 = arith.extui %9 : i1 to i32
    %c0_i32_9 = arith.constant 0 : i32
    %11 = arith.cmpi ne, %10, %c0_i32_9 : i32
    scf.if %11 {
      %c0_10 = arith.constant 0 : index
      %c0_11 = arith.constant 0 : index
      %12 = vector.load %arg7[%c0_10, %c0_11] : memref<16x128xf32, #tpu.memory_space<vmem>>, vector<16x128xf32>
      %c0_12 = arith.constant 0 : index
      %c0_13 = arith.constant 0 : index
      %13 = vector.load %arg5[%c0_12, %c0_13] : memref<1x128xf32, #tpu.memory_space<vmem>>, vector<1x128xf32>
      %14 = vector.broadcast %13 : vector<1x128xf32> to vector<16x128xf32>
      %15 = arith.addf %12, %14 : vector<16x128xf32>
      %c0_14 = arith.constant 0 : index
      %c0_15 = arith.constant 0 : index
      %16 = vector.load %arg6[%c0_14, %c0_15] : memref<16x128xf32, #tpu.memory_space<vmem>>, vector<16x128xf32>
      tpu.vector_store %arg6[%c0_14, %c0_15], %15 {strides = array<i32>} : memref<16x128xf32, #tpu.memory_space<vmem>>, vector<16x128xf32>,
    } else {
    }
    return
  }
  func.func @transform_0(%arg0: i32, %arg1: i32, %arg2: i32) -> (i32, i32) {
    %c0_i32 = arith.constant 0 : i32
    return %arg0, %arg2 : i32, i32
  }
  func.func @transform_1(%arg0: i32, %arg1: i32, %arg2: i32) -> (i32, i32) {
    %c0_i32 = arith.constant 0 : i32
    return %arg2, %arg1 : i32, i32
  }
  func.func @transform_2(%arg0: i32, %arg1: i32, %arg2: i32) -> (i32, i32) {
    %c0_i32 = arith.constant 0 : i32
    %c0_i32_0 = arith.constant 0 : i32
    return %c0_i32, %arg1 : i32, i32
  }
  func.func @transform_3(%arg0: i32, %arg1: i32, %arg2: i32) -> (i32, i32) {
    %c0_i32 = arith.constant 0 : i32
    return %arg0, %arg1 : i32, i32
  }
}

module attributes {stable_mosaic.version = 11 : i64} {
  func.func @_fused_lstm_kernel(%arg0: i32, %arg1: i32, %arg2: memref<8x2x128xbf16, #tpu.memory_space<vmem>>, %arg3: memref<8x2x128xbf16, #tpu.memory_space<vmem>>, %arg4: memref<32x128xbf16, #tpu.memory_space<vmem>>, %arg5: memref<32x128xbf16, #tpu.memory_space<vmem>>, %arg6: memref<32x128xbf16, #tpu.memory_space<vmem>>, %arg7: memref<1x128xf32, #tpu.memory_space<vmem>>, %arg8: memref<1x128xf32, #tpu.memory_space<vmem>>, %arg9: memref<8x2x32xf32, #tpu.memory_space<vmem>>, %arg10: memref<2x32xf32, #tpu.memory_space<vmem>>, %arg11: memref<2x32xf32, #tpu.memory_space<vmem>>, %arg12: memref<2x32xf32, #tpu.memory_space<vmem>>, %arg13: memref<2x32xf32, #tpu.memory_space<vmem>>) attributes {dimension_semantics = [#tpu.dimension_semantics<parallel>, #tpu.dimension_semantics<arbitrary>], iteration_bounds = array<i64: 1, 2>, scalar_prefetch = 0 : i64, scratch_operands = 4 : i64, tpu.core_type = #tpu.core_type<tc>, window_params = [{transform_indices = @transform_0, window_bounds = array<i64: 8, 2, 128>}, {transform_indices = @transform_1, window_bounds = array<i64: 8, 2, 128>}, {pipeline_mode = #tpu.pipeline_mode<synchronous>, transform_indices = @transform_2, window_bounds = array<i64: 32, 128>}, {pipeline_mode = #tpu.pipeline_mode<synchronous>, transform_indices = @transform_3, window_bounds = array<i64: 32, 128>}, {pipeline_mode = #tpu.pipeline_mode<synchronous>, transform_indices = @transform_4, window_bounds = array<i64: 32, 128>}, {pipeline_mode = #tpu.pipeline_mode<synchronous>, transform_indices = @transform_5, window_bounds = array<i64: 1, 128>}, {pipeline_mode = #tpu.pipeline_mode<synchronous>, transform_indices = @transform_6, window_bounds = array<i64: 1, 128>}, {transform_indices = @transform_7, window_bounds = array<i64: 8, 2, 32>}]} {
    %c0_i32 = arith.constant 0 : i32
    %0 = arith.cmpi eq, %arg1, %c0_i32 : i32
    %1 = arith.extui %0 : i1 to i32
    %c0_i32_0 = arith.constant 0 : i32
    %2 = arith.cmpi ne, %1, %c0_i32_0 : i32
    scf.if %2 {
      %cst_244 = arith.constant 0.000000e+00 : f32
      %740 = vector.broadcast %cst_244 : f32 to vector<2x32xf32>
      %c0_245 = arith.constant 0 : index
      %c0_246 = arith.constant 0 : index
      %741 = vector.load %arg10[%c0_245, %c0_246] : memref<2x32xf32, #tpu.memory_space<vmem>>, vector<2x32xf32>
      tpu.vector_store %arg10[%c0_245, %c0_246], %740 {strides = array<i32>} : memref<2x32xf32, #tpu.memory_space<vmem>>, vector<2x32xf32>,
      %cst_247 = arith.constant 0.000000e+00 : f32
      %742 = vector.broadcast %cst_247 : f32 to vector<2x32xf32>
      %c0_248 = arith.constant 0 : index
      %c0_249 = arith.constant 0 : index
      %743 = vector.load %arg11[%c0_248, %c0_249] : memref<2x32xf32, #tpu.memory_space<vmem>>, vector<2x32xf32>
      tpu.vector_store %arg11[%c0_248, %c0_249], %742 {strides = array<i32>} : memref<2x32xf32, #tpu.memory_space<vmem>>, vector<2x32xf32>,
      %cst_250 = arith.constant 0.000000e+00 : f32
      %744 = vector.broadcast %cst_250 : f32 to vector<2x32xf32>
      %c0_251 = arith.constant 0 : index
      %c0_252 = arith.constant 0 : index
      %745 = vector.load %arg12[%c0_251, %c0_252] : memref<2x32xf32, #tpu.memory_space<vmem>>, vector<2x32xf32>
      tpu.vector_store %arg12[%c0_251, %c0_252], %744 {strides = array<i32>} : memref<2x32xf32, #tpu.memory_space<vmem>>, vector<2x32xf32>,
      %cst_253 = arith.constant 0.000000e+00 : f32
      %746 = vector.broadcast %cst_253 : f32 to vector<2x32xf32>
      %c0_254 = arith.constant 0 : index
      %c0_255 = arith.constant 0 : index
      %747 = vector.load %arg13[%c0_254, %c0_255] : memref<2x32xf32, #tpu.memory_space<vmem>>, vector<2x32xf32>
      tpu.vector_store %arg13[%c0_254, %c0_255], %746 {strides = array<i32>} : memref<2x32xf32, #tpu.memory_space<vmem>>, vector<2x32xf32>,
    } else {
    }
    %c0 = arith.constant 0 : index
    %c0_1 = arith.constant 0 : index
    %3 = vector.load %arg4[%c0, %c0_1] : memref<32x128xbf16, #tpu.memory_space<vmem>>, vector<32x128xbf16>
    %c0_2 = arith.constant 0 : index
    %c0_3 = arith.constant 0 : index
    %4 = vector.load %arg5[%c0_2, %c0_3] : memref<32x128xbf16, #tpu.memory_space<vmem>>, vector<32x128xbf16>
    %c0_4 = arith.constant 0 : index
    %c0_5 = arith.constant 0 : index
    %5 = vector.load %arg6[%c0_4, %c0_5] : memref<32x128xbf16, #tpu.memory_space<vmem>>, vector<32x128xbf16>
    %c1_i32 = arith.constant 1 : i32
    %6 = arith.cmpi slt, %arg1, %c1_i32 : i32
    %7 = arith.extui %6 : i1 to i32
    %8 = arith.sitofp %7 : i32 to f32
    %cst = arith.constant 1.000000e+00 : f32
    %9 = arith.subf %cst, %8 : f32
    %c0_6 = arith.constant 0 : index
    %c0_7 = arith.constant 0 : index
    %10 = vector.load %arg7[%c0_6, %c0_7] : memref<1x128xf32, #tpu.memory_space<vmem>>, vector<1x128xf32>
    %11 = vector.shape_cast %10 : vector<1x128xf32> to vector<1x128xf32>
    %12 = vector.broadcast %11 : vector<1x128xf32> to vector<2x128xf32>
    %c0_8 = arith.constant 0 : index
    %c0_9 = arith.constant 0 : index
    %13 = vector.load %arg8[%c0_8, %c0_9] : memref<1x128xf32, #tpu.memory_space<vmem>>, vector<1x128xf32>
    %14 = vector.shape_cast %13 : vector<1x128xf32> to vector<1x128xf32>
    %15 = vector.broadcast %14 : vector<1x128xf32> to vector<2x128xf32>
    %16 = vector.broadcast %9 : f32 to vector<2x128xf32>
    %17 = arith.mulf %12, %16 : vector<2x128xf32>
    %18 = vector.broadcast %8 : f32 to vector<2x128xf32>
    %19 = arith.mulf %15, %18 : vector<2x128xf32>
    %c0_10 = arith.constant 0 : index
    %c0_11 = arith.constant 0 : index
    %20 = vector.load %arg10[%c0_10, %c0_11] : memref<2x32xf32, #tpu.memory_space<vmem>>, vector<2x32xf32>
    %c0_12 = arith.constant 0 : index
    %c0_13 = arith.constant 0 : index
    %21 = vector.load %arg11[%c0_12, %c0_13] : memref<2x32xf32, #tpu.memory_space<vmem>>, vector<2x32xf32>
    %c0_14 = arith.constant 0 : index
    %c0_15 = arith.constant 0 : index
    %22 = vector.load %arg12[%c0_14, %c0_15] : memref<2x32xf32, #tpu.memory_space<vmem>>, vector<2x32xf32>
    %c0_16 = arith.constant 0 : index
    %c0_17 = arith.constant 0 : index
    %23 = vector.load %arg13[%c0_16, %c0_17] : memref<2x32xf32, #tpu.memory_space<vmem>>, vector<2x32xf32>
    %c0_i32_18 = arith.constant 0 : i32
    %24 = arith.index_cast %c0_i32_18 : i32 to index
    %c0_19 = arith.constant 0 : index
    %c0_20 = arith.constant 0 : index
    %25 = vector.load %arg2[%24, %c0_19, %c0_20] : memref<8x2x128xbf16, #tpu.memory_space<vmem>>, vector<1x2x128xbf16>
    %26 = vector.shape_cast %25 : vector<1x2x128xbf16> to vector<2x128xbf16>
    %27 = arith.extf %26 : vector<2x128xbf16> to vector<2x128xf32>
    %28 = vector.broadcast %8 : f32 to vector<2x128xf32>
    %29 = arith.mulf %27, %28 : vector<2x128xf32>
    %30 = arith.addf %29, %17 : vector<2x128xf32>
    %31 = arith.truncf %20 : vector<2x32xf32> to vector<2x32xbf16>
    %cst_21 = arith.constant dense<0.000000e+00> : vector<2x128xf32>
    %32 = tpu.matmul %31, %3, %cst_21 {dimension_numbers = #tpu.dot_dimension_numbers<[1], [0], [0], [1], [0, 0, 1, 1], [], []>} : vector<2x32xbf16>, vector<32x128xbf16>, vector<2x128xf32> -> vector<2x128xf32>
    %33 = arith.addf %30, %32 : vector<2x128xf32>
    %34 = vector.extract_strided_slice %33 {offsets = [0, 0], sizes = [2, 32], strides = [1, 1]} : vector<2x128xf32> to vector<2x32xf32>
    %cst_22 = arith.constant 5.000000e-01 : f32
    %35 = vector.broadcast %cst_22 : f32 to vector<2x32xf32>
    %36 = arith.mulf %35, %34 : vector<2x32xf32>
    %37 = math.tanh %36 : vector<2x32xf32>
    %cst_23 = arith.constant 5.000000e-01 : f32
    %38 = vector.broadcast %cst_23 : f32 to vector<2x32xf32>
    %39 = arith.mulf %38, %37 : vector<2x32xf32>
    %cst_24 = arith.constant 5.000000e-01 : f32
    %40 = vector.broadcast %cst_24 : f32 to vector<2x32xf32>
    %41 = arith.addf %39, %40 : vector<2x32xf32>
    %42 = vector.extract_strided_slice %33 {offsets = [0, 32], sizes = [2, 32], strides = [1, 1]} : vector<2x128xf32> to vector<2x32xf32>
    %cst_25 = arith.constant 5.000000e-01 : f32
    %43 = vector.broadcast %cst_25 : f32 to vector<2x32xf32>
    %44 = arith.mulf %43, %42 : vector<2x32xf32>
    %45 = math.tanh %44 : vector<2x32xf32>
    %cst_26 = arith.constant 5.000000e-01 : f32
    %46 = vector.broadcast %cst_26 : f32 to vector<2x32xf32>
    %47 = arith.mulf %46, %45 : vector<2x32xf32>
    %cst_27 = arith.constant 5.000000e-01 : f32
    %48 = vector.broadcast %cst_27 : f32 to vector<2x32xf32>
    %49 = arith.addf %47, %48 : vector<2x32xf32>
    %50 = vector.extract_strided_slice %33 {offsets = [0, 64], sizes = [2, 32], strides = [1, 1]} : vector<2x128xf32> to vector<2x32xf32>
    %51 = math.tanh %50 : vector<2x32xf32>
    %52 = vector.extract_strided_slice %33 {offsets = [0, 96], sizes = [2, 32], strides = [1, 1]} : vector<2x128xf32> to vector<2x32xf32>
    %cst_28 = arith.constant 5.000000e-01 : f32
    %53 = vector.broadcast %cst_28 : f32 to vector<2x32xf32>
    %54 = arith.mulf %53, %52 : vector<2x32xf32>
    %55 = math.tanh %54 : vector<2x32xf32>
    %cst_29 = arith.constant 5.000000e-01 : f32
    %56 = vector.broadcast %cst_29 : f32 to vector<2x32xf32>
    %57 = arith.mulf %56, %55 : vector<2x32xf32>
    %cst_30 = arith.constant 5.000000e-01 : f32
    %58 = vector.broadcast %cst_30 : f32 to vector<2x32xf32>
    %59 = arith.addf %57, %58 : vector<2x32xf32>
    %60 = arith.mulf %49, %21 : vector<2x32xf32>
    %61 = arith.mulf %41, %51 : vector<2x32xf32>
    %62 = arith.addf %60, %61 : vector<2x32xf32>
    %63 = math.tanh %62 : vector<2x32xf32>
    %64 = arith.mulf %59, %63 : vector<2x32xf32>
    %65 = arith.index_cast %c0_i32_18 : i32 to index
    %c0_31 = arith.constant 0 : index
    %c0_32 = arith.constant 0 : index
    %66 = vector.load %arg3[%65, %c0_31, %c0_32] : memref<8x2x128xbf16, #tpu.memory_space<vmem>>, vector<1x2x128xbf16>
    %67 = vector.shape_cast %66 : vector<1x2x128xbf16> to vector<2x128xbf16>
    %68 = arith.extf %67 : vector<2x128xbf16> to vector<2x128xf32>
    %69 = vector.broadcast %9 : f32 to vector<2x128xf32>
    %70 = arith.mulf %68, %69 : vector<2x128xf32>
    %71 = arith.addf %70, %19 : vector<2x128xf32>
    %72 = arith.truncf %64 : vector<2x32xf32> to vector<2x32xbf16>
    %cst_33 = arith.constant dense<0.000000e+00> : vector<2x128xf32>
    %73 = tpu.matmul %72, %4, %cst_33 {dimension_numbers = #tpu.dot_dimension_numbers<[1], [0], [0], [1], [0, 0, 1, 1], [], []>} : vector<2x32xbf16>, vector<32x128xbf16>, vector<2x128xf32> -> vector<2x128xf32>
    %74 = arith.addf %71, %73 : vector<2x128xf32>
    %75 = arith.truncf %22 : vector<2x32xf32> to vector<2x32xbf16>
    %cst_34 = arith.constant dense<0.000000e+00> : vector<2x128xf32>
    %76 = tpu.matmul %75, %5, %cst_34 {dimension_numbers = #tpu.dot_dimension_numbers<[1], [0], [0], [1], [0, 0, 1, 1], [], []>} : vector<2x32xbf16>, vector<32x128xbf16>, vector<2x128xf32> -> vector<2x128xf32>
    %77 = arith.addf %74, %76 : vector<2x128xf32>
    %78 = vector.extract_strided_slice %77 {offsets = [0, 0], sizes = [2, 32], strides = [1, 1]} : vector<2x128xf32> to vector<2x32xf32>
    %cst_35 = arith.constant 5.000000e-01 : f32
    %79 = vector.broadcast %cst_35 : f32 to vector<2x32xf32>
    %80 = arith.mulf %79, %78 : vector<2x32xf32>
    %81 = math.tanh %80 : vector<2x32xf32>
    %cst_36 = arith.constant 5.000000e-01 : f32
    %82 = vector.broadcast %cst_36 : f32 to vector<2x32xf32>
    %83 = arith.mulf %82, %81 : vector<2x32xf32>
    %cst_37 = arith.constant 5.000000e-01 : f32
    %84 = vector.broadcast %cst_37 : f32 to vector<2x32xf32>
    %85 = arith.addf %83, %84 : vector<2x32xf32>
    %86 = vector.extract_strided_slice %77 {offsets = [0, 32], sizes = [2, 32], strides = [1, 1]} : vector<2x128xf32> to vector<2x32xf32>
    %cst_38 = arith.constant 5.000000e-01 : f32
    %87 = vector.broadcast %cst_38 : f32 to vector<2x32xf32>
    %88 = arith.mulf %87, %86 : vector<2x32xf32>
    %89 = math.tanh %88 : vector<2x32xf32>
    %cst_39 = arith.constant 5.000000e-01 : f32
    %90 = vector.broadcast %cst_39 : f32 to vector<2x32xf32>
    %91 = arith.mulf %90, %89 : vector<2x32xf32>
    %cst_40 = arith.constant 5.000000e-01 : f32
    %92 = vector.broadcast %cst_40 : f32 to vector<2x32xf32>
    %93 = arith.addf %91, %92 : vector<2x32xf32>
    %94 = vector.extract_strided_slice %77 {offsets = [0, 64], sizes = [2, 32], strides = [1, 1]} : vector<2x128xf32> to vector<2x32xf32>
    %95 = math.tanh %94 : vector<2x32xf32>
    %96 = vector.extract_strided_slice %77 {offsets = [0, 96], sizes = [2, 32], strides = [1, 1]} : vector<2x128xf32> to vector<2x32xf32>
    %cst_41 = arith.constant 5.000000e-01 : f32
    %97 = vector.broadcast %cst_41 : f32 to vector<2x32xf32>
    %98 = arith.mulf %97, %96 : vector<2x32xf32>
    %99 = math.tanh %98 : vector<2x32xf32>
    %cst_42 = arith.constant 5.000000e-01 : f32
    %100 = vector.broadcast %cst_42 : f32 to vector<2x32xf32>
    %101 = arith.mulf %100, %99 : vector<2x32xf32>
    %cst_43 = arith.constant 5.000000e-01 : f32
    %102 = vector.broadcast %cst_43 : f32 to vector<2x32xf32>
    %103 = arith.addf %101, %102 : vector<2x32xf32>
    %104 = arith.mulf %93, %23 : vector<2x32xf32>
    %105 = arith.mulf %85, %95 : vector<2x32xf32>
    %106 = arith.addf %104, %105 : vector<2x32xf32>
    %107 = math.tanh %106 : vector<2x32xf32>
    %108 = arith.mulf %103, %107 : vector<2x32xf32>
    %109 = arith.index_cast %c0_i32_18 : i32 to index
    %c0_44 = arith.constant 0 : index
    %c0_45 = arith.constant 0 : index
    %110 = vector.load %arg9[%109, %c0_44, %c0_45] : memref<8x2x32xf32, #tpu.memory_space<vmem>>, vector<1x2x32xf32>
    %111 = vector.shape_cast %110 : vector<1x2x32xf32> to vector<2x32xf32>
    %112 = vector.shape_cast %108 : vector<2x32xf32> to vector<1x2x32xf32>
    tpu.vector_store %arg9[%109, %c0_44, %c0_45], %112 {strides = array<i32>} : memref<8x2x32xf32, #tpu.memory_space<vmem>>, vector<1x2x32xf32>,
    %c1_i32_46 = arith.constant 1 : i32
    %113 = arith.index_cast %c1_i32_46 : i32 to index
    %c0_47 = arith.constant 0 : index
    %c0_48 = arith.constant 0 : index
    %114 = vector.load %arg2[%113, %c0_47, %c0_48] : memref<8x2x128xbf16, #tpu.memory_space<vmem>>, vector<1x2x128xbf16>
    %115 = vector.shape_cast %114 : vector<1x2x128xbf16> to vector<2x128xbf16>
    %116 = arith.extf %115 : vector<2x128xbf16> to vector<2x128xf32>
    %117 = vector.broadcast %8 : f32 to vector<2x128xf32>
    %118 = arith.mulf %116, %117 : vector<2x128xf32>
    %119 = arith.addf %118, %17 : vector<2x128xf32>
    %120 = arith.truncf %64 : vector<2x32xf32> to vector<2x32xbf16>
    %cst_49 = arith.constant dense<0.000000e+00> : vector<2x128xf32>
    %121 = tpu.matmul %120, %3, %cst_49 {dimension_numbers = #tpu.dot_dimension_numbers<[1], [0], [0], [1], [0, 0, 1, 1], [], []>} : vector<2x32xbf16>, vector<32x128xbf16>, vector<2x128xf32> -> vector<2x128xf32>
    %122 = arith.addf %119, %121 : vector<2x128xf32>
    %123 = vector.extract_strided_slice %122 {offsets = [0, 0], sizes = [2, 32], strides = [1, 1]} : vector<2x128xf32> to vector<2x32xf32>
    %cst_50 = arith.constant 5.000000e-01 : f32
    %124 = vector.broadcast %cst_50 : f32 to vector<2x32xf32>
    %125 = arith.mulf %124, %123 : vector<2x32xf32>
    %126 = math.tanh %125 : vector<2x32xf32>
    %cst_51 = arith.constant 5.000000e-01 : f32
    %127 = vector.broadcast %cst_51 : f32 to vector<2x32xf32>
    %128 = arith.mulf %127, %126 : vector<2x32xf32>
    %cst_52 = arith.constant 5.000000e-01 : f32
    %129 = vector.broadcast %cst_52 : f32 to vector<2x32xf32>
    %130 = arith.addf %128, %129 : vector<2x32xf32>
    %131 = vector.extract_strided_slice %122 {offsets = [0, 32], sizes = [2, 32], strides = [1, 1]} : vector<2x128xf32> to vector<2x32xf32>
    %cst_53 = arith.constant 5.000000e-01 : f32
    %132 = vector.broadcast %cst_53 : f32 to vector<2x32xf32>
    %133 = arith.mulf %132, %131 : vector<2x32xf32>
    %134 = math.tanh %133 : vector<2x32xf32>
    %cst_54 = arith.constant 5.000000e-01 : f32
    %135 = vector.broadcast %cst_54 : f32 to vector<2x32xf32>
    %136 = arith.mulf %135, %134 : vector<2x32xf32>
    %cst_55 = arith.constant 5.000000e-01 : f32
    %137 = vector.broadcast %cst_55 : f32 to vector<2x32xf32>
    %138 = arith.addf %136, %137 : vector<2x32xf32>
    %139 = vector.extract_strided_slice %122 {offsets = [0, 64], sizes = [2, 32], strides = [1, 1]} : vector<2x128xf32> to vector<2x32xf32>
    %140 = math.tanh %139 : vector<2x32xf32>
    %141 = vector.extract_strided_slice %122 {offsets = [0, 96], sizes = [2, 32], strides = [1, 1]} : vector<2x128xf32> to vector<2x32xf32>
    %cst_56 = arith.constant 5.000000e-01 : f32
    %142 = vector.broadcast %cst_56 : f32 to vector<2x32xf32>
    %143 = arith.mulf %142, %141 : vector<2x32xf32>
    %144 = math.tanh %143 : vector<2x32xf32>
    %cst_57 = arith.constant 5.000000e-01 : f32
    %145 = vector.broadcast %cst_57 : f32 to vector<2x32xf32>
    %146 = arith.mulf %145, %144 : vector<2x32xf32>
    %cst_58 = arith.constant 5.000000e-01 : f32
    %147 = vector.broadcast %cst_58 : f32 to vector<2x32xf32>
    %148 = arith.addf %146, %147 : vector<2x32xf32>
    %149 = arith.mulf %138, %62 : vector<2x32xf32>
    %150 = arith.mulf %130, %140 : vector<2x32xf32>
    %151 = arith.addf %149, %150 : vector<2x32xf32>
    %152 = math.tanh %151 : vector<2x32xf32>
    %153 = arith.mulf %148, %152 : vector<2x32xf32>
    %154 = arith.index_cast %c1_i32_46 : i32 to index
    %c0_59 = arith.constant 0 : index
    %c0_60 = arith.constant 0 : index
    %155 = vector.load %arg3[%154, %c0_59, %c0_60] : memref<8x2x128xbf16, #tpu.memory_space<vmem>>, vector<1x2x128xbf16>
    %156 = vector.shape_cast %155 : vector<1x2x128xbf16> to vector<2x128xbf16>
    %157 = arith.extf %156 : vector<2x128xbf16> to vector<2x128xf32>
    %158 = vector.broadcast %9 : f32 to vector<2x128xf32>
    %159 = arith.mulf %157, %158 : vector<2x128xf32>
    %160 = arith.addf %159, %19 : vector<2x128xf32>
    %161 = arith.truncf %153 : vector<2x32xf32> to vector<2x32xbf16>
    %cst_61 = arith.constant dense<0.000000e+00> : vector<2x128xf32>
    %162 = tpu.matmul %161, %4, %cst_61 {dimension_numbers = #tpu.dot_dimension_numbers<[1], [0], [0], [1], [0, 0, 1, 1], [], []>} : vector<2x32xbf16>, vector<32x128xbf16>, vector<2x128xf32> -> vector<2x128xf32>
    %163 = arith.addf %160, %162 : vector<2x128xf32>
    %164 = arith.truncf %108 : vector<2x32xf32> to vector<2x32xbf16>
    %cst_62 = arith.constant dense<0.000000e+00> : vector<2x128xf32>
    %165 = tpu.matmul %164, %5, %cst_62 {dimension_numbers = #tpu.dot_dimension_numbers<[1], [0], [0], [1], [0, 0, 1, 1], [], []>} : vector<2x32xbf16>, vector<32x128xbf16>, vector<2x128xf32> -> vector<2x128xf32>
    %166 = arith.addf %163, %165 : vector<2x128xf32>
    %167 = vector.extract_strided_slice %166 {offsets = [0, 0], sizes = [2, 32], strides = [1, 1]} : vector<2x128xf32> to vector<2x32xf32>
    %cst_63 = arith.constant 5.000000e-01 : f32
    %168 = vector.broadcast %cst_63 : f32 to vector<2x32xf32>
    %169 = arith.mulf %168, %167 : vector<2x32xf32>
    %170 = math.tanh %169 : vector<2x32xf32>
    %cst_64 = arith.constant 5.000000e-01 : f32
    %171 = vector.broadcast %cst_64 : f32 to vector<2x32xf32>
    %172 = arith.mulf %171, %170 : vector<2x32xf32>
    %cst_65 = arith.constant 5.000000e-01 : f32
    %173 = vector.broadcast %cst_65 : f32 to vector<2x32xf32>
    %174 = arith.addf %172, %173 : vector<2x32xf32>
    %175 = vector.extract_strided_slice %166 {offsets = [0, 32], sizes = [2, 32], strides = [1, 1]} : vector<2x128xf32> to vector<2x32xf32>
    %cst_66 = arith.constant 5.000000e-01 : f32
    %176 = vector.broadcast %cst_66 : f32 to vector<2x32xf32>
    %177 = arith.mulf %176, %175 : vector<2x32xf32>
    %178 = math.tanh %177 : vector<2x32xf32>
    %cst_67 = arith.constant 5.000000e-01 : f32
    %179 = vector.broadcast %cst_67 : f32 to vector<2x32xf32>
    %180 = arith.mulf %179, %178 : vector<2x32xf32>
    %cst_68 = arith.constant 5.000000e-01 : f32
    %181 = vector.broadcast %cst_68 : f32 to vector<2x32xf32>
    %182 = arith.addf %180, %181 : vector<2x32xf32>
    %183 = vector.extract_strided_slice %166 {offsets = [0, 64], sizes = [2, 32], strides = [1, 1]} : vector<2x128xf32> to vector<2x32xf32>
    %184 = math.tanh %183 : vector<2x32xf32>
    %185 = vector.extract_strided_slice %166 {offsets = [0, 96], sizes = [2, 32], strides = [1, 1]} : vector<2x128xf32> to vector<2x32xf32>
    %cst_69 = arith.constant 5.000000e-01 : f32
    %186 = vector.broadcast %cst_69 : f32 to vector<2x32xf32>
    %187 = arith.mulf %186, %185 : vector<2x32xf32>
    %188 = math.tanh %187 : vector<2x32xf32>
    %cst_70 = arith.constant 5.000000e-01 : f32
    %189 = vector.broadcast %cst_70 : f32 to vector<2x32xf32>
    %190 = arith.mulf %189, %188 : vector<2x32xf32>
    %cst_71 = arith.constant 5.000000e-01 : f32
    %191 = vector.broadcast %cst_71 : f32 to vector<2x32xf32>
    %192 = arith.addf %190, %191 : vector<2x32xf32>
    %193 = arith.mulf %182, %106 : vector<2x32xf32>
    %194 = arith.mulf %174, %184 : vector<2x32xf32>
    %195 = arith.addf %193, %194 : vector<2x32xf32>
    %196 = math.tanh %195 : vector<2x32xf32>
    %197 = arith.mulf %192, %196 : vector<2x32xf32>
    %198 = arith.index_cast %c1_i32_46 : i32 to index
    %c0_72 = arith.constant 0 : index
    %c0_73 = arith.constant 0 : index
    %199 = vector.load %arg9[%198, %c0_72, %c0_73] : memref<8x2x32xf32, #tpu.memory_space<vmem>>, vector<1x2x32xf32>
    %200 = vector.shape_cast %199 : vector<1x2x32xf32> to vector<2x32xf32>
    %201 = vector.shape_cast %197 : vector<2x32xf32> to vector<1x2x32xf32>
    tpu.vector_store %arg9[%198, %c0_72, %c0_73], %201 {strides = array<i32>} : memref<8x2x32xf32, #tpu.memory_space<vmem>>, vector<1x2x32xf32>,
    %c2_i32 = arith.constant 2 : i32
    %202 = arith.index_cast %c2_i32 : i32 to index
    %c0_74 = arith.constant 0 : index
    %c0_75 = arith.constant 0 : index
    %203 = vector.load %arg2[%202, %c0_74, %c0_75] : memref<8x2x128xbf16, #tpu.memory_space<vmem>>, vector<1x2x128xbf16>
    %204 = vector.shape_cast %203 : vector<1x2x128xbf16> to vector<2x128xbf16>
    %205 = arith.extf %204 : vector<2x128xbf16> to vector<2x128xf32>
    %206 = vector.broadcast %8 : f32 to vector<2x128xf32>
    %207 = arith.mulf %205, %206 : vector<2x128xf32>
    %208 = arith.addf %207, %17 : vector<2x128xf32>
    %209 = arith.truncf %153 : vector<2x32xf32> to vector<2x32xbf16>
    %cst_76 = arith.constant dense<0.000000e+00> : vector<2x128xf32>
    %210 = tpu.matmul %209, %3, %cst_76 {dimension_numbers = #tpu.dot_dimension_numbers<[1], [0], [0], [1], [0, 0, 1, 1], [], []>} : vector<2x32xbf16>, vector<32x128xbf16>, vector<2x128xf32> -> vector<2x128xf32>
    %211 = arith.addf %208, %210 : vector<2x128xf32>
    %212 = vector.extract_strided_slice %211 {offsets = [0, 0], sizes = [2, 32], strides = [1, 1]} : vector<2x128xf32> to vector<2x32xf32>
    %cst_77 = arith.constant 5.000000e-01 : f32
    %213 = vector.broadcast %cst_77 : f32 to vector<2x32xf32>
    %214 = arith.mulf %213, %212 : vector<2x32xf32>
    %215 = math.tanh %214 : vector<2x32xf32>
    %cst_78 = arith.constant 5.000000e-01 : f32
    %216 = vector.broadcast %cst_78 : f32 to vector<2x32xf32>
    %217 = arith.mulf %216, %215 : vector<2x32xf32>
    %cst_79 = arith.constant 5.000000e-01 : f32
    %218 = vector.broadcast %cst_79 : f32 to vector<2x32xf32>
    %219 = arith.addf %217, %218 : vector<2x32xf32>
    %220 = vector.extract_strided_slice %211 {offsets = [0, 32], sizes = [2, 32], strides = [1, 1]} : vector<2x128xf32> to vector<2x32xf32>
    %cst_80 = arith.constant 5.000000e-01 : f32
    %221 = vector.broadcast %cst_80 : f32 to vector<2x32xf32>
    %222 = arith.mulf %221, %220 : vector<2x32xf32>
    %223 = math.tanh %222 : vector<2x32xf32>
    %cst_81 = arith.constant 5.000000e-01 : f32
    %224 = vector.broadcast %cst_81 : f32 to vector<2x32xf32>
    %225 = arith.mulf %224, %223 : vector<2x32xf32>
    %cst_82 = arith.constant 5.000000e-01 : f32
    %226 = vector.broadcast %cst_82 : f32 to vector<2x32xf32>
    %227 = arith.addf %225, %226 : vector<2x32xf32>
    %228 = vector.extract_strided_slice %211 {offsets = [0, 64], sizes = [2, 32], strides = [1, 1]} : vector<2x128xf32> to vector<2x32xf32>
    %229 = math.tanh %228 : vector<2x32xf32>
    %230 = vector.extract_strided_slice %211 {offsets = [0, 96], sizes = [2, 32], strides = [1, 1]} : vector<2x128xf32> to vector<2x32xf32>
    %cst_83 = arith.constant 5.000000e-01 : f32
    %231 = vector.broadcast %cst_83 : f32 to vector<2x32xf32>
    %232 = arith.mulf %231, %230 : vector<2x32xf32>
    %233 = math.tanh %232 : vector<2x32xf32>
    %cst_84 = arith.constant 5.000000e-01 : f32
    %234 = vector.broadcast %cst_84 : f32 to vector<2x32xf32>
    %235 = arith.mulf %234, %233 : vector<2x32xf32>
    %cst_85 = arith.constant 5.000000e-01 : f32
    %236 = vector.broadcast %cst_85 : f32 to vector<2x32xf32>
    %237 = arith.addf %235, %236 : vector<2x32xf32>
    %238 = arith.mulf %227, %151 : vector<2x32xf32>
    %239 = arith.mulf %219, %229 : vector<2x32xf32>
    %240 = arith.addf %238, %239 : vector<2x32xf32>
    %241 = math.tanh %240 : vector<2x32xf32>
    %242 = arith.mulf %237, %241 : vector<2x32xf32>
    %243 = arith.index_cast %c2_i32 : i32 to index
    %c0_86 = arith.constant 0 : index
    %c0_87 = arith.constant 0 : index
    %244 = vector.load %arg3[%243, %c0_86, %c0_87] : memref<8x2x128xbf16, #tpu.memory_space<vmem>>, vector<1x2x128xbf16>
    %245 = vector.shape_cast %244 : vector<1x2x128xbf16> to vector<2x128xbf16>
    %246 = arith.extf %245 : vector<2x128xbf16> to vector<2x128xf32>
    %247 = vector.broadcast %9 : f32 to vector<2x128xf32>
    %248 = arith.mulf %246, %247 : vector<2x128xf32>
    %249 = arith.addf %248, %19 : vector<2x128xf32>
    %250 = arith.truncf %242 : vector<2x32xf32> to vector<2x32xbf16>
    %cst_88 = arith.constant dense<0.000000e+00> : vector<2x128xf32>
    %251 = tpu.matmul %250, %4, %cst_88 {dimension_numbers = #tpu.dot_dimension_numbers<[1], [0], [0], [1], [0, 0, 1, 1], [], []>} : vector<2x32xbf16>, vector<32x128xbf16>, vector<2x128xf32> -> vector<2x128xf32>
    %252 = arith.addf %249, %251 : vector<2x128xf32>
    %253 = arith.truncf %197 : vector<2x32xf32> to vector<2x32xbf16>
    %cst_89 = arith.constant dense<0.000000e+00> : vector<2x128xf32>
    %254 = tpu.matmul %253, %5, %cst_89 {dimension_numbers = #tpu.dot_dimension_numbers<[1], [0], [0], [1], [0, 0, 1, 1], [], []>} : vector<2x32xbf16>, vector<32x128xbf16>, vector<2x128xf32> -> vector<2x128xf32>
    %255 = arith.addf %252, %254 : vector<2x128xf32>
    %256 = vector.extract_strided_slice %255 {offsets = [0, 0], sizes = [2, 32], strides = [1, 1]} : vector<2x128xf32> to vector<2x32xf32>
    %cst_90 = arith.constant 5.000000e-01 : f32
    %257 = vector.broadcast %cst_90 : f32 to vector<2x32xf32>
    %258 = arith.mulf %257, %256 : vector<2x32xf32>
    %259 = math.tanh %258 : vector<2x32xf32>
    %cst_91 = arith.constant 5.000000e-01 : f32
    %260 = vector.broadcast %cst_91 : f32 to vector<2x32xf32>
    %261 = arith.mulf %260, %259 : vector<2x32xf32>
    %cst_92 = arith.constant 5.000000e-01 : f32
    %262 = vector.broadcast %cst_92 : f32 to vector<2x32xf32>
    %263 = arith.addf %261, %262 : vector<2x32xf32>
    %264 = vector.extract_strided_slice %255 {offsets = [0, 32], sizes = [2, 32], strides = [1, 1]} : vector<2x128xf32> to vector<2x32xf32>
    %cst_93 = arith.constant 5.000000e-01 : f32
    %265 = vector.broadcast %cst_93 : f32 to vector<2x32xf32>
    %266 = arith.mulf %265, %264 : vector<2x32xf32>
    %267 = math.tanh %266 : vector<2x32xf32>
    %cst_94 = arith.constant 5.000000e-01 : f32
    %268 = vector.broadcast %cst_94 : f32 to vector<2x32xf32>
    %269 = arith.mulf %268, %267 : vector<2x32xf32>
    %cst_95 = arith.constant 5.000000e-01 : f32
    %270 = vector.broadcast %cst_95 : f32 to vector<2x32xf32>
    %271 = arith.addf %269, %270 : vector<2x32xf32>
    %272 = vector.extract_strided_slice %255 {offsets = [0, 64], sizes = [2, 32], strides = [1, 1]} : vector<2x128xf32> to vector<2x32xf32>
    %273 = math.tanh %272 : vector<2x32xf32>
    %274 = vector.extract_strided_slice %255 {offsets = [0, 96], sizes = [2, 32], strides = [1, 1]} : vector<2x128xf32> to vector<2x32xf32>
    %cst_96 = arith.constant 5.000000e-01 : f32
    %275 = vector.broadcast %cst_96 : f32 to vector<2x32xf32>
    %276 = arith.mulf %275, %274 : vector<2x32xf32>
    %277 = math.tanh %276 : vector<2x32xf32>
    %cst_97 = arith.constant 5.000000e-01 : f32
    %278 = vector.broadcast %cst_97 : f32 to vector<2x32xf32>
    %279 = arith.mulf %278, %277 : vector<2x32xf32>
    %cst_98 = arith.constant 5.000000e-01 : f32
    %280 = vector.broadcast %cst_98 : f32 to vector<2x32xf32>
    %281 = arith.addf %279, %280 : vector<2x32xf32>
    %282 = arith.mulf %271, %195 : vector<2x32xf32>
    %283 = arith.mulf %263, %273 : vector<2x32xf32>
    %284 = arith.addf %282, %283 : vector<2x32xf32>
    %285 = math.tanh %284 : vector<2x32xf32>
    %286 = arith.mulf %281, %285 : vector<2x32xf32>
    %287 = arith.index_cast %c2_i32 : i32 to index
    %c0_99 = arith.constant 0 : index
    %c0_100 = arith.constant 0 : index
    %288 = vector.load %arg9[%287, %c0_99, %c0_100] : memref<8x2x32xf32, #tpu.memory_space<vmem>>, vector<1x2x32xf32>
    %289 = vector.shape_cast %288 : vector<1x2x32xf32> to vector<2x32xf32>
    %290 = vector.shape_cast %286 : vector<2x32xf32> to vector<1x2x32xf32>
    tpu.vector_store %arg9[%287, %c0_99, %c0_100], %290 {strides = array<i32>} : memref<8x2x32xf32, #tpu.memory_space<vmem>>, vector<1x2x32xf32>,
    %c3_i32 = arith.constant 3 : i32
    %291 = arith.index_cast %c3_i32 : i32 to index
    %c0_101 = arith.constant 0 : index
    %c0_102 = arith.constant 0 : index
    %292 = vector.load %arg2[%291, %c0_101, %c0_102] : memref<8x2x128xbf16, #tpu.memory_space<vmem>>, vector<1x2x128xbf16>
    %293 = vector.shape_cast %292 : vector<1x2x128xbf16> to vector<2x128xbf16>
    %294 = arith.extf %293 : vector<2x128xbf16> to vector<2x128xf32>
    %295 = vector.broadcast %8 : f32 to vector<2x128xf32>
    %296 = arith.mulf %294, %295 : vector<2x128xf32>
    %297 = arith.addf %296, %17 : vector<2x128xf32>
    %298 = arith.truncf %242 : vector<2x32xf32> to vector<2x32xbf16>
    %cst_103 = arith.constant dense<0.000000e+00> : vector<2x128xf32>
    %299 = tpu.matmul %298, %3, %cst_103 {dimension_numbers = #tpu.dot_dimension_numbers<[1], [0], [0], [1], [0, 0, 1, 1], [], []>} : vector<2x32xbf16>, vector<32x128xbf16>, vector<2x128xf32> -> vector<2x128xf32>
    %300 = arith.addf %297, %299 : vector<2x128xf32>
    %301 = vector.extract_strided_slice %300 {offsets = [0, 0], sizes = [2, 32], strides = [1, 1]} : vector<2x128xf32> to vector<2x32xf32>
    %cst_104 = arith.constant 5.000000e-01 : f32
    %302 = vector.broadcast %cst_104 : f32 to vector<2x32xf32>
    %303 = arith.mulf %302, %301 : vector<2x32xf32>
    %304 = math.tanh %303 : vector<2x32xf32>
    %cst_105 = arith.constant 5.000000e-01 : f32
    %305 = vector.broadcast %cst_105 : f32 to vector<2x32xf32>
    %306 = arith.mulf %305, %304 : vector<2x32xf32>
    %cst_106 = arith.constant 5.000000e-01 : f32
    %307 = vector.broadcast %cst_106 : f32 to vector<2x32xf32>
    %308 = arith.addf %306, %307 : vector<2x32xf32>
    %309 = vector.extract_strided_slice %300 {offsets = [0, 32], sizes = [2, 32], strides = [1, 1]} : vector<2x128xf32> to vector<2x32xf32>
    %cst_107 = arith.constant 5.000000e-01 : f32
    %310 = vector.broadcast %cst_107 : f32 to vector<2x32xf32>
    %311 = arith.mulf %310, %309 : vector<2x32xf32>
    %312 = math.tanh %311 : vector<2x32xf32>
    %cst_108 = arith.constant 5.000000e-01 : f32
    %313 = vector.broadcast %cst_108 : f32 to vector<2x32xf32>
    %314 = arith.mulf %313, %312 : vector<2x32xf32>
    %cst_109 = arith.constant 5.000000e-01 : f32
    %315 = vector.broadcast %cst_109 : f32 to vector<2x32xf32>
    %316 = arith.addf %314, %315 : vector<2x32xf32>
    %317 = vector.extract_strided_slice %300 {offsets = [0, 64], sizes = [2, 32], strides = [1, 1]} : vector<2x128xf32> to vector<2x32xf32>
    %318 = math.tanh %317 : vector<2x32xf32>
    %319 = vector.extract_strided_slice %300 {offsets = [0, 96], sizes = [2, 32], strides = [1, 1]} : vector<2x128xf32> to vector<2x32xf32>
    %cst_110 = arith.constant 5.000000e-01 : f32
    %320 = vector.broadcast %cst_110 : f32 to vector<2x32xf32>
    %321 = arith.mulf %320, %319 : vector<2x32xf32>
    %322 = math.tanh %321 : vector<2x32xf32>
    %cst_111 = arith.constant 5.000000e-01 : f32
    %323 = vector.broadcast %cst_111 : f32 to vector<2x32xf32>
    %324 = arith.mulf %323, %322 : vector<2x32xf32>
    %cst_112 = arith.constant 5.000000e-01 : f32
    %325 = vector.broadcast %cst_112 : f32 to vector<2x32xf32>
    %326 = arith.addf %324, %325 : vector<2x32xf32>
    %327 = arith.mulf %316, %240 : vector<2x32xf32>
    %328 = arith.mulf %308, %318 : vector<2x32xf32>
    %329 = arith.addf %327, %328 : vector<2x32xf32>
    %330 = math.tanh %329 : vector<2x32xf32>
    %331 = arith.mulf %326, %330 : vector<2x32xf32>
    %332 = arith.index_cast %c3_i32 : i32 to index
    %c0_113 = arith.constant 0 : index
    %c0_114 = arith.constant 0 : index
    %333 = vector.load %arg3[%332, %c0_113, %c0_114] : memref<8x2x128xbf16, #tpu.memory_space<vmem>>, vector<1x2x128xbf16>
    %334 = vector.shape_cast %333 : vector<1x2x128xbf16> to vector<2x128xbf16>
    %335 = arith.extf %334 : vector<2x128xbf16> to vector<2x128xf32>
    %336 = vector.broadcast %9 : f32 to vector<2x128xf32>
    %337 = arith.mulf %335, %336 : vector<2x128xf32>
    %338 = arith.addf %337, %19 : vector<2x128xf32>
    %339 = arith.truncf %331 : vector<2x32xf32> to vector<2x32xbf16>
    %cst_115 = arith.constant dense<0.000000e+00> : vector<2x128xf32>
    %340 = tpu.matmul %339, %4, %cst_115 {dimension_numbers = #tpu.dot_dimension_numbers<[1], [0], [0], [1], [0, 0, 1, 1], [], []>} : vector<2x32xbf16>, vector<32x128xbf16>, vector<2x128xf32> -> vector<2x128xf32>
    %341 = arith.addf %338, %340 : vector<2x128xf32>
    %342 = arith.truncf %286 : vector<2x32xf32> to vector<2x32xbf16>
    %cst_116 = arith.constant dense<0.000000e+00> : vector<2x128xf32>
    %343 = tpu.matmul %342, %5, %cst_116 {dimension_numbers = #tpu.dot_dimension_numbers<[1], [0], [0], [1], [0, 0, 1, 1], [], []>} : vector<2x32xbf16>, vector<32x128xbf16>, vector<2x128xf32> -> vector<2x128xf32>
    %344 = arith.addf %341, %343 : vector<2x128xf32>
    %345 = vector.extract_strided_slice %344 {offsets = [0, 0], sizes = [2, 32], strides = [1, 1]} : vector<2x128xf32> to vector<2x32xf32>
    %cst_117 = arith.constant 5.000000e-01 : f32
    %346 = vector.broadcast %cst_117 : f32 to vector<2x32xf32>
    %347 = arith.mulf %346, %345 : vector<2x32xf32>
    %348 = math.tanh %347 : vector<2x32xf32>
    %cst_118 = arith.constant 5.000000e-01 : f32
    %349 = vector.broadcast %cst_118 : f32 to vector<2x32xf32>
    %350 = arith.mulf %349, %348 : vector<2x32xf32>
    %cst_119 = arith.constant 5.000000e-01 : f32
    %351 = vector.broadcast %cst_119 : f32 to vector<2x32xf32>
    %352 = arith.addf %350, %351 : vector<2x32xf32>
    %353 = vector.extract_strided_slice %344 {offsets = [0, 32], sizes = [2, 32], strides = [1, 1]} : vector<2x128xf32> to vector<2x32xf32>
    %cst_120 = arith.constant 5.000000e-01 : f32
    %354 = vector.broadcast %cst_120 : f32 to vector<2x32xf32>
    %355 = arith.mulf %354, %353 : vector<2x32xf32>
    %356 = math.tanh %355 : vector<2x32xf32>
    %cst_121 = arith.constant 5.000000e-01 : f32
    %357 = vector.broadcast %cst_121 : f32 to vector<2x32xf32>
    %358 = arith.mulf %357, %356 : vector<2x32xf32>
    %cst_122 = arith.constant 5.000000e-01 : f32
    %359 = vector.broadcast %cst_122 : f32 to vector<2x32xf32>
    %360 = arith.addf %358, %359 : vector<2x32xf32>
    %361 = vector.extract_strided_slice %344 {offsets = [0, 64], sizes = [2, 32], strides = [1, 1]} : vector<2x128xf32> to vector<2x32xf32>
    %362 = math.tanh %361 : vector<2x32xf32>
    %363 = vector.extract_strided_slice %344 {offsets = [0, 96], sizes = [2, 32], strides = [1, 1]} : vector<2x128xf32> to vector<2x32xf32>
    %cst_123 = arith.constant 5.000000e-01 : f32
    %364 = vector.broadcast %cst_123 : f32 to vector<2x32xf32>
    %365 = arith.mulf %364, %363 : vector<2x32xf32>
    %366 = math.tanh %365 : vector<2x32xf32>
    %cst_124 = arith.constant 5.000000e-01 : f32
    %367 = vector.broadcast %cst_124 : f32 to vector<2x32xf32>
    %368 = arith.mulf %367, %366 : vector<2x32xf32>
    %cst_125 = arith.constant 5.000000e-01 : f32
    %369 = vector.broadcast %cst_125 : f32 to vector<2x32xf32>
    %370 = arith.addf %368, %369 : vector<2x32xf32>
    %371 = arith.mulf %360, %284 : vector<2x32xf32>
    %372 = arith.mulf %352, %362 : vector<2x32xf32>
    %373 = arith.addf %371, %372 : vector<2x32xf32>
    %374 = math.tanh %373 : vector<2x32xf32>
    %375 = arith.mulf %370, %374 : vector<2x32xf32>
    %376 = arith.index_cast %c3_i32 : i32 to index
    %c0_126 = arith.constant 0 : index
    %c0_127 = arith.constant 0 : index
    %377 = vector.load %arg9[%376, %c0_126, %c0_127] : memref<8x2x32xf32, #tpu.memory_space<vmem>>, vector<1x2x32xf32>
    %378 = vector.shape_cast %377 : vector<1x2x32xf32> to vector<2x32xf32>
    %379 = vector.shape_cast %375 : vector<2x32xf32> to vector<1x2x32xf32>
    tpu.vector_store %arg9[%376, %c0_126, %c0_127], %379 {strides = array<i32>} : memref<8x2x32xf32, #tpu.memory_space<vmem>>, vector<1x2x32xf32>,
    %c4_i32 = arith.constant 4 : i32
    %380 = arith.index_cast %c4_i32 : i32 to index
    %c0_128 = arith.constant 0 : index
    %c0_129 = arith.constant 0 : index
    %381 = vector.load %arg2[%380, %c0_128, %c0_129] : memref<8x2x128xbf16, #tpu.memory_space<vmem>>, vector<1x2x128xbf16>
    %382 = vector.shape_cast %381 : vector<1x2x128xbf16> to vector<2x128xbf16>
    %383 = arith.extf %382 : vector<2x128xbf16> to vector<2x128xf32>
    %384 = vector.broadcast %8 : f32 to vector<2x128xf32>
    %385 = arith.mulf %383, %384 : vector<2x128xf32>
    %386 = arith.addf %385, %17 : vector<2x128xf32>
    %387 = arith.truncf %331 : vector<2x32xf32> to vector<2x32xbf16>
    %cst_130 = arith.constant dense<0.000000e+00> : vector<2x128xf32>
    %388 = tpu.matmul %387, %3, %cst_130 {dimension_numbers = #tpu.dot_dimension_numbers<[1], [0], [0], [1], [0, 0, 1, 1], [], []>} : vector<2x32xbf16>, vector<32x128xbf16>, vector<2x128xf32> -> vector<2x128xf32>
    %389 = arith.addf %386, %388 : vector<2x128xf32>
    %390 = vector.extract_strided_slice %389 {offsets = [0, 0], sizes = [2, 32], strides = [1, 1]} : vector<2x128xf32> to vector<2x32xf32>
    %cst_131 = arith.constant 5.000000e-01 : f32
    %391 = vector.broadcast %cst_131 : f32 to vector<2x32xf32>
    %392 = arith.mulf %391, %390 : vector<2x32xf32>
    %393 = math.tanh %392 : vector<2x32xf32>
    %cst_132 = arith.constant 5.000000e-01 : f32
    %394 = vector.broadcast %cst_132 : f32 to vector<2x32xf32>
    %395 = arith.mulf %394, %393 : vector<2x32xf32>
    %cst_133 = arith.constant 5.000000e-01 : f32
    %396 = vector.broadcast %cst_133 : f32 to vector<2x32xf32>
    %397 = arith.addf %395, %396 : vector<2x32xf32>
    %398 = vector.extract_strided_slice %389 {offsets = [0, 32], sizes = [2, 32], strides = [1, 1]} : vector<2x128xf32> to vector<2x32xf32>
    %cst_134 = arith.constant 5.000000e-01 : f32
    %399 = vector.broadcast %cst_134 : f32 to vector<2x32xf32>
    %400 = arith.mulf %399, %398 : vector<2x32xf32>
    %401 = math.tanh %400 : vector<2x32xf32>
    %cst_135 = arith.constant 5.000000e-01 : f32
    %402 = vector.broadcast %cst_135 : f32 to vector<2x32xf32>
    %403 = arith.mulf %402, %401 : vector<2x32xf32>
    %cst_136 = arith.constant 5.000000e-01 : f32
    %404 = vector.broadcast %cst_136 : f32 to vector<2x32xf32>
    %405 = arith.addf %403, %404 : vector<2x32xf32>
    %406 = vector.extract_strided_slice %389 {offsets = [0, 64], sizes = [2, 32], strides = [1, 1]} : vector<2x128xf32> to vector<2x32xf32>
    %407 = math.tanh %406 : vector<2x32xf32>
    %408 = vector.extract_strided_slice %389 {offsets = [0, 96], sizes = [2, 32], strides = [1, 1]} : vector<2x128xf32> to vector<2x32xf32>
    %cst_137 = arith.constant 5.000000e-01 : f32
    %409 = vector.broadcast %cst_137 : f32 to vector<2x32xf32>
    %410 = arith.mulf %409, %408 : vector<2x32xf32>
    %411 = math.tanh %410 : vector<2x32xf32>
    %cst_138 = arith.constant 5.000000e-01 : f32
    %412 = vector.broadcast %cst_138 : f32 to vector<2x32xf32>
    %413 = arith.mulf %412, %411 : vector<2x32xf32>
    %cst_139 = arith.constant 5.000000e-01 : f32
    %414 = vector.broadcast %cst_139 : f32 to vector<2x32xf32>
    %415 = arith.addf %413, %414 : vector<2x32xf32>
    %416 = arith.mulf %405, %329 : vector<2x32xf32>
    %417 = arith.mulf %397, %407 : vector<2x32xf32>
    %418 = arith.addf %416, %417 : vector<2x32xf32>
    %419 = math.tanh %418 : vector<2x32xf32>
    %420 = arith.mulf %415, %419 : vector<2x32xf32>
    %421 = arith.index_cast %c4_i32 : i32 to index
    %c0_140 = arith.constant 0 : index
    %c0_141 = arith.constant 0 : index
    %422 = vector.load %arg3[%421, %c0_140, %c0_141] : memref<8x2x128xbf16, #tpu.memory_space<vmem>>, vector<1x2x128xbf16>
    %423 = vector.shape_cast %422 : vector<1x2x128xbf16> to vector<2x128xbf16>
    %424 = arith.extf %423 : vector<2x128xbf16> to vector<2x128xf32>
    %425 = vector.broadcast %9 : f32 to vector<2x128xf32>
    %426 = arith.mulf %424, %425 : vector<2x128xf32>
    %427 = arith.addf %426, %19 : vector<2x128xf32>
    %428 = arith.truncf %420 : vector<2x32xf32> to vector<2x32xbf16>
    %cst_142 = arith.constant dense<0.000000e+00> : vector<2x128xf32>
    %429 = tpu.matmul %428, %4, %cst_142 {dimension_numbers = #tpu.dot_dimension_numbers<[1], [0], [0], [1], [0, 0, 1, 1], [], []>} : vector<2x32xbf16>, vector<32x128xbf16>, vector<2x128xf32> -> vector<2x128xf32>
    %430 = arith.addf %427, %429 : vector<2x128xf32>
    %431 = arith.truncf %375 : vector<2x32xf32> to vector<2x32xbf16>
    %cst_143 = arith.constant dense<0.000000e+00> : vector<2x128xf32>
    %432 = tpu.matmul %431, %5, %cst_143 {dimension_numbers = #tpu.dot_dimension_numbers<[1], [0], [0], [1], [0, 0, 1, 1], [], []>} : vector<2x32xbf16>, vector<32x128xbf16>, vector<2x128xf32> -> vector<2x128xf32>
    %433 = arith.addf %430, %432 : vector<2x128xf32>
    %434 = vector.extract_strided_slice %433 {offsets = [0, 0], sizes = [2, 32], strides = [1, 1]} : vector<2x128xf32> to vector<2x32xf32>
    %cst_144 = arith.constant 5.000000e-01 : f32
    %435 = vector.broadcast %cst_144 : f32 to vector<2x32xf32>
    %436 = arith.mulf %435, %434 : vector<2x32xf32>
    %437 = math.tanh %436 : vector<2x32xf32>
    %cst_145 = arith.constant 5.000000e-01 : f32
    %438 = vector.broadcast %cst_145 : f32 to vector<2x32xf32>
    %439 = arith.mulf %438, %437 : vector<2x32xf32>
    %cst_146 = arith.constant 5.000000e-01 : f32
    %440 = vector.broadcast %cst_146 : f32 to vector<2x32xf32>
    %441 = arith.addf %439, %440 : vector<2x32xf32>
    %442 = vector.extract_strided_slice %433 {offsets = [0, 32], sizes = [2, 32], strides = [1, 1]} : vector<2x128xf32> to vector<2x32xf32>
    %cst_147 = arith.constant 5.000000e-01 : f32
    %443 = vector.broadcast %cst_147 : f32 to vector<2x32xf32>
    %444 = arith.mulf %443, %442 : vector<2x32xf32>
    %445 = math.tanh %444 : vector<2x32xf32>
    %cst_148 = arith.constant 5.000000e-01 : f32
    %446 = vector.broadcast %cst_148 : f32 to vector<2x32xf32>
    %447 = arith.mulf %446, %445 : vector<2x32xf32>
    %cst_149 = arith.constant 5.000000e-01 : f32
    %448 = vector.broadcast %cst_149 : f32 to vector<2x32xf32>
    %449 = arith.addf %447, %448 : vector<2x32xf32>
    %450 = vector.extract_strided_slice %433 {offsets = [0, 64], sizes = [2, 32], strides = [1, 1]} : vector<2x128xf32> to vector<2x32xf32>
    %451 = math.tanh %450 : vector<2x32xf32>
    %452 = vector.extract_strided_slice %433 {offsets = [0, 96], sizes = [2, 32], strides = [1, 1]} : vector<2x128xf32> to vector<2x32xf32>
    %cst_150 = arith.constant 5.000000e-01 : f32
    %453 = vector.broadcast %cst_150 : f32 to vector<2x32xf32>
    %454 = arith.mulf %453, %452 : vector<2x32xf32>
    %455 = math.tanh %454 : vector<2x32xf32>
    %cst_151 = arith.constant 5.000000e-01 : f32
    %456 = vector.broadcast %cst_151 : f32 to vector<2x32xf32>
    %457 = arith.mulf %456, %455 : vector<2x32xf32>
    %cst_152 = arith.constant 5.000000e-01 : f32
    %458 = vector.broadcast %cst_152 : f32 to vector<2x32xf32>
    %459 = arith.addf %457, %458 : vector<2x32xf32>
    %460 = arith.mulf %449, %373 : vector<2x32xf32>
    %461 = arith.mulf %441, %451 : vector<2x32xf32>
    %462 = arith.addf %460, %461 : vector<2x32xf32>
    %463 = math.tanh %462 : vector<2x32xf32>
    %464 = arith.mulf %459, %463 : vector<2x32xf32>
    %465 = arith.index_cast %c4_i32 : i32 to index
    %c0_153 = arith.constant 0 : index
    %c0_154 = arith.constant 0 : index
    %466 = vector.load %arg9[%465, %c0_153, %c0_154] : memref<8x2x32xf32, #tpu.memory_space<vmem>>, vector<1x2x32xf32>
    %467 = vector.shape_cast %466 : vector<1x2x32xf32> to vector<2x32xf32>
    %468 = vector.shape_cast %464 : vector<2x32xf32> to vector<1x2x32xf32>
    tpu.vector_store %arg9[%465, %c0_153, %c0_154], %468 {strides = array<i32>} : memref<8x2x32xf32, #tpu.memory_space<vmem>>, vector<1x2x32xf32>,
    %c5_i32 = arith.constant 5 : i32
    %469 = arith.index_cast %c5_i32 : i32 to index
    %c0_155 = arith.constant 0 : index
    %c0_156 = arith.constant 0 : index
    %470 = vector.load %arg2[%469, %c0_155, %c0_156] : memref<8x2x128xbf16, #tpu.memory_space<vmem>>, vector<1x2x128xbf16>
    %471 = vector.shape_cast %470 : vector<1x2x128xbf16> to vector<2x128xbf16>
    %472 = arith.extf %471 : vector<2x128xbf16> to vector<2x128xf32>
    %473 = vector.broadcast %8 : f32 to vector<2x128xf32>
    %474 = arith.mulf %472, %473 : vector<2x128xf32>
    %475 = arith.addf %474, %17 : vector<2x128xf32>
    %476 = arith.truncf %420 : vector<2x32xf32> to vector<2x32xbf16>
    %cst_157 = arith.constant dense<0.000000e+00> : vector<2x128xf32>
    %477 = tpu.matmul %476, %3, %cst_157 {dimension_numbers = #tpu.dot_dimension_numbers<[1], [0], [0], [1], [0, 0, 1, 1], [], []>} : vector<2x32xbf16>, vector<32x128xbf16>, vector<2x128xf32> -> vector<2x128xf32>
    %478 = arith.addf %475, %477 : vector<2x128xf32>
    %479 = vector.extract_strided_slice %478 {offsets = [0, 0], sizes = [2, 32], strides = [1, 1]} : vector<2x128xf32> to vector<2x32xf32>
    %cst_158 = arith.constant 5.000000e-01 : f32
    %480 = vector.broadcast %cst_158 : f32 to vector<2x32xf32>
    %481 = arith.mulf %480, %479 : vector<2x32xf32>
    %482 = math.tanh %481 : vector<2x32xf32>
    %cst_159 = arith.constant 5.000000e-01 : f32
    %483 = vector.broadcast %cst_159 : f32 to vector<2x32xf32>
    %484 = arith.mulf %483, %482 : vector<2x32xf32>
    %cst_160 = arith.constant 5.000000e-01 : f32
    %485 = vector.broadcast %cst_160 : f32 to vector<2x32xf32>
    %486 = arith.addf %484, %485 : vector<2x32xf32>
    %487 = vector.extract_strided_slice %478 {offsets = [0, 32], sizes = [2, 32], strides = [1, 1]} : vector<2x128xf32> to vector<2x32xf32>
    %cst_161 = arith.constant 5.000000e-01 : f32
    %488 = vector.broadcast %cst_161 : f32 to vector<2x32xf32>
    %489 = arith.mulf %488, %487 : vector<2x32xf32>
    %490 = math.tanh %489 : vector<2x32xf32>
    %cst_162 = arith.constant 5.000000e-01 : f32
    %491 = vector.broadcast %cst_162 : f32 to vector<2x32xf32>
    %492 = arith.mulf %491, %490 : vector<2x32xf32>
    %cst_163 = arith.constant 5.000000e-01 : f32
    %493 = vector.broadcast %cst_163 : f32 to vector<2x32xf32>
    %494 = arith.addf %492, %493 : vector<2x32xf32>
    %495 = vector.extract_strided_slice %478 {offsets = [0, 64], sizes = [2, 32], strides = [1, 1]} : vector<2x128xf32> to vector<2x32xf32>
    %496 = math.tanh %495 : vector<2x32xf32>
    %497 = vector.extract_strided_slice %478 {offsets = [0, 96], sizes = [2, 32], strides = [1, 1]} : vector<2x128xf32> to vector<2x32xf32>
    %cst_164 = arith.constant 5.000000e-01 : f32
    %498 = vector.broadcast %cst_164 : f32 to vector<2x32xf32>
    %499 = arith.mulf %498, %497 : vector<2x32xf32>
    %500 = math.tanh %499 : vector<2x32xf32>
    %cst_165 = arith.constant 5.000000e-01 : f32
    %501 = vector.broadcast %cst_165 : f32 to vector<2x32xf32>
    %502 = arith.mulf %501, %500 : vector<2x32xf32>
    %cst_166 = arith.constant 5.000000e-01 : f32
    %503 = vector.broadcast %cst_166 : f32 to vector<2x32xf32>
    %504 = arith.addf %502, %503 : vector<2x32xf32>
    %505 = arith.mulf %494, %418 : vector<2x32xf32>
    %506 = arith.mulf %486, %496 : vector<2x32xf32>
    %507 = arith.addf %505, %506 : vector<2x32xf32>
    %508 = math.tanh %507 : vector<2x32xf32>
    %509 = arith.mulf %504, %508 : vector<2x32xf32>
    %510 = arith.index_cast %c5_i32 : i32 to index
    %c0_167 = arith.constant 0 : index
    %c0_168 = arith.constant 0 : index
    %511 = vector.load %arg3[%510, %c0_167, %c0_168] : memref<8x2x128xbf16, #tpu.memory_space<vmem>>, vector<1x2x128xbf16>
    %512 = vector.shape_cast %511 : vector<1x2x128xbf16> to vector<2x128xbf16>
    %513 = arith.extf %512 : vector<2x128xbf16> to vector<2x128xf32>
    %514 = vector.broadcast %9 : f32 to vector<2x128xf32>
    %515 = arith.mulf %513, %514 : vector<2x128xf32>
    %516 = arith.addf %515, %19 : vector<2x128xf32>
    %517 = arith.truncf %509 : vector<2x32xf32> to vector<2x32xbf16>
    %cst_169 = arith.constant dense<0.000000e+00> : vector<2x128xf32>
    %518 = tpu.matmul %517, %4, %cst_169 {dimension_numbers = #tpu.dot_dimension_numbers<[1], [0], [0], [1], [0, 0, 1, 1], [], []>} : vector<2x32xbf16>, vector<32x128xbf16>, vector<2x128xf32> -> vector<2x128xf32>
    %519 = arith.addf %516, %518 : vector<2x128xf32>
    %520 = arith.truncf %464 : vector<2x32xf32> to vector<2x32xbf16>
    %cst_170 = arith.constant dense<0.000000e+00> : vector<2x128xf32>
    %521 = tpu.matmul %520, %5, %cst_170 {dimension_numbers = #tpu.dot_dimension_numbers<[1], [0], [0], [1], [0, 0, 1, 1], [], []>} : vector<2x32xbf16>, vector<32x128xbf16>, vector<2x128xf32> -> vector<2x128xf32>
    %522 = arith.addf %519, %521 : vector<2x128xf32>
    %523 = vector.extract_strided_slice %522 {offsets = [0, 0], sizes = [2, 32], strides = [1, 1]} : vector<2x128xf32> to vector<2x32xf32>
    %cst_171 = arith.constant 5.000000e-01 : f32
    %524 = vector.broadcast %cst_171 : f32 to vector<2x32xf32>
    %525 = arith.mulf %524, %523 : vector<2x32xf32>
    %526 = math.tanh %525 : vector<2x32xf32>
    %cst_172 = arith.constant 5.000000e-01 : f32
    %527 = vector.broadcast %cst_172 : f32 to vector<2x32xf32>
    %528 = arith.mulf %527, %526 : vector<2x32xf32>
    %cst_173 = arith.constant 5.000000e-01 : f32
    %529 = vector.broadcast %cst_173 : f32 to vector<2x32xf32>
    %530 = arith.addf %528, %529 : vector<2x32xf32>
    %531 = vector.extract_strided_slice %522 {offsets = [0, 32], sizes = [2, 32], strides = [1, 1]} : vector<2x128xf32> to vector<2x32xf32>
    %cst_174 = arith.constant 5.000000e-01 : f32
    %532 = vector.broadcast %cst_174 : f32 to vector<2x32xf32>
    %533 = arith.mulf %532, %531 : vector<2x32xf32>
    %534 = math.tanh %533 : vector<2x32xf32>
    %cst_175 = arith.constant 5.000000e-01 : f32
    %535 = vector.broadcast %cst_175 : f32 to vector<2x32xf32>
    %536 = arith.mulf %535, %534 : vector<2x32xf32>
    %cst_176 = arith.constant 5.000000e-01 : f32
    %537 = vector.broadcast %cst_176 : f32 to vector<2x32xf32>
    %538 = arith.addf %536, %537 : vector<2x32xf32>
    %539 = vector.extract_strided_slice %522 {offsets = [0, 64], sizes = [2, 32], strides = [1, 1]} : vector<2x128xf32> to vector<2x32xf32>
    %540 = math.tanh %539 : vector<2x32xf32>
    %541 = vector.extract_strided_slice %522 {offsets = [0, 96], sizes = [2, 32], strides = [1, 1]} : vector<2x128xf32> to vector<2x32xf32>
    %cst_177 = arith.constant 5.000000e-01 : f32
    %542 = vector.broadcast %cst_177 : f32 to vector<2x32xf32>
    %543 = arith.mulf %542, %541 : vector<2x32xf32>
    %544 = math.tanh %543 : vector<2x32xf32>
    %cst_178 = arith.constant 5.000000e-01 : f32
    %545 = vector.broadcast %cst_178 : f32 to vector<2x32xf32>
    %546 = arith.mulf %545, %544 : vector<2x32xf32>
    %cst_179 = arith.constant 5.000000e-01 : f32
    %547 = vector.broadcast %cst_179 : f32 to vector<2x32xf32>
    %548 = arith.addf %546, %547 : vector<2x32xf32>
    %549 = arith.mulf %538, %462 : vector<2x32xf32>
    %550 = arith.mulf %530, %540 : vector<2x32xf32>
    %551 = arith.addf %549, %550 : vector<2x32xf32>
    %552 = math.tanh %551 : vector<2x32xf32>
    %553 = arith.mulf %548, %552 : vector<2x32xf32>
    %554 = arith.index_cast %c5_i32 : i32 to index
    %c0_180 = arith.constant 0 : index
    %c0_181 = arith.constant 0 : index
    %555 = vector.load %arg9[%554, %c0_180, %c0_181] : memref<8x2x32xf32, #tpu.memory_space<vmem>>, vector<1x2x32xf32>
    %556 = vector.shape_cast %555 : vector<1x2x32xf32> to vector<2x32xf32>
    %557 = vector.shape_cast %553 : vector<2x32xf32> to vector<1x2x32xf32>
    tpu.vector_store %arg9[%554, %c0_180, %c0_181], %557 {strides = array<i32>} : memref<8x2x32xf32, #tpu.memory_space<vmem>>, vector<1x2x32xf32>,
    %c6_i32 = arith.constant 6 : i32
    %558 = arith.index_cast %c6_i32 : i32 to index
    %c0_182 = arith.constant 0 : index
    %c0_183 = arith.constant 0 : index
    %559 = vector.load %arg2[%558, %c0_182, %c0_183] : memref<8x2x128xbf16, #tpu.memory_space<vmem>>, vector<1x2x128xbf16>
    %560 = vector.shape_cast %559 : vector<1x2x128xbf16> to vector<2x128xbf16>
    %561 = arith.extf %560 : vector<2x128xbf16> to vector<2x128xf32>
    %562 = vector.broadcast %8 : f32 to vector<2x128xf32>
    %563 = arith.mulf %561, %562 : vector<2x128xf32>
    %564 = arith.addf %563, %17 : vector<2x128xf32>
    %565 = arith.truncf %509 : vector<2x32xf32> to vector<2x32xbf16>
    %cst_184 = arith.constant dense<0.000000e+00> : vector<2x128xf32>
    %566 = tpu.matmul %565, %3, %cst_184 {dimension_numbers = #tpu.dot_dimension_numbers<[1], [0], [0], [1], [0, 0, 1, 1], [], []>} : vector<2x32xbf16>, vector<32x128xbf16>, vector<2x128xf32> -> vector<2x128xf32>
    %567 = arith.addf %564, %566 : vector<2x128xf32>
    %568 = vector.extract_strided_slice %567 {offsets = [0, 0], sizes = [2, 32], strides = [1, 1]} : vector<2x128xf32> to vector<2x32xf32>
    %cst_185 = arith.constant 5.000000e-01 : f32
    %569 = vector.broadcast %cst_185 : f32 to vector<2x32xf32>
    %570 = arith.mulf %569, %568 : vector<2x32xf32>
    %571 = math.tanh %570 : vector<2x32xf32>
    %cst_186 = arith.constant 5.000000e-01 : f32
    %572 = vector.broadcast %cst_186 : f32 to vector<2x32xf32>
    %573 = arith.mulf %572, %571 : vector<2x32xf32>
    %cst_187 = arith.constant 5.000000e-01 : f32
    %574 = vector.broadcast %cst_187 : f32 to vector<2x32xf32>
    %575 = arith.addf %573, %574 : vector<2x32xf32>
    %576 = vector.extract_strided_slice %567 {offsets = [0, 32], sizes = [2, 32], strides = [1, 1]} : vector<2x128xf32> to vector<2x32xf32>
    %cst_188 = arith.constant 5.000000e-01 : f32
    %577 = vector.broadcast %cst_188 : f32 to vector<2x32xf32>
    %578 = arith.mulf %577, %576 : vector<2x32xf32>
    %579 = math.tanh %578 : vector<2x32xf32>
    %cst_189 = arith.constant 5.000000e-01 : f32
    %580 = vector.broadcast %cst_189 : f32 to vector<2x32xf32>
    %581 = arith.mulf %580, %579 : vector<2x32xf32>
    %cst_190 = arith.constant 5.000000e-01 : f32
    %582 = vector.broadcast %cst_190 : f32 to vector<2x32xf32>
    %583 = arith.addf %581, %582 : vector<2x32xf32>
    %584 = vector.extract_strided_slice %567 {offsets = [0, 64], sizes = [2, 32], strides = [1, 1]} : vector<2x128xf32> to vector<2x32xf32>
    %585 = math.tanh %584 : vector<2x32xf32>
    %586 = vector.extract_strided_slice %567 {offsets = [0, 96], sizes = [2, 32], strides = [1, 1]} : vector<2x128xf32> to vector<2x32xf32>
    %cst_191 = arith.constant 5.000000e-01 : f32
    %587 = vector.broadcast %cst_191 : f32 to vector<2x32xf32>
    %588 = arith.mulf %587, %586 : vector<2x32xf32>
    %589 = math.tanh %588 : vector<2x32xf32>
    %cst_192 = arith.constant 5.000000e-01 : f32
    %590 = vector.broadcast %cst_192 : f32 to vector<2x32xf32>
    %591 = arith.mulf %590, %589 : vector<2x32xf32>
    %cst_193 = arith.constant 5.000000e-01 : f32
    %592 = vector.broadcast %cst_193 : f32 to vector<2x32xf32>
    %593 = arith.addf %591, %592 : vector<2x32xf32>
    %594 = arith.mulf %583, %507 : vector<2x32xf32>
    %595 = arith.mulf %575, %585 : vector<2x32xf32>
    %596 = arith.addf %594, %595 : vector<2x32xf32>
    %597 = math.tanh %596 : vector<2x32xf32>
    %598 = arith.mulf %593, %597 : vector<2x32xf32>
    %599 = arith.index_cast %c6_i32 : i32 to index
    %c0_194 = arith.constant 0 : index
    %c0_195 = arith.constant 0 : index
    %600 = vector.load %arg3[%599, %c0_194, %c0_195] : memref<8x2x128xbf16, #tpu.memory_space<vmem>>, vector<1x2x128xbf16>
    %601 = vector.shape_cast %600 : vector<1x2x128xbf16> to vector<2x128xbf16>
    %602 = arith.extf %601 : vector<2x128xbf16> to vector<2x128xf32>
    %603 = vector.broadcast %9 : f32 to vector<2x128xf32>
    %604 = arith.mulf %602, %603 : vector<2x128xf32>
    %605 = arith.addf %604, %19 : vector<2x128xf32>
    %606 = arith.truncf %598 : vector<2x32xf32> to vector<2x32xbf16>
    %cst_196 = arith.constant dense<0.000000e+00> : vector<2x128xf32>
    %607 = tpu.matmul %606, %4, %cst_196 {dimension_numbers = #tpu.dot_dimension_numbers<[1], [0], [0], [1], [0, 0, 1, 1], [], []>} : vector<2x32xbf16>, vector<32x128xbf16>, vector<2x128xf32> -> vector<2x128xf32>
    %608 = arith.addf %605, %607 : vector<2x128xf32>
    %609 = arith.truncf %553 : vector<2x32xf32> to vector<2x32xbf16>
    %cst_197 = arith.constant dense<0.000000e+00> : vector<2x128xf32>
    %610 = tpu.matmul %609, %5, %cst_197 {dimension_numbers = #tpu.dot_dimension_numbers<[1], [0], [0], [1], [0, 0, 1, 1], [], []>} : vector<2x32xbf16>, vector<32x128xbf16>, vector<2x128xf32> -> vector<2x128xf32>
    %611 = arith.addf %608, %610 : vector<2x128xf32>
    %612 = vector.extract_strided_slice %611 {offsets = [0, 0], sizes = [2, 32], strides = [1, 1]} : vector<2x128xf32> to vector<2x32xf32>
    %cst_198 = arith.constant 5.000000e-01 : f32
    %613 = vector.broadcast %cst_198 : f32 to vector<2x32xf32>
    %614 = arith.mulf %613, %612 : vector<2x32xf32>
    %615 = math.tanh %614 : vector<2x32xf32>
    %cst_199 = arith.constant 5.000000e-01 : f32
    %616 = vector.broadcast %cst_199 : f32 to vector<2x32xf32>
    %617 = arith.mulf %616, %615 : vector<2x32xf32>
    %cst_200 = arith.constant 5.000000e-01 : f32
    %618 = vector.broadcast %cst_200 : f32 to vector<2x32xf32>
    %619 = arith.addf %617, %618 : vector<2x32xf32>
    %620 = vector.extract_strided_slice %611 {offsets = [0, 32], sizes = [2, 32], strides = [1, 1]} : vector<2x128xf32> to vector<2x32xf32>
    %cst_201 = arith.constant 5.000000e-01 : f32
    %621 = vector.broadcast %cst_201 : f32 to vector<2x32xf32>
    %622 = arith.mulf %621, %620 : vector<2x32xf32>
    %623 = math.tanh %622 : vector<2x32xf32>
    %cst_202 = arith.constant 5.000000e-01 : f32
    %624 = vector.broadcast %cst_202 : f32 to vector<2x32xf32>
    %625 = arith.mulf %624, %623 : vector<2x32xf32>
    %cst_203 = arith.constant 5.000000e-01 : f32
    %626 = vector.broadcast %cst_203 : f32 to vector<2x32xf32>
    %627 = arith.addf %625, %626 : vector<2x32xf32>
    %628 = vector.extract_strided_slice %611 {offsets = [0, 64], sizes = [2, 32], strides = [1, 1]} : vector<2x128xf32> to vector<2x32xf32>
    %629 = math.tanh %628 : vector<2x32xf32>
    %630 = vector.extract_strided_slice %611 {offsets = [0, 96], sizes = [2, 32], strides = [1, 1]} : vector<2x128xf32> to vector<2x32xf32>
    %cst_204 = arith.constant 5.000000e-01 : f32
    %631 = vector.broadcast %cst_204 : f32 to vector<2x32xf32>
    %632 = arith.mulf %631, %630 : vector<2x32xf32>
    %633 = math.tanh %632 : vector<2x32xf32>
    %cst_205 = arith.constant 5.000000e-01 : f32
    %634 = vector.broadcast %cst_205 : f32 to vector<2x32xf32>
    %635 = arith.mulf %634, %633 : vector<2x32xf32>
    %cst_206 = arith.constant 5.000000e-01 : f32
    %636 = vector.broadcast %cst_206 : f32 to vector<2x32xf32>
    %637 = arith.addf %635, %636 : vector<2x32xf32>
    %638 = arith.mulf %627, %551 : vector<2x32xf32>
    %639 = arith.mulf %619, %629 : vector<2x32xf32>
    %640 = arith.addf %638, %639 : vector<2x32xf32>
    %641 = math.tanh %640 : vector<2x32xf32>
    %642 = arith.mulf %637, %641 : vector<2x32xf32>
    %643 = arith.index_cast %c6_i32 : i32 to index
    %c0_207 = arith.constant 0 : index
    %c0_208 = arith.constant 0 : index
    %644 = vector.load %arg9[%643, %c0_207, %c0_208] : memref<8x2x32xf32, #tpu.memory_space<vmem>>, vector<1x2x32xf32>
    %645 = vector.shape_cast %644 : vector<1x2x32xf32> to vector<2x32xf32>
    %646 = vector.shape_cast %642 : vector<2x32xf32> to vector<1x2x32xf32>
    tpu.vector_store %arg9[%643, %c0_207, %c0_208], %646 {strides = array<i32>} : memref<8x2x32xf32, #tpu.memory_space<vmem>>, vector<1x2x32xf32>,
    %c7_i32 = arith.constant 7 : i32
    %647 = arith.index_cast %c7_i32 : i32 to index
    %c0_209 = arith.constant 0 : index
    %c0_210 = arith.constant 0 : index
    %648 = vector.load %arg2[%647, %c0_209, %c0_210] : memref<8x2x128xbf16, #tpu.memory_space<vmem>>, vector<1x2x128xbf16>
    %649 = vector.shape_cast %648 : vector<1x2x128xbf16> to vector<2x128xbf16>
    %650 = arith.extf %649 : vector<2x128xbf16> to vector<2x128xf32>
    %651 = vector.broadcast %8 : f32 to vector<2x128xf32>
    %652 = arith.mulf %650, %651 : vector<2x128xf32>
    %653 = arith.addf %652, %17 : vector<2x128xf32>
    %654 = arith.truncf %598 : vector<2x32xf32> to vector<2x32xbf16>
    %cst_211 = arith.constant dense<0.000000e+00> : vector<2x128xf32>
    %655 = tpu.matmul %654, %3, %cst_211 {dimension_numbers = #tpu.dot_dimension_numbers<[1], [0], [0], [1], [0, 0, 1, 1], [], []>} : vector<2x32xbf16>, vector<32x128xbf16>, vector<2x128xf32> -> vector<2x128xf32>
    %656 = arith.addf %653, %655 : vector<2x128xf32>
    %657 = vector.extract_strided_slice %656 {offsets = [0, 0], sizes = [2, 32], strides = [1, 1]} : vector<2x128xf32> to vector<2x32xf32>
    %cst_212 = arith.constant 5.000000e-01 : f32
    %658 = vector.broadcast %cst_212 : f32 to vector<2x32xf32>
    %659 = arith.mulf %658, %657 : vector<2x32xf32>
    %660 = math.tanh %659 : vector<2x32xf32>
    %cst_213 = arith.constant 5.000000e-01 : f32
    %661 = vector.broadcast %cst_213 : f32 to vector<2x32xf32>
    %662 = arith.mulf %661, %660 : vector<2x32xf32>
    %cst_214 = arith.constant 5.000000e-01 : f32
    %663 = vector.broadcast %cst_214 : f32 to vector<2x32xf32>
    %664 = arith.addf %662, %663 : vector<2x32xf32>
    %665 = vector.extract_strided_slice %656 {offsets = [0, 32], sizes = [2, 32], strides = [1, 1]} : vector<2x128xf32> to vector<2x32xf32>
    %cst_215 = arith.constant 5.000000e-01 : f32
    %666 = vector.broadcast %cst_215 : f32 to vector<2x32xf32>
    %667 = arith.mulf %666, %665 : vector<2x32xf32>
    %668 = math.tanh %667 : vector<2x32xf32>
    %cst_216 = arith.constant 5.000000e-01 : f32
    %669 = vector.broadcast %cst_216 : f32 to vector<2x32xf32>
    %670 = arith.mulf %669, %668 : vector<2x32xf32>
    %cst_217 = arith.constant 5.000000e-01 : f32
    %671 = vector.broadcast %cst_217 : f32 to vector<2x32xf32>
    %672 = arith.addf %670, %671 : vector<2x32xf32>
    %673 = vector.extract_strided_slice %656 {offsets = [0, 64], sizes = [2, 32], strides = [1, 1]} : vector<2x128xf32> to vector<2x32xf32>
    %674 = math.tanh %673 : vector<2x32xf32>
    %675 = vector.extract_strided_slice %656 {offsets = [0, 96], sizes = [2, 32], strides = [1, 1]} : vector<2x128xf32> to vector<2x32xf32>
    %cst_218 = arith.constant 5.000000e-01 : f32
    %676 = vector.broadcast %cst_218 : f32 to vector<2x32xf32>
    %677 = arith.mulf %676, %675 : vector<2x32xf32>
    %678 = math.tanh %677 : vector<2x32xf32>
    %cst_219 = arith.constant 5.000000e-01 : f32
    %679 = vector.broadcast %cst_219 : f32 to vector<2x32xf32>
    %680 = arith.mulf %679, %678 : vector<2x32xf32>
    %cst_220 = arith.constant 5.000000e-01 : f32
    %681 = vector.broadcast %cst_220 : f32 to vector<2x32xf32>
    %682 = arith.addf %680, %681 : vector<2x32xf32>
    %683 = arith.mulf %672, %596 : vector<2x32xf32>
    %684 = arith.mulf %664, %674 : vector<2x32xf32>
    %685 = arith.addf %683, %684 : vector<2x32xf32>
    %686 = math.tanh %685 : vector<2x32xf32>
    %687 = arith.mulf %682, %686 : vector<2x32xf32>
    %688 = arith.index_cast %c7_i32 : i32 to index
    %c0_221 = arith.constant 0 : index
    %c0_222 = arith.constant 0 : index
    %689 = vector.load %arg3[%688, %c0_221, %c0_222] : memref<8x2x128xbf16, #tpu.memory_space<vmem>>, vector<1x2x128xbf16>
    %690 = vector.shape_cast %689 : vector<1x2x128xbf16> to vector<2x128xbf16>
    %691 = arith.extf %690 : vector<2x128xbf16> to vector<2x128xf32>
    %692 = vector.broadcast %9 : f32 to vector<2x128xf32>
    %693 = arith.mulf %691, %692 : vector<2x128xf32>
    %694 = arith.addf %693, %19 : vector<2x128xf32>
    %695 = arith.truncf %687 : vector<2x32xf32> to vector<2x32xbf16>
    %cst_223 = arith.constant dense<0.000000e+00> : vector<2x128xf32>
    %696 = tpu.matmul %695, %4, %cst_223 {dimension_numbers = #tpu.dot_dimension_numbers<[1], [0], [0], [1], [0, 0, 1, 1], [], []>} : vector<2x32xbf16>, vector<32x128xbf16>, vector<2x128xf32> -> vector<2x128xf32>
    %697 = arith.addf %694, %696 : vector<2x128xf32>
    %698 = arith.truncf %642 : vector<2x32xf32> to vector<2x32xbf16>
    %cst_224 = arith.constant dense<0.000000e+00> : vector<2x128xf32>
    %699 = tpu.matmul %698, %5, %cst_224 {dimension_numbers = #tpu.dot_dimension_numbers<[1], [0], [0], [1], [0, 0, 1, 1], [], []>} : vector<2x32xbf16>, vector<32x128xbf16>, vector<2x128xf32> -> vector<2x128xf32>
    %700 = arith.addf %697, %699 : vector<2x128xf32>
    %701 = vector.extract_strided_slice %700 {offsets = [0, 0], sizes = [2, 32], strides = [1, 1]} : vector<2x128xf32> to vector<2x32xf32>
    %cst_225 = arith.constant 5.000000e-01 : f32
    %702 = vector.broadcast %cst_225 : f32 to vector<2x32xf32>
    %703 = arith.mulf %702, %701 : vector<2x32xf32>
    %704 = math.tanh %703 : vector<2x32xf32>
    %cst_226 = arith.constant 5.000000e-01 : f32
    %705 = vector.broadcast %cst_226 : f32 to vector<2x32xf32>
    %706 = arith.mulf %705, %704 : vector<2x32xf32>
    %cst_227 = arith.constant 5.000000e-01 : f32
    %707 = vector.broadcast %cst_227 : f32 to vector<2x32xf32>
    %708 = arith.addf %706, %707 : vector<2x32xf32>
    %709 = vector.extract_strided_slice %700 {offsets = [0, 32], sizes = [2, 32], strides = [1, 1]} : vector<2x128xf32> to vector<2x32xf32>
    %cst_228 = arith.constant 5.000000e-01 : f32
    %710 = vector.broadcast %cst_228 : f32 to vector<2x32xf32>
    %711 = arith.mulf %710, %709 : vector<2x32xf32>
    %712 = math.tanh %711 : vector<2x32xf32>
    %cst_229 = arith.constant 5.000000e-01 : f32
    %713 = vector.broadcast %cst_229 : f32 to vector<2x32xf32>
    %714 = arith.mulf %713, %712 : vector<2x32xf32>
    %cst_230 = arith.constant 5.000000e-01 : f32
    %715 = vector.broadcast %cst_230 : f32 to vector<2x32xf32>
    %716 = arith.addf %714, %715 : vector<2x32xf32>
    %717 = vector.extract_strided_slice %700 {offsets = [0, 64], sizes = [2, 32], strides = [1, 1]} : vector<2x128xf32> to vector<2x32xf32>
    %718 = math.tanh %717 : vector<2x32xf32>
    %719 = vector.extract_strided_slice %700 {offsets = [0, 96], sizes = [2, 32], strides = [1, 1]} : vector<2x128xf32> to vector<2x32xf32>
    %cst_231 = arith.constant 5.000000e-01 : f32
    %720 = vector.broadcast %cst_231 : f32 to vector<2x32xf32>
    %721 = arith.mulf %720, %719 : vector<2x32xf32>
    %722 = math.tanh %721 : vector<2x32xf32>
    %cst_232 = arith.constant 5.000000e-01 : f32
    %723 = vector.broadcast %cst_232 : f32 to vector<2x32xf32>
    %724 = arith.mulf %723, %722 : vector<2x32xf32>
    %cst_233 = arith.constant 5.000000e-01 : f32
    %725 = vector.broadcast %cst_233 : f32 to vector<2x32xf32>
    %726 = arith.addf %724, %725 : vector<2x32xf32>
    %727 = arith.mulf %716, %640 : vector<2x32xf32>
    %728 = arith.mulf %708, %718 : vector<2x32xf32>
    %729 = arith.addf %727, %728 : vector<2x32xf32>
    %730 = math.tanh %729 : vector<2x32xf32>
    %731 = arith.mulf %726, %730 : vector<2x32xf32>
    %732 = arith.index_cast %c7_i32 : i32 to index
    %c0_234 = arith.constant 0 : index
    %c0_235 = arith.constant 0 : index
    %733 = vector.load %arg9[%732, %c0_234, %c0_235] : memref<8x2x32xf32, #tpu.memory_space<vmem>>, vector<1x2x32xf32>
    %734 = vector.shape_cast %733 : vector<1x2x32xf32> to vector<2x32xf32>
    %735 = vector.shape_cast %731 : vector<2x32xf32> to vector<1x2x32xf32>
    tpu.vector_store %arg9[%732, %c0_234, %c0_235], %735 {strides = array<i32>} : memref<8x2x32xf32, #tpu.memory_space<vmem>>, vector<1x2x32xf32>,
    %c8_i32 = arith.constant 8 : i32
    %c0_236 = arith.constant 0 : index
    %c0_237 = arith.constant 0 : index
    %736 = vector.load %arg10[%c0_236, %c0_237] : memref<2x32xf32, #tpu.memory_space<vmem>>, vector<2x32xf32>
    tpu.vector_store %arg10[%c0_236, %c0_237], %687 {strides = array<i32>} : memref<2x32xf32, #tpu.memory_space<vmem>>, vector<2x32xf32>,
    %c0_238 = arith.constant 0 : index
    %c0_239 = arith.constant 0 : index
    %737 = vector.load %arg11[%c0_238, %c0_239] : memref<2x32xf32, #tpu.memory_space<vmem>>, vector<2x32xf32>
    tpu.vector_store %arg11[%c0_238, %c0_239], %685 {strides = array<i32>} : memref<2x32xf32, #tpu.memory_space<vmem>>, vector<2x32xf32>,
    %c0_240 = arith.constant 0 : index
    %c0_241 = arith.constant 0 : index
    %738 = vector.load %arg12[%c0_240, %c0_241] : memref<2x32xf32, #tpu.memory_space<vmem>>, vector<2x32xf32>
    tpu.vector_store %arg12[%c0_240, %c0_241], %731 {strides = array<i32>} : memref<2x32xf32, #tpu.memory_space<vmem>>, vector<2x32xf32>,
    %c0_242 = arith.constant 0 : index
    %c0_243 = arith.constant 0 : index
    %739 = vector.load %arg13[%c0_242, %c0_243] : memref<2x32xf32, #tpu.memory_space<vmem>>, vector<2x32xf32>
    tpu.vector_store %arg13[%c0_242, %c0_243], %729 {strides = array<i32>} : memref<2x32xf32, #tpu.memory_space<vmem>>, vector<2x32xf32>,
    return
  }
  func.func @transform_0(%arg0: i32, %arg1: i32) -> (i32, i32, i32) {
    %c0_i32 = arith.constant 0 : i32
    %0 = arith.minsi %arg1, %c0_i32 : i32
    %c0_i32_0 = arith.constant 0 : i32
    %c0_i32_1 = arith.constant 0 : i32
    return %0, %arg0, %c0_i32_0 : i32, i32, i32
  }
  func.func @transform_1(%arg0: i32, %arg1: i32) -> (i32, i32, i32) {
    %c1_i32 = arith.constant 1 : i32
    %0 = arith.subi %arg1, %c1_i32 : i32
    %c0_i32 = arith.constant 0 : i32
    %1 = arith.maxsi %0, %c0_i32 : i32
    %c0_i32_0 = arith.constant 0 : i32
    %c0_i32_1 = arith.constant 0 : i32
    return %1, %arg0, %c0_i32_0 : i32, i32, i32
  }
  func.func @transform_2(%arg0: i32, %arg1: i32) -> (i32, i32) {
    %c0_i32 = arith.constant 0 : i32
    %c0_i32_0 = arith.constant 0 : i32
    %c0_i32_1 = arith.constant 0 : i32
    return %c0_i32, %c0_i32_0 : i32, i32
  }
  func.func @transform_3(%arg0: i32, %arg1: i32) -> (i32, i32) {
    %c0_i32 = arith.constant 0 : i32
    %c0_i32_0 = arith.constant 0 : i32
    %c0_i32_1 = arith.constant 0 : i32
    return %c0_i32, %c0_i32_0 : i32, i32
  }
  func.func @transform_4(%arg0: i32, %arg1: i32) -> (i32, i32) {
    %c0_i32 = arith.constant 0 : i32
    %c0_i32_0 = arith.constant 0 : i32
    %c0_i32_1 = arith.constant 0 : i32
    return %c0_i32, %c0_i32_0 : i32, i32
  }
  func.func @transform_5(%arg0: i32, %arg1: i32) -> (i32, i32) {
    %c0_i32 = arith.constant 0 : i32
    %c0_i32_0 = arith.constant 0 : i32
    %c0_i32_1 = arith.constant 0 : i32
    return %c0_i32, %c0_i32_0 : i32, i32
  }
  func.func @transform_6(%arg0: i32, %arg1: i32) -> (i32, i32) {
    %c0_i32 = arith.constant 0 : i32
    %c0_i32_0 = arith.constant 0 : i32
    %c0_i32_1 = arith.constant 0 : i32
    return %c0_i32, %c0_i32_0 : i32, i32
  }
  func.func @transform_7(%arg0: i32, %arg1: i32) -> (i32, i32, i32) {
    %c1_i32 = arith.constant 1 : i32
    %0 = arith.subi %arg1, %c1_i32 : i32
    %c0_i32 = arith.constant 0 : i32
    %1 = arith.maxsi %0, %c0_i32 : i32
    %c0_i32_0 = arith.constant 0 : i32
    %c0_i32_1 = arith.constant 0 : i32
    return %1, %arg0, %c0_i32_0 : i32, i32, i32
  }
}

</mosaic_0001>

<bundles_post_ra>
// kernel: s2vt_forward.9
= control target key start
LH: loop header
LB: loop body
LE: loop exit
PB: predicated region body
PF: predicated region fallthrough
CT: control target
= control target key end

     0   :  { %v210_v0 = vmov 0.0   ;;  %vm211_vm0 = vmmov 0   ;;  %s268_s1 = inlined_call_operand.vmem [shape: bf16[128,128], index: 1, kind: input, shape index: {}]   ;;  %s269_s0 = inlined_call_operand.vmem [shape: bf16[16,128], index: 0, kind: input, shape index: {}]   ;;  %s270_s2 = inlined_call_operand.vmem [shape: f32[1,128], index: 2, kind: input, shape index: {}]   ;;  %s271_s3 = inlined_call_operand.vmem [shape: f32[16,128], index: 3, kind: output, shape index: {}]  }
   0x1   :  { %179 = vmatprep.subr.bf16.mxu0 %v210_v0  ;;  %v201_v1 = vld [vmem:[%s268_s1] sm:$0xff]   ;;  %195 = vmatprep.mubr.msk.bf16.mxu0 %vm211_vm0, %v210_v0  ;;  %v202_v2 = vld [vmem:[%s268_s1 + $0x8] sm:$0xff]   ;;  %v203_v3 = vld [vmem:[%s268_s1 + $0x10] sm:$0xff]  }
   0x2   :  { %180 = vmatpush3.bf16.msra.mxu0 %v201_v1  ;;  %v204_v4 = vld [vmem:[%s268_s1 + $0x18] sm:$0xff]   ;;  %v205_v5 = vld [vmem:[%s268_s1 + $0x20] sm:$0xff]   ;;  %v206_v6 = vld [vmem:[%s268_s1 + $0x28] sm:$0xff]  }
   0x3   :  { %181 = vmatprep.subr.bf16.mxu0 %v210_v0  ;;  %v207_v7 = vld [vmem:[%s268_s1 + $0x30] sm:$0xff]   ;;  %v208_v8 = vld [vmem:[%s268_s1 + $0x38] sm:$0xff]   ;;  %v209_v9 = vld [vmem:[%s269_s0] sm:$0xff]  }
   0x4   :  { %v169_v10 = vld [vmem:[%s270_s2] ss:$0 sm:$0xff] }
   0x6   :  { %182 = vmatpush3.bf16.msra.mxu0 %v202_v2 }
   0x7   :  { %183 = vmatprep.subr.bf16.mxu0 %v210_v0 }
   0xa   :  { %184 = vmatpush3.bf16.msra.mxu0 %v203_v3 }
   0xb   :  { %185 = vmatprep.subr.bf16.mxu0 %v210_v0 }
   0xe   :  { %186 = vmatpush3.bf16.msra.mxu0 %v204_v4 }
   0xf   :  { %187 = vmatprep.subr.bf16.mxu0 %v210_v0 }
  0x12   :  { %188 = vmatpush3.bf16.msra.mxu0 %v205_v5 }
  0x13   :  { %189 = vmatprep.subr.bf16.mxu0 %v210_v0 }
  0x16   :  { %190 = vmatpush3.bf16.msra.mxu0 %v206_v6 }
  0x17   :  { %191 = vmatprep.subr.bf16.mxu0 %v210_v0 }
  0x1a   :  { %192 = vmatpush3.bf16.msra.mxu0 %v207_v7 }
  0x1b   :  { %193 = vmatprep.subr.bf16.mxu0 %v210_v0 }
  0x1e   :  { %194 = vmatpush3.bf16.msra.mxu0 %v208_v8 }
  0x21   :  { %196 = vmatmul.mubr.bf16.vlgmr.msra.gmra.mrb[0].mxu0 %v209_v9 }
  0xf4   :  { %v129_v11 = vpop.f32.mrb[0].mxu0 }
  0xf5   :  { %v152_v12 = vadd.f32 %v169_v10, %v129_v11  ;;  %v197_v13 = vpop.f32.mrb[1].mxu0 }
  0xf6   :  { %v132_v14 = vpop.f32.mrb[2].mxu0 }
  0xf7   :  { %154 = vst [vmem:[%s271_s3] sm:$0xff] %v152_v12  ;;  %v153_v15 = vadd.f32 %v169_v10, %v132_v14  ;;  %v198_v16 = vpop.f32.mrb[3].mxu0 }
  0xf9   :  { %155 = vst [vmem:[%s271_s3 + $0x8] sm:$0xff] %v153_v15 }

// kernel: s2vt_forward.7
= control target key start
LH: loop header
LB: loop body
LE: loop exit
PB: predicated region body
PF: predicated region fallthrough
CT: control target
= control target key end

     0   :  { %v227_v0 = vmov 0.0   ;;  %vm228_vm0 = vmmov 0   ;;  %s282_s1 = inlined_call_operand.vmem [shape: bf16[128,128], index: 1, kind: input, shape index: {}]   ;;  %s283_s0 = inlined_call_operand.vmem [shape: bf16[16,128], index: 0, kind: input, shape index: {}]   ;;  %s284_s2 = inlined_call_operand.vmem [shape: f32[1,128], index: 2, kind: input, shape index: {}]   ;;  %s285_s3 = inlined_call_operand.vmem [shape: bf16[16,128], index: 3, kind: output, shape index: {}]  }
   0x1   :  { %196 = vmatprep.subr.bf16.mxu0 %v227_v0  ;;  %v218_v1 = vld [vmem:[%s282_s1] sm:$0xff]   ;;  %212 = vmatprep.mubr.msk.bf16.mxu0 %vm228_vm0, %v227_v0  ;;  %v219_v2 = vld [vmem:[%s282_s1 + $0x8] sm:$0xff]   ;;  %v220_v3 = vld [vmem:[%s282_s1 + $0x10] sm:$0xff]  }
   0x2   :  { %197 = vmatpush3.bf16.msra.mxu0 %v218_v1  ;;  %v221_v4 = vld [vmem:[%s282_s1 + $0x18] sm:$0xff]   ;;  %v222_v5 = vld [vmem:[%s282_s1 + $0x20] sm:$0xff]   ;;  %v223_v6 = vld [vmem:[%s282_s1 + $0x28] sm:$0xff]  }
   0x3   :  { %198 = vmatprep.subr.bf16.mxu0 %v227_v0  ;;  %v224_v7 = vld [vmem:[%s282_s1 + $0x30] sm:$0xff]   ;;  %v225_v8 = vld [vmem:[%s282_s1 + $0x38] sm:$0xff]   ;;  %v226_v9 = vld [vmem:[%s283_s0] sm:$0xff]  }
   0x4   :  { %v177_v11 = vld [vmem:[%s284_s2] ss:$0 sm:$0xff] }
   0x6   :  { %199 = vmatpush3.bf16.msra.mxu0 %v219_v2 }
   0x7   :  { %200 = vmatprep.subr.bf16.mxu0 %v227_v0 }
   0xa   :  { %201 = vmatpush3.bf16.msra.mxu0 %v220_v3 }
   0xb   :  { %202 = vmatprep.subr.bf16.mxu0 %v227_v0 }
   0xe   :  { %203 = vmatpush3.bf16.msra.mxu0 %v221_v4 }
   0xf   :  { %204 = vmatprep.subr.bf16.mxu0 %v227_v0 }
  0x12   :  { %205 = vmatpush3.bf16.msra.mxu0 %v222_v5 }
  0x13   :  { %206 = vmatprep.subr.bf16.mxu0 %v227_v0 }
  0x16   :  { %207 = vmatpush3.bf16.msra.mxu0 %v223_v6 }
  0x17   :  { %208 = vmatprep.subr.bf16.mxu0 %v227_v0 }
  0x1a   :  { %209 = vmatpush3.bf16.msra.mxu0 %v224_v7 }
  0x1b   :  { %210 = vmatprep.subr.bf16.mxu0 %v227_v0 }
  0x1e   :  { %211 = vmatpush3.bf16.msra.mxu0 %v225_v8 }
  0x21   :  { %213 = vmatmul.mubr.bf16.vlgmr.msra.gmra.mrb[0].mxu0 %v226_v9 }
  0xf4   :  { %v129_v10 = vpop.f32.mrb[0].mxu0 }
  0xf5   :  { %v214_v12 = vpop.f32.mrb[1].mxu0  ;;  %v152_v14 = vadd.f32 %v177_v11, %v129_v10 }
  0xf6   :  { %v132_v13 = vpop.f32.mrb[2].mxu0 }
  0xf7   :  { %v153_v15 = vadd.f32 %v177_v11, %v132_v13  ;;  %v215_v16 = vpop.f32.mrb[3].mxu0 }
  0xf9   :  { %v185_v17 = vpack.c.bf16 %v153_v15, %v152_v14 }
  0xfb   :  { %186 = vst [vmem:[%s285_s3] sm:$0xff] %v185_v17  }

// kernel: s2vt_forward.8
= control target key start
LH: loop header
LB: loop body
LE: loop exit
PB: predicated region body
PF: predicated region fallthrough
CT: control target
= control target key end

     0   :  { %s2844_s24 = smov 0   ;;  %s2846_s25 = smov 0   ;;  %s3339_s0 = inlined_call_operand.vmem [shape: bf16[8,2,128], index: 0, kind: input, shape index: {}]   ;;  %s3340_s1 = inlined_call_operand.vmem [shape: bf16[8,2,128], index: 1, kind: input, shape index: {}]   ;;  %s3341_s2 = inlined_call_operand.vmem [shape: bf16[32,128], index: 2, kind: input, shape index: {}]   ;;  %s3342_s3 = inlined_call_operand.vmem [shape: bf16[32,128], index: 3, kind: input, shape index: {}]   ;;  %s3343_s4 = inlined_call_operand.vmem [shape: bf16[32,128], index: 4, kind: input, shape index: {}]   ;;  %s3344_s5 = inlined_call_operand.vmem [shape: f32[1,128], index: 5, kind: input, shape index: {}]   ;;  %s3345_s6 = inlined_call_operand.vmem [shape: f32[1,128], index: 6, kind: input, shape index: {}]   ;;  %s3346_s7 = inlined_call_operand.vmem [shape: f32[8,2,32], index: 7, kind: output, shape index: {}]  }
   0x1   :  { %s2848_s26 = smov 0  }
   0x2 LB: > { %s26_s27 = sadd.s32 1, %s2791_s25  ;;  %p2269_p0 = scmp.ge.s32.totalorder %s2795_s26, 1  ;;  %s2795_s26 = sphi %s2848_s26, %s17_s26   ;;  %s2791_s25 = sphi %s2846_s25, %s3348_s25   ;;  %s2787_s24 = sphi %s2844_s24, %s3347_s24  }
   0x3   : > { %p27_p1 = scmp.ge.s32.totalorder %s26_s27, 2  ;;  %p297_p2 = scmp.lt.s32.totalorder %s2795_s26, 3 }
   0x5   : > { %s3350_s27 = smov (%p27_p1, %s26_s27), 0  ;;  %p298_p3 = pnand %p2269_p0, %p297_p2 }
   0x6   : > { %p349_p4 = scmp.lt.s32.totalorder (!%p298_p3), %s2787_s24, 0  ;;  %s2271_s28 = sadd.s32 (!%p298_p3), 4294967295, %s2787_s24 }
   0x7   : > { %301 = sbr.rel (%p298_p3) target bundleno = 6387 (0x18f3), region = 48  ;;  %p362_p5 = scmp.gt.s32.totalorder (!%p298_p3), %s2271_s28, 0 }
   0x8   : > { %p2276_p8 = scmp.ne.s32.totalorder (!%p298_p3), %s2787_s24, 0 }
   0xe   : > { %s350_s29 = scalar_select %p349_p4, %s2787_s24, 0 }
   0xf   : > { %s3352_s28 = smov (!%p362_p5, %s2271_s28), 0  ;;  %vm395_vm0 = vcmask (!%p2276_p8), 254976   ;;  %v2797_v0 = vmov (!%p2276_p8), 0.0  }
  0x10   : > { %s2270_s30 = sshll.u32 %s350_s29, 3  ;;  %s2272_s8 = sshll.u32 %s3352_s28, 3  ;;  %396 = vst.msk [vmem:[#allocation2] sm:$0x3] (!%p2276_p8), %vm395_vm0, %v2797_v0  ;;  %397 = vst.msk [vmem:[#allocation3] sm:$0x3] (!%p2276_p8), %vm395_vm0, %v2797_v0 }
  0x11   : > { %p352_p6 = scmp.lt.s32.totalorder %s2270_s30, 7  ;;  %p365_p7 = scmp.lt.s32.totalorder %s2272_s8, 7  ;;  %398 = vst.msk [vmem:[#allocation4] sm:$0x3] (!%p2276_p8), %vm395_vm0, %v2797_v0  ;;  %399 = vst.msk [vmem:[#allocation5] sm:$0x3] (!%p2276_p8), %vm395_vm0, %v2797_v0 }
  0x12   : > { %394 = sbr.rel (%p2276_p8) target bundleno = 25 (0x19), region = 52 }
  0x13   : > { %s3354_s30 = smov (!%p352_p6, %s2270_s30), 7  ;;  %s3356_s8 = smov (!%p365_p7, %s2272_s8), 7 }
  0x14   : > { %s2870_s11 = scalar_lea.vmem %s3339_s0, %s3354_s30  ;;  %s2875_s14 = scalar_lea.vmem %s3340_s1, %s3356_s8 }
  0x15   : > { %s2275_s15 = sshll.u32 %s3356_s8, 1 }
  0x16   : > { %s2880_s18 = scalar_lea.vmem %s3346_s7, %s2275_s15 }
  0x19 PF: > { %v2886_v1 = vld [vmem:[%s3341_s2] sm:$0xff]   ;;  %v2798_v2 = vmov 0.0   ;;  %v2894_v3 = vld [vmem:[%s3341_s2 + $0x8] sm:$0xff]   ;;  %vm2799_vm1 = vmmov 0   ;;  %vm455_vm2 = vcmask 261120   ;;  %p412_p9 = scmp.lt.s32.totalorder %s2787_s24, 1 }
  0x1a   : > { %2406 = vmatprep.subr.bf16.mxu1 %v2798_v2  ;;  %2430 = vmatprep.subr.bf16.mxu0 %v2798_v2  ;;  %v434_v4 = vld [vmem:[#allocation2] sm:$0x3]  ;;  %s2800_s24 = smov 64   ;;  %s2801_s9 = smov 32   ;;  %v2939_v32 = vld [vmem:[%s3342_s3 + $0x8] sm:$0xff]   ;;  %vm698_vm3 = vcmask 254976  }
  0x1b   : > { %2407 = vmatpush3.bf16.msra.mxu1 %v2886_v1  ;;  %2410 = vmatprep.mubr.msk.bf16.mxu1 %vm2799_vm1, %v2798_v2  ;;  %v442_v5 = vpack.c.bf16 %v434_v4, %v434_v4  ;;  %s413_s23 = scalar_select %p412_p9, 1, 0  ;;  %v438_v6 = vld [vmem:[%s2870_s11] sm:$0x1]  ;;  %v2957_v39 = vld [vmem:[%s3343_s4 + $0x8] sm:$0xff]  }
  0x1c   : > { %2408 = vmatprep.subr.bf16.mxu1 %v2798_v2  ;;  %2431 = vmatpush3.bf16.msra.mxu0 %v2886_v1  ;;  %v439_v7 = vunpack.c.l.bf16 %v438_v6  ;;  %v2277_v8 = vld [vmem:[%s3344_s5] ss:$0 sm:$0xff]  ;;  %v2282_v20 = vld.sshfl [vmem:[#allocation3] sm:$0x3 pattern:$0x76325410] }
  0x1d   : > { %2432 = vmatprep.subr.bf16.mxu0 %v2798_v2  ;;  %2434 = vmatprep.mubr.msk.bf16.mxu0 %vm2799_vm1, %v2798_v2  ;;  %s414_s28 = scvt.s32.f32 %s413_s23  ;;  %v2933_v31 = vld [vmem:[%s3342_s3] sm:$0xff]  }
  0x1e   : > { %v2949_v37 = vld [vmem:[%s3343_s4] sm:$0xff]  }
  0x1f   : > { %2409 = vmatpush3.bf16.msra.mxu1 %v2894_v3  ;;  %s415_s29 = ssub.f32 1.0, %s414_s28  ;;  %v2917_v10 = vstv %s414_s28  ;;  %v436_v40 = vld [vmem:[#allocation4] sm:$0x3]  ;;  %v2290_v42 = vld [vmem:[%s2870_s11 + $0x1] sm:$0x1] }
  0x20   : > { %2414 = vmatprep.subr.bf16.mxu1 %v2798_v2  ;;  %2433 = vmatpush3.bf16.msra.mxu0 %v2894_v3  ;;  %v440_v12 = vmul.f32 %v439_v7, %v2917_v10  ;;  %v597_v41 = vpack.c.bf16 %v436_v40, %v436_v40  ;;  %v702_v43 = vunpack.c.l.bf16 %v2290_v42  ;;  %v533_v46 = vld [vmem:[%s2875_s14] sm:$0x1]  ;;  %v2289_v0 = vld.sshfl [vmem:[#allocation5] sm:$0x3 pattern:$0x76325410] }
  0x21   : > { %2438 = vmatprep.subr.bf16.mxu0 %v2798_v2  ;;  %v2915_v9 = vstv %s415_s29  ;;  %v534_v50 = vunpack.c.l.bf16 %v533_v46  ;;  %v2278_v52 = vld [vmem:[%s3345_s6] ss:$0 sm:$0xff]  ;;  %v2296_v40 = vld [vmem:[%s2870_s11 + $0x2] sm:$0x1] }
  0x22   : > { %2411 = vmatmul.mubr.msk.bf16.vlgmr.msra.gmra.mrb[0].mxu1 %vm455_vm2, %v442_v5  ;;  %v2920_v11 = vmul.f32 %v2277_v8, %v2915_v9  ;;  %v703_v44 = vmul.f32 %v702_v43, %v2917_v10  ;;  %v2985_v54 = vmul.f32 %v2278_v52, %v2917_v10 }
  0x23   : > { %2418 = vmatprep.mubr.msk.bf16.mxu1 %vm2799_vm1, %v2798_v2  ;;  %2415 = vmatpush3.bf16.msra.mxu1 %v2933_v31  ;;  %v535_v55 = vmul.f32 %v534_v50, %v2915_v9 }
  0x24   : > { %v441_v13 = vadd.f32 %v440_v12, %v2920_v11  ;;  %2416 = vmatprep.subr.bf16.mxu1 %v2798_v2  ;;  %v704_v45 = vadd.f32 %v703_v44, %v2920_v11  ;;  %v2292_v44 = vld [vmem:[%s2875_s14 + $0x1] sm:$0x1] }
  0x25   : > { %v536_v56 = vadd.f32 %v535_v55, %v2985_v54 }
  0x27   : > { %2417 = vmatpush3.bf16.msra.mxu1 %v2939_v32 }
  0x28   : > { %2422 = vmatprep.subr.bf16.mxu1 %v2798_v2 }
  0xf5   : > { %v493_v14 = vpop.f32.mrb[0].mxu1 }
  0xf6   : > { %v499_v15 = vadd.f32 %v493_v14, %v441_v13  ;;  %v2412_v16 = vpop.f32.mrb[1].mxu1 }
  0xf7   : > { %v496_v17 = vpop.f32.mrb[2].mxu1 }
  0xf8   : > { %2675 = vtanh.f32 %v499_v15  ;;  %v2413_v18 = vpop.f32.mrb[3].mxu1  ;;  %v500_v21 = vmul.f32 0.5, %v499_v15 }
  0xfa   : > { %2677 = vtanh.f32 %v500_v21 }
 0x102   : > { %v2676_v19 = vpop.eup %2675 }
 0x103   : > { %518 = vrot.lane.b32.xlu0 %v2676_v19, %s2800_s24 }
 0x104   : > { %v2678_v22 = vpop.eup %2677 }
 0x105   : > { %v502_v23 = vmul.f32 0.5, %v2678_v22 }
 0x107   : > { %513 = vrot.lane.b32.xlu0 %v2282_v20, %s2801_s9  ;;  %v503_v24 = vadd.f32 0.5, %v502_v23 }
 0x175   : > { %v519_v25 = vpop.permute.xlu0 %518 }
 0x176   : > { %v521_v26 = vmul.f32 %v519_v25, %v503_v24 }
 0x178   : > { %523 = vrot.lane.b32.xlu1 %v521_v26, %s2801_s9 }
 0x179   : > { %v514_v27 = vpop.permute.xlu0 %513 }
 0x17a   : > { %v516_v28 = vmul.f32 %v514_v27, %v503_v24 }
 0x1ea   : > { %v524_v29 = vpop.permute.xlu1 %523 }
 0x1eb   : > { %v2927_v30 = vadd.f32 %v524_v29, %v516_v28 }
 0x1ed   : > { %2679 = vtanh.f32 %v2927_v30 }
 0x1f7   : > { %v2680_v33 = vpop.eup %2679 }
 0x1f8   : > { %529 = vrot.lane.b32.xlu1 %v2680_v33, %s2800_s24 }
 0x26a   : > { %v530_v34 = vpop.permute.xlu1 %529 }
 0x26b   : > { %v532_v35 = vmul.f32 %v530_v34, %v503_v24 }
 0x26d   : > { %v537_v36 = vpack.c.bf16 %v532_v35, %v532_v35 }
 0x26f   : > { %539 = vrot.lane.b32.xlu0 %v537_v36, %s2801_s9 }
 0x2e1   : > { %v540_v38 = vpop.permute.xlu0 %539 }
 0x2e2   : > { %2419 = vmatmul.mubr.msk.bf16.vlgmr.msra.gmra.mrb[4].mxu1 %vm455_vm2, %v540_v38  ;;  %2435 = vmatmul.mubr.msk.bf16.vlgmr.msra.gmra.mrb[0].mxu0 %vm455_vm2, %v540_v38 }
 0x2e3   : > { %2423 = vmatpush3.bf16.msra.mxu1 %v2949_v37  ;;  %2426 = vmatprep.mubr.msk.bf16.mxu1 %vm2799_vm1, %v2798_v2 }
 0x2e4   : > { %2424 = vmatprep.subr.bf16.mxu1 %v2798_v2  ;;  %2439 = vmatpush3.bf16.msra.mxu0 %v2933_v31 }
 0x2e5   : > { %2440 = vmatprep.subr.bf16.mxu0 %v2798_v2  ;;  %2442 = vmatprep.mubr.msk.bf16.mxu0 %vm2799_vm1, %v2798_v2 }
 0x2e7   : > { %2425 = vmatpush3.bf16.msra.mxu1 %v2957_v39 }
 0x2e8   : > { %2454 = vmatprep.subr.bf16.mxu1 %v2798_v2  ;;  %2441 = vmatpush3.bf16.msra.mxu0 %v2939_v32 }
 0x2e9   : > { %2446 = vmatprep.subr.bf16.mxu0 %v2798_v2 }
 0x2ee   : > { %2427 = vmatmul.mubr.msk.bf16.vlgmr.msra.gmra.mrb[4].mxu1 %vm455_vm2, %v597_v41  ;;  %v906_v41 = vunpack.c.l.bf16 %v2296_v40  ;;  %v2298_v40 = vld [vmem:[%s2875_s14 + $0x2] sm:$0x1] }
 0x2ef   : > { %2455 = vmatpush3.bf16.msra.mxu1 %v2886_v1  ;;  %2458 = vmatprep.mubr.msk.bf16.mxu1 %vm2799_vm1, %v2798_v2 }
 0x2f0   : > { %2456 = vmatprep.subr.bf16.mxu1 %v2798_v2  ;;  %v907_v42 = vmul.f32 %v906_v41, %v2917_v10 }
 0x2f2   : > { %v908_v43 = vadd.f32 %v907_v42, %v2920_v11 }
 0x2f3   : > { %2457 = vmatpush3.bf16.msra.mxu1 %v2894_v3 }
 0x2f4   : > { %2462 = vmatprep.subr.bf16.mxu1 %v2798_v2 }
 0x3b5   : > { %v739_v47 = vpop.f32.mrb[0].mxu0 }
 0x3b6   : > { %v745_v48 = vadd.f32 %v739_v47, %v704_v45  ;;  %v2436_v49 = vpop.f32.mrb[1].mxu0 }
 0x3b7   : > { %v742_v51 = vpop.f32.mrb[2].mxu0 }
 0x3b8   : > { %2681 = vtanh.f32 %v745_v48  ;;  %v2437_v53 = vpop.f32.mrb[3].mxu0  ;;  %v746_v4 = vmul.f32 0.5, %v745_v48  ;;  %v770_v48 = vunpack.c.l.bf16 %v2292_v44  ;;  %v974_v44 = vunpack.c.l.bf16 %v2298_v40 }
 0x3ba   : > { %v771_v51 = vmul.f32 %v770_v48, %v2915_v9 }
 0x3bc   : > { %v772_v52 = vadd.f32 %v771_v51, %v2985_v54 }
 0x3c1   : > { %v647_v57 = vpop.f32.mrb[4].mxu1 }
 0x3c2   : > { %v2682_v58 = vpop.eup %2681  ;;  %v2598_v59 = vadd.f32 %v647_v57, %v536_v56  ;;  %v2428_v60 = vpop.f32.mrb[5].mxu1 }
 0x3c3   : > { %753 = vrot.lane.b32.xlu1 %v2682_v58, %s2800_s24  ;;  %v650_v61 = vpop.f32.mrb[6].mxu1 }
 0x3c4   : > { %2683 = vtanh.f32 %v2598_v59  ;;  %v2429_v62 = vpop.f32.mrb[7].mxu1  ;;  %v654_v5 = vmul.f32 0.5, %v2598_v59 }
 0x3c5   : > { %2685 = vtanh.f32 %v746_v4 }
 0x3c6   : > { %2687 = vtanh.f32 %v654_v5 }
 0x3ce   : > { %v2684_v63 = vpop.eup %2683 }
 0x3cf   : > { %672 = vrot.lane.b32.xlu0 %v2684_v63, %s2800_s24  ;;  %v2686_v6 = vpop.eup %2685 }
 0x3d0   : > { %v748_v7 = vmul.f32 0.5, %v2686_v6  ;;  %v2688_v14 = vpop.eup %2687 }
 0x3d1   : > { %v656_v15 = vmul.f32 0.5, %v2688_v14 }
 0x3d2   : > { %v749_v8 = vadd.f32 0.5, %v748_v7 }
 0x3d3   : > { %667 = vrot.lane.b32.xlu0 %v2289_v0, %s2801_s9  ;;  %v657_v16 = vadd.f32 0.5, %v656_v15 }
 0x3d4   : > { %v751_v19 = vmul.f32 %v749_v8, %v2927_v30 }
 0x435   : > { %v754_v12 = vpop.permute.xlu1 %753 }
 0x436   : > { %v756_v13 = vmul.f32 %v754_v12, %v749_v8 }
 0x438   : > { %758 = vrot.lane.b32.xlu1 %v756_v13, %s2801_s9 }
 0x441   : > { %v673_v17 = vpop.permute.xlu0 %672 }
 0x442   : > { %v675_v18 = vmul.f32 %v673_v17, %v657_v16 }
 0x444   : > { %677 = vrot.lane.b32.xlu1 %v675_v18, %s2801_s9 }
 0x445   : > { %v668_v22 = vpop.permute.xlu0 %667 }
 0x446   : > { %v670_v23 = vmul.f32 %v668_v22, %v657_v16 }
 0x4aa   : > { %v759_v20 = vpop.permute.xlu1 %758 }
 0x4ab   : > { %v2995_v21 = vadd.f32 %v759_v20, %v751_v19 }
 0x4ad   : > { %2689 = vtanh.f32 %v2995_v21 }
 0x4b6   : > { %v678_v24 = vpop.permute.xlu1 %677 }
 0x4b7   : > { %v2690_v25 = vpop.eup %2689  ;;  %v2998_v26 = vadd.f32 %v678_v24, %v670_v23 }
 0x4b8   : > { %764 = vrot.lane.b32.xlu0 %v2690_v25, %s2800_s24 }
 0x4b9   : > { %2691 = vtanh.f32 %v2998_v26 }
 0x4c3   : > { %v2692_v27 = vpop.eup %2691 }
 0x4c4   : > { %683 = vrot.lane.b32.xlu1 %v2692_v27, %s2800_s24 }
 0x52a   : > { %v765_v28 = vpop.permute.xlu0 %764 }
 0x52b   : > { %v767_v29 = vmul.f32 %v765_v28, %v749_v8 }
 0x52d   : > { %v773_v30 = vpack.c.bf16 %v767_v29, %v767_v29 }
 0x52f   : > { %775 = vrot.lane.b32.xlu0 %v773_v30, %s2801_s9 }
 0x536   : > { %v684_v33 = vpop.permute.xlu1 %683 }
 0x537   : > { %v3004_v34 = vmul.f32 %v684_v33, %v657_v16  ;;  %v2302_v33 = vld [vmem:[%s2870_s11 + $0x3] sm:$0x1] }
 0x539   : > { %v821_v35 = vpack.c.bf16 %v3004_v34, %v3004_v34 }
 0x53b   : > { %823 = vrot.lane.b32.xlu1 %v821_v35, %s2801_s9  ;;  %v1110_v35 = vunpack.c.l.bf16 %v2302_v33 }
 0x5a1   : > { %v776_v36 = vpop.permute.xlu0 %775 }
 0x5a2   : > { %2443 = vmatmul.mubr.msk.bf16.vlgmr.msra.gmra.mrb[4].mxu0 %vm455_vm2, %v776_v36  ;;  %2459 = vmatmul.mubr.msk.bf16.vlgmr.msra.gmra.mrb[8].mxu1 %vm455_vm2, %v776_v36  ;;  %v1111_v36 = vmul.f32 %v1110_v35, %v2917_v10  ;;  %v2304_v35 = vld [vmem:[%s2875_s14 + $0x3] sm:$0x1] }
 0x5a3   : > { %2447 = vmatpush3.bf16.msra.mxu0 %v2949_v37  ;;  %2450 = vmatprep.mubr.msk.bf16.mxu0 %vm2799_vm1, %v2798_v2 }
 0x5a4   : > { %2448 = vmatprep.subr.bf16.mxu0 %v2798_v2  ;;  %2463 = vmatpush3.bf16.msra.mxu1 %v2933_v31 }
 0x5a5   : > { %2464 = vmatprep.subr.bf16.mxu1 %v2798_v2  ;;  %2466 = vmatprep.mubr.msk.bf16.mxu1 %vm2799_vm1, %v2798_v2 }
 0x5a7   : > { %2449 = vmatpush3.bf16.msra.mxu0 %v2957_v39 }
 0x5a8   : > { %2478 = vmatprep.subr.bf16.mxu0 %v2798_v2  ;;  %2465 = vmatpush3.bf16.msra.mxu1 %v2939_v32 }
 0x5a9   : > { %2470 = vmatprep.subr.bf16.mxu1 %v2798_v2 }
 0x5ad   : > { %v824_v38 = vpop.permute.xlu1 %823 }
 0x5ae   : > { %2451 = vmatmul.mubr.msk.bf16.vlgmr.msra.gmra.mrb[4].mxu0 %vm455_vm2, %v824_v38  ;;  %v1112_v38 = vadd.f32 %v1111_v36, %v2920_v11 }
 0x5af   : > { %2479 = vmatpush3.bf16.msra.mxu0 %v2886_v1  ;;  %2482 = vmatprep.mubr.msk.bf16.mxu0 %vm2799_vm1, %v2798_v2 }
 0x5b0   : > { %2480 = vmatprep.subr.bf16.mxu0 %v2798_v2 }
 0x5b3   : > { %2481 = vmatpush3.bf16.msra.mxu0 %v2894_v3 }
 0x5b4   : > { %2486 = vmatprep.subr.bf16.mxu0 %v2798_v2 }
 0x675   : > { %v943_v45 = vpop.f32.mrb[8].mxu1 }
 0x676   : > { %v949_v46 = vadd.f32 %v943_v45, %v908_v43  ;;  %v2460_v47 = vpop.f32.mrb[9].mxu1 }
 0x677   : > { %v946_v49 = vpop.f32.mrb[10].mxu1  ;;  %v975_v47 = vmul.f32 %v974_v44, %v2915_v9 }
 0x678   : > { %2693 = vtanh.f32 %v949_v46  ;;  %v2461_v50 = vpop.f32.mrb[11].mxu1  ;;  %v950_v61 = vmul.f32 0.5, %v949_v46 }
 0x679   : > { %v976_v48 = vadd.f32 %v975_v47, %v2985_v54 }
 0x681   : > { %v862_v53 = vpop.f32.mrb[4].mxu0 }
 0x682   : > { %v2694_v55 = vpop.eup %2693  ;;  %v2599_v56 = vadd.f32 %v862_v53, %v772_v52  ;;  %v2452_v57 = vpop.f32.mrb[5].mxu0 }
 0x683   : > { %v865_v58 = vpop.f32.mrb[6].mxu0  ;;  %957 = vrot.lane.b32.xlu0 %v2694_v55, %s2800_s24 }
 0x684   : > { %2695 = vtanh.f32 %v2599_v56  ;;  %v2453_v59 = vpop.f32.mrb[7].mxu0  ;;  %v869_v62 = vmul.f32 0.5, %v2599_v56 }
 0x685   : > { %2697 = vtanh.f32 %v950_v61 }
 0x686   : > { %2699 = vtanh.f32 %v869_v62 }
 0x68e   : > { %v2696_v60 = vpop.eup %2695 }
 0x68f   : > { %876 = vrot.lane.b32.xlu1 %v2696_v60, %s2800_s24  ;;  %v2698_v63 = vpop.eup %2697 }
 0x690   : > { %v952_v0 = vmul.f32 0.5, %v2698_v63  ;;  %v2700_v7 = vpop.eup %2699 }
 0x691   : > { %v871_v8 = vmul.f32 0.5, %v2700_v7 }
 0x692   : > { %v953_v4 = vadd.f32 0.5, %v952_v0 }
 0x693   : > { %v872_v12 = vadd.f32 0.5, %v871_v8 }
 0x694   : > { %v955_v15 = vmul.f32 %v953_v4, %v2995_v21 }
 0x695   : > { %v874_v18 = vmul.f32 %v872_v12, %v2998_v26 }
 0x6f5   : > { %v958_v5 = vpop.permute.xlu0 %957 }
 0x6f6   : > { %v960_v6 = vmul.f32 %v958_v5, %v953_v4 }
 0x6f8   : > { %962 = vrot.lane.b32.xlu0 %v960_v6, %s2801_s9 }
 0x701   : > { %v877_v13 = vpop.permute.xlu1 %876 }
 0x702   : > { %v879_v14 = vmul.f32 %v877_v13, %v872_v12 }
 0x704   : > { %881 = vrot.lane.b32.xlu1 %v879_v14, %s2801_s9 }
 0x76a   : > { %v963_v16 = vpop.permute.xlu0 %962 }
 0x76b   : > { %v3041_v17 = vadd.f32 %v963_v16, %v955_v15 }
 0x76d   : > { %2701 = vtanh.f32 %v3041_v17 }
 0x776   : > { %v882_v19 = vpop.permute.xlu1 %881 }
 0x777   : > { %v2702_v20 = vpop.eup %2701  ;;  %v3045_v22 = vadd.f32 %v882_v19, %v874_v18 }
 0x778   : > { %968 = vrot.lane.b32.xlu0 %v2702_v20, %s2800_s24 }
 0x779   : > { %2703 = vtanh.f32 %v3045_v22 }
 0x783   : > { %v2704_v23 = vpop.eup %2703 }
 0x784   : > { %887 = vrot.lane.b32.xlu1 %v2704_v23, %s2800_s24 }
 0x7ea   : > { %v969_v24 = vpop.permute.xlu0 %968 }
 0x7eb   : > { %v971_v21 = vmul.f32 %v969_v24, %v953_v4 }
 0x7ed   : > { %v977_v25 = vpack.c.bf16 %v971_v21, %v971_v21 }
 0x7ef   : > { %979 = vrot.lane.b32.xlu0 %v977_v25, %s2801_s9 }
 0x7f6   : > { %v888_v27 = vpop.permute.xlu1 %887 }
 0x7f7   : > { %v3051_v28 = vmul.f32 %v888_v27, %v872_v12 }
 0x7f9   : > { %v1025_v26 = vpack.c.bf16 %v3051_v28, %v3051_v28 }
 0x7fb   : > { %1027 = vrot.lane.b32.xlu1 %v1025_v26, %s2801_s9  ;;  %v2308_v26 = vld [vmem:[%s2870_s11 + $0x4] sm:$0x1] }
 0x861   : > { %v980_v29 = vpop.permute.xlu0 %979 }
 0x862   : > { %2467 = vmatmul.mubr.msk.bf16.vlgmr.msra.gmra.mrb[12].mxu1 %vm455_vm2, %v980_v29  ;;  %2483 = vmatmul.mubr.msk.bf16.vlgmr.msra.gmra.mrb[8].mxu0 %vm455_vm2, %v980_v29  ;;  %v1314_v29 = vunpack.c.l.bf16 %v2308_v26 }
 0x863   : > { %2471 = vmatpush3.bf16.msra.mxu1 %v2949_v37  ;;  %2474 = vmatprep.mubr.msk.bf16.mxu1 %vm2799_vm1, %v2798_v2 }
 0x864   : > { %2472 = vmatprep.subr.bf16.mxu1 %v2798_v2  ;;  %2487 = vmatpush3.bf16.msra.mxu0 %v2933_v31 }
 0x865   : > { %2488 = vmatprep.subr.bf16.mxu0 %v2798_v2  ;;  %2490 = vmatprep.mubr.msk.bf16.mxu0 %vm2799_vm1, %v2798_v2 }
 0x867   : > { %2473 = vmatpush3.bf16.msra.mxu1 %v2957_v39 }
 0x868   : > { %2502 = vmatprep.subr.bf16.mxu1 %v2798_v2  ;;  %2489 = vmatpush3.bf16.msra.mxu0 %v2939_v32 }
 0x869   : > { %2494 = vmatprep.subr.bf16.mxu0 %v2798_v2 }
 0x86d   : > { %v1028_v30 = vpop.permute.xlu1 %1027 }
 0x86e   : > { %2475 = vmatmul.mubr.msk.bf16.vlgmr.msra.gmra.mrb[12].mxu1 %vm455_vm2, %v1028_v30  ;;  %v1315_v30 = vmul.f32 %v1314_v29, %v2917_v10 }
 0x86f   : > { %2503 = vmatpush3.bf16.msra.mxu1 %v2886_v1  ;;  %2506 = vmatprep.mubr.msk.bf16.mxu1 %vm2799_vm1, %v2798_v2 }
 0x870   : > { %2504 = vmatprep.subr.bf16.mxu1 %v2798_v2  ;;  %v1316_v33 = vadd.f32 %v1315_v30, %v2920_v11  ;;  %v2310_v30 = vld [vmem:[%s2875_s14 + $0x4] sm:$0x1] }
 0x873   : > { %2505 = vmatpush3.bf16.msra.mxu1 %v2894_v3 }
 0x874   : > { %2510 = vmatprep.subr.bf16.mxu1 %v2798_v2 }
 0x935   : > { %v1147_v41 = vpop.f32.mrb[8].mxu0 }
 0x936   : > { %v1153_v42 = vadd.f32 %v1147_v41, %v1112_v38  ;;  %v2484_v43 = vpop.f32.mrb[9].mxu0  ;;  %v1178_v41 = vunpack.c.l.bf16 %v2304_v35 }
 0x937   : > { %v1150_v45 = vpop.f32.mrb[10].mxu0 }
 0x938   : > { %2705 = vtanh.f32 %v1153_v42  ;;  %v2485_v46 = vpop.f32.mrb[11].mxu0  ;;  %v1154_v57 = vmul.f32 0.5, %v1153_v42  ;;  %v1179_v44 = vmul.f32 %v1178_v41, %v2915_v9 }
 0x93a   : > { %v1180_v45 = vadd.f32 %v1179_v44, %v2985_v54 }
 0x941   : > { %v1066_v49 = vpop.f32.mrb[12].mxu1 }
 0x942   : > { %v2706_v50 = vpop.eup %2705  ;;  %v2600_v51 = vadd.f32 %v1066_v49, %v976_v48  ;;  %v2476_v52 = vpop.f32.mrb[13].mxu1 }
 0x943   : > { %1161 = vrot.lane.b32.xlu0 %v2706_v50, %s2800_s24  ;;  %v1069_v53 = vpop.f32.mrb[14].mxu1 }
 0x944   : > { %2707 = vtanh.f32 %v2600_v51  ;;  %v2477_v55 = vpop.f32.mrb[15].mxu1  ;;  %v1073_v58 = vmul.f32 0.5, %v2600_v51 }
 0x945   : > { %2709 = vtanh.f32 %v1154_v57 }
 0x946   : > { %2711 = vtanh.f32 %v1073_v58 }
 0x94e   : > { %v2708_v56 = vpop.eup %2707 }
 0x94f   : > { %1080 = vrot.lane.b32.xlu1 %v2708_v56, %s2800_s24  ;;  %v2710_v59 = vpop.eup %2709 }
 0x950   : > { %v1156_v60 = vmul.f32 0.5, %v2710_v59  ;;  %v2712_v0 = vpop.eup %2711 }
 0x951   : > { %v1075_v4 = vmul.f32 0.5, %v2712_v0 }
 0x952   : > { %v1157_v61 = vadd.f32 0.5, %v1156_v60 }
 0x953   : > { %v1076_v5 = vadd.f32 0.5, %v1075_v4 }
 0x954   : > { %v1159_v8 = vmul.f32 %v1157_v61, %v3041_v17 }
 0x955   : > { %v1078_v14 = vmul.f32 %v1076_v5, %v3045_v22 }
 0x9b5   : > { %v1162_v62 = vpop.permute.xlu0 %1161 }
 0x9b6   : > { %v1164_v63 = vmul.f32 %v1162_v62, %v1157_v61 }
 0x9b8   : > { %1166 = vrot.lane.b32.xlu0 %v1164_v63, %s2801_s9 }
 0x9c1   : > { %v1081_v6 = vpop.permute.xlu1 %1080 }
 0x9c2   : > { %v1083_v7 = vmul.f32 %v1081_v6, %v1076_v5 }
 0x9c4   : > { %1085 = vrot.lane.b32.xlu1 %v1083_v7, %s2801_s9 }
 0xa2a   : > { %v1167_v12 = vpop.permute.xlu0 %1166 }
 0xa2b   : > { %v3088_v13 = vadd.f32 %v1167_v12, %v1159_v8 }
 0xa2d   : > { %2713 = vtanh.f32 %v3088_v13 }
 0xa36   : > { %v1086_v15 = vpop.permute.xlu1 %1085 }
 0xa37   : > { %v2714_v16 = vpop.eup %2713  ;;  %v3092_v18 = vadd.f32 %v1086_v15, %v1078_v14 }
 0xa38   : > { %1172 = vrot.lane.b32.xlu0 %v2714_v16, %s2800_s24 }
 0xa39   : > { %2715 = vtanh.f32 %v3092_v18 }
 0xa43   : > { %v2716_v19 = vpop.eup %2715 }
 0xa44   : > { %1091 = vrot.lane.b32.xlu1 %v2716_v19, %s2800_s24 }
 0xaaa   : > { %v1173_v20 = vpop.permute.xlu0 %1172 }
 0xaab   : > { %v1175_v17 = vmul.f32 %v1173_v20, %v1157_v61 }
 0xaad   : > { %v1181_v23 = vpack.c.bf16 %v1175_v17, %v1175_v17 }
 0xaaf   : > { %1183 = vrot.lane.b32.xlu0 %v1181_v23, %s2801_s9 }
 0xab6   : > { %v1092_v24 = vpop.permute.xlu1 %1091 }
 0xab7   : > { %v3098_v21 = vmul.f32 %v1092_v24, %v1076_v5 }
 0xab9   : > { %v1229_v22 = vpack.c.bf16 %v3098_v21, %v3098_v21 }
 0xabb   : > { %1231 = vrot.lane.b32.xlu1 %v1229_v22, %s2801_s9 }
 0xb21   : > { %v1184_v25 = vpop.permute.xlu0 %1183 }
 0xb22   : > { %2491 = vmatmul.mubr.msk.bf16.vlgmr.msra.gmra.mrb[12].mxu0 %vm455_vm2, %v1184_v25  ;;  %2507 = vmatmul.mubr.msk.bf16.vlgmr.msra.gmra.mrb[16].mxu1 %vm455_vm2, %v1184_v25  ;;  %v2314_v25 = vld [vmem:[%s2870_s11 + $0x5] sm:$0x1] }
 0xb23   : > { %2495 = vmatpush3.bf16.msra.mxu0 %v2949_v37  ;;  %2498 = vmatprep.mubr.msk.bf16.mxu0 %vm2799_vm1, %v2798_v2 }
 0xb24   : > { %2496 = vmatprep.subr.bf16.mxu0 %v2798_v2  ;;  %2511 = vmatpush3.bf16.msra.mxu1 %v2933_v31 }
 0xb25   : > { %2512 = vmatprep.subr.bf16.mxu1 %v2798_v2  ;;  %2514 = vmatprep.mubr.msk.bf16.mxu1 %vm2799_vm1, %v2798_v2 }
 0xb27   : > { %2497 = vmatpush3.bf16.msra.mxu0 %v2957_v39 }
 0xb28   : > { %2526 = vmatprep.subr.bf16.mxu0 %v2798_v2  ;;  %2513 = vmatpush3.bf16.msra.mxu1 %v2939_v32 }
 0xb29   : > { %2518 = vmatprep.subr.bf16.mxu1 %v2798_v2 }
 0xb2d   : > { %v1232_v27 = vpop.permute.xlu1 %1231 }
 0xb2e   : > { %2499 = vmatmul.mubr.msk.bf16.vlgmr.msra.gmra.mrb[12].mxu0 %vm455_vm2, %v1232_v27  ;;  %v1518_v27 = vunpack.c.l.bf16 %v2314_v25 }
 0xb2f   : > { %2527 = vmatpush3.bf16.msra.mxu0 %v2886_v1  ;;  %2530 = vmatprep.mubr.msk.bf16.mxu0 %vm2799_vm1, %v2798_v2 }
 0xb30   : > { %2528 = vmatprep.subr.bf16.mxu0 %v2798_v2  ;;  %v1519_v26 = vmul.f32 %v1518_v27, %v2917_v10 }
 0xb32   : > { %v1520_v29 = vadd.f32 %v1519_v26, %v2920_v11 }
 0xb33   : > { %2529 = vmatpush3.bf16.msra.mxu0 %v2894_v3 }
 0xb34   : > { %2534 = vmatprep.subr.bf16.mxu0 %v2798_v2 }
 0xbf5   : > { %v1351_v36 = vpop.f32.mrb[16].mxu1 }
 0xbf6   : > { %v1357_v38 = vadd.f32 %v1351_v36, %v1316_v33  ;;  %v2508_v40 = vpop.f32.mrb[17].mxu1 }
 0xbf7   : > { %v1354_v42 = vpop.f32.mrb[18].mxu1 }
 0xbf8   : > { %2717 = vtanh.f32 %v1357_v38  ;;  %v2509_v43 = vpop.f32.mrb[19].mxu1  ;;  %v1358_v53 = vmul.f32 0.5, %v1357_v38  ;;  %v1382_v38 = vunpack.c.l.bf16 %v2310_v30 }
 0xbfa   : > { %v1383_v42 = vmul.f32 %v1382_v38, %v2915_v9 }
 0xbfc   : > { %v1384_v43 = vadd.f32 %v1383_v42, %v2985_v54 }
 0xc01   : > { %v1270_v46 = vpop.f32.mrb[12].mxu0 }
 0xc02   : > { %v2718_v47 = vpop.eup %2717  ;;  %v2601_v48 = vadd.f32 %v1270_v46, %v1180_v45  ;;  %v2500_v49 = vpop.f32.mrb[13].mxu0 }
 0xc03   : > { %v1273_v50 = vpop.f32.mrb[14].mxu0  ;;  %1365 = vrot.lane.b32.xlu0 %v2718_v47, %s2800_s24 }
 0xc04   : > { %2719 = vtanh.f32 %v2601_v48  ;;  %v2501_v51 = vpop.f32.mrb[15].mxu0  ;;  %v1277_v55 = vmul.f32 0.5, %v2601_v48 }
 0xc05   : > { %2721 = vtanh.f32 %v1358_v53 }
 0xc06   : > { %2723 = vtanh.f32 %v1277_v55 }
 0xc0e   : > { %v2720_v52 = vpop.eup %2719 }
 0xc0f   : > { %1284 = vrot.lane.b32.xlu1 %v2720_v52, %s2800_s24  ;;  %v2722_v56 = vpop.eup %2721 }
 0xc10   : > { %v1360_v57 = vmul.f32 0.5, %v2722_v56  ;;  %v2724_v61 = vpop.eup %2723 }
 0xc11   : > { %v1279_v62 = vmul.f32 0.5, %v2724_v61 }
 0xc12   : > { %v1361_v58 = vadd.f32 0.5, %v1360_v57 }
 0xc13   : > { %v1280_v63 = vadd.f32 0.5, %v1279_v62 }
 0xc14   : > { %v1363_v5 = vmul.f32 %v1361_v58, %v3088_v13 }
 0xc15   : > { %v1282_v8 = vmul.f32 %v1280_v63, %v3092_v18 }
 0xc75   : > { %v1366_v59 = vpop.permute.xlu0 %1365 }
 0xc76   : > { %v1368_v60 = vmul.f32 %v1366_v59, %v1361_v58 }
 0xc78   : > { %1370 = vrot.lane.b32.xlu0 %v1368_v60, %s2801_s9 }
 0xc81   : > { %v1285_v0 = vpop.permute.xlu1 %1284 }
 0xc82   : > { %v1287_v4 = vmul.f32 %v1285_v0, %v1280_v63 }
 0xc84   : > { %1289 = vrot.lane.b32.xlu1 %v1287_v4, %s2801_s9 }
 0xcea   : > { %v1371_v6 = vpop.permute.xlu0 %1370 }
 0xceb   : > { %v3135_v7 = vadd.f32 %v1371_v6, %v1363_v5 }
 0xced   : > { %2725 = vtanh.f32 %v3135_v7 }
 0xcf6   : > { %v1290_v12 = vpop.permute.xlu1 %1289 }
 0xcf7   : > { %v2726_v14 = vpop.eup %2725  ;;  %v3139_v15 = vadd.f32 %v1290_v12, %v1282_v8 }
 0xcf8   : > { %1376 = vrot.lane.b32.xlu0 %v2726_v14, %s2800_s24 }
 0xcf9   : > { %2727 = vtanh.f32 %v3139_v15 }
 0xd03   : > { %v2728_v16 = vpop.eup %2727 }
 0xd04   : > { %1295 = vrot.lane.b32.xlu1 %v2728_v16, %s2800_s24 }
 0xd6a   : > { %v1377_v19 = vpop.permute.xlu0 %1376 }
 0xd6b   : > { %v1379_v13 = vmul.f32 %v1377_v19, %v1361_v58 }
 0xd6d   : > { %v1385_v20 = vpack.c.bf16 %v1379_v13, %v1379_v13 }
 0xd6f   : > { %1387 = vrot.lane.b32.xlu0 %v1385_v20, %s2801_s9 }
 0xd76   : > { %v1296_v17 = vpop.permute.xlu1 %1295 }
 0xd77   : > { %v3145_v23 = vmul.f32 %v1296_v17, %v1280_v63 }
 0xd79   : > { %v1433_v18 = vpack.c.bf16 %v3145_v23, %v3145_v23 }
 0xd7b   : > { %1435 = vrot.lane.b32.xlu1 %v1433_v18, %s2801_s9 }
 0xde1   : > { %v1388_v24 = vpop.permute.xlu0 %1387 }
 0xde2   : > { %2515 = vmatmul.mubr.msk.bf16.vlgmr.msra.gmra.mrb[20].mxu1 %vm455_vm2, %v1388_v24  ;;  %2531 = vmatmul.mubr.msk.bf16.vlgmr.msra.gmra.mrb[16].mxu0 %vm455_vm2, %v1388_v24 }
 0xde3   : > { %2519 = vmatpush3.bf16.msra.mxu1 %v2949_v37  ;;  %2522 = vmatprep.mubr.msk.bf16.mxu1 %vm2799_vm1, %v2798_v2 }
 0xde4   : > { %2520 = vmatprep.subr.bf16.mxu1 %v2798_v2  ;;  %2535 = vmatpush3.bf16.msra.mxu0 %v2933_v31 }
 0xde5   : > { %2536 = vmatprep.subr.bf16.mxu0 %v2798_v2  ;;  %2538 = vmatprep.mubr.msk.bf16.mxu0 %vm2799_vm1, %v2798_v2 }
 0xde7   : > { %2521 = vmatpush3.bf16.msra.mxu1 %v2957_v39 }
 0xde8   : > { %2550 = vmatprep.subr.bf16.mxu1 %v2798_v2  ;;  %2537 = vmatpush3.bf16.msra.mxu0 %v2939_v32 }
 0xde9   : > { %2542 = vmatprep.subr.bf16.mxu0 %v2798_v2 }
 0xded   : > { %v1436_v22 = vpop.permute.xlu1 %1435 }
 0xdee   : > { %2523 = vmatmul.mubr.msk.bf16.vlgmr.msra.gmra.mrb[20].mxu1 %vm455_vm2, %v1436_v22  ;;  %v2320_v22 = vld [vmem:[%s2870_s11 + $0x6] sm:$0x1] }
 0xdef   : > { %2551 = vmatpush3.bf16.msra.mxu1 %v2886_v1  ;;  %2554 = vmatprep.mubr.msk.bf16.mxu1 %vm2799_vm1, %v2798_v2  ;;  %v1722_v25 = vunpack.c.l.bf16 %v2320_v22  ;;  %v2322_v22 = vld [vmem:[%s2875_s14 + $0x6] sm:$0x1] }
 0xdf0   : > { %2552 = vmatprep.subr.bf16.mxu1 %v2798_v2 }
 0xdf1   : > { %v1723_v27 = vmul.f32 %v1722_v25, %v2917_v10 }
 0xdf3   : > { %2553 = vmatpush3.bf16.msra.mxu1 %v2894_v3  ;;  %v1724_v26 = vadd.f32 %v1723_v27, %v2920_v11 }
 0xdf4   : > { %2558 = vmatprep.subr.bf16.mxu1 %v2798_v2 }
 0xeb5   : > { %v1555_v33 = vpop.f32.mrb[16].mxu0 }
 0xeb6   : > { %v1561_v35 = vadd.f32 %v1555_v33, %v1520_v29  ;;  %v2532_v36 = vpop.f32.mrb[17].mxu0  ;;  %v2316_v29 = vld [vmem:[%s2875_s14 + $0x5] sm:$0x1] }
 0xeb7   : > { %v1558_v40 = vpop.f32.mrb[18].mxu0 }
 0xeb8   : > { %2729 = vtanh.f32 %v1561_v35  ;;  %v2533_v41 = vpop.f32.mrb[19].mxu0  ;;  %v1562_v51 = vmul.f32 0.5, %v1561_v35 }
 0xec1   : > { %v1474_v44 = vpop.f32.mrb[20].mxu1 }
 0xec2   : > { %v2730_v45 = vpop.eup %2729  ;;  %v2602_v46 = vadd.f32 %v1474_v44, %v1384_v43  ;;  %v2524_v47 = vpop.f32.mrb[21].mxu1 }
 0xec3   : > { %1569 = vrot.lane.b32.xlu0 %v2730_v45, %s2800_s24  ;;  %v1477_v48 = vpop.f32.mrb[22].mxu1 }
 0xec4   : > { %2731 = vtanh.f32 %v2602_v46  ;;  %v2525_v49 = vpop.f32.mrb[23].mxu1  ;;  %v1481_v52 = vmul.f32 0.5, %v2602_v46 }
 0xec5   : > { %2733 = vtanh.f32 %v1562_v51 }
 0xec6   : > { %2735 = vtanh.f32 %v1481_v52 }
 0xece   : > { %v2732_v50 = vpop.eup %2731 }
 0xecf   : > { %1488 = vrot.lane.b32.xlu1 %v2732_v50, %s2800_s24  ;;  %v2734_v53 = vpop.eup %2733 }
 0xed0   : > { %v1564_v55 = vmul.f32 0.5, %v2734_v53  ;;  %v2736_v59 = vpop.eup %2735 }
 0xed1   : > { %v1483_v60 = vmul.f32 0.5, %v2736_v59 }
 0xed2   : > { %v1565_v56 = vadd.f32 0.5, %v1564_v55 }
 0xed3   : > { %v1484_v61 = vadd.f32 0.5, %v1483_v60 }
 0xed4   : > { %v1567_v0 = vmul.f32 %v1565_v56, %v3135_v7 }
 0xed5   : > { %v1486_v6 = vmul.f32 %v1484_v61, %v3139_v15 }
 0xf35   : > { %v1570_v57 = vpop.permute.xlu0 %1569 }
 0xf36   : > { %v1572_v58 = vmul.f32 %v1570_v57, %v1565_v56 }
 0xf38   : > { %1574 = vrot.lane.b32.xlu0 %v1572_v58, %s2801_s9 }
 0xf41   : > { %v1489_v62 = vpop.permute.xlu1 %1488 }
 0xf42   : > { %v1491_v63 = vmul.f32 %v1489_v62, %v1484_v61 }
 0xf44   : > { %1493 = vrot.lane.b32.xlu1 %v1491_v63, %s2801_s9 }
 0xfaa   : > { %v1575_v4 = vpop.permute.xlu0 %1574 }
 0xfab   : > { %v3182_v5 = vadd.f32 %v1575_v4, %v1567_v0 }
 0xfad   : > { %2737 = vtanh.f32 %v3182_v5 }
 0xfb6   : > { %v1494_v8 = vpop.permute.xlu1 %1493 }
 0xfb7   : > { %v2738_v12 = vpop.eup %2737  ;;  %v3186_v14 = vadd.f32 %v1494_v8, %v1486_v6 }
 0xfb8   : > { %1580 = vrot.lane.b32.xlu0 %v2738_v12, %s2800_s24 }
 0xfb9   : > { %2739 = vtanh.f32 %v3186_v14 }
 0xfc3   : > { %v2740_v16 = vpop.eup %2739 }
 0xfc4   : > { %1499 = vrot.lane.b32.xlu1 %v2740_v16, %s2800_s24 }
0x102a   : > { %v1581_v19 = vpop.permute.xlu0 %1580 }
0x102b   : > { %v1583_v7 = vmul.f32 %v1581_v19, %v1565_v56 }
0x102d   : > { %v1589_v13 = vpack.c.bf16 %v1583_v7, %v1583_v7 }
0x102f   : > { %1591 = vrot.lane.b32.xlu0 %v1589_v13, %s2801_s9 }
0x1036   : > { %v1500_v20 = vpop.permute.xlu1 %1499 }
0x1037   : > { %v3192_v17 = vmul.f32 %v1500_v20, %v1484_v61 }
0x1039   : > { %v1637_v15 = vpack.c.bf16 %v3192_v17, %v3192_v17 }
0x103b   : > { %1639 = vrot.lane.b32.xlu1 %v1637_v15, %s2801_s9 }
0x10a1   : > { %v1592_v18 = vpop.permute.xlu0 %1591 }
0x10a2   : > { %2539 = vmatmul.mubr.msk.bf16.vlgmr.msra.gmra.mrb[20].mxu0 %vm455_vm2, %v1592_v18  ;;  %2555 = vmatmul.mubr.msk.bf16.vlgmr.msra.gmra.mrb[24].mxu1 %vm455_vm2, %v1592_v18 }
0x10a3   : > { %2543 = vmatpush3.bf16.msra.mxu0 %v2949_v37  ;;  %2546 = vmatprep.mubr.msk.bf16.mxu0 %vm2799_vm1, %v2798_v2 }
0x10a4   : > { %2544 = vmatprep.subr.bf16.mxu0 %v2798_v2  ;;  %2559 = vmatpush3.bf16.msra.mxu1 %v2933_v31 }
0x10a5   : > { %2560 = vmatprep.subr.bf16.mxu1 %v2798_v2  ;;  %2562 = vmatprep.mubr.msk.bf16.mxu1 %vm2799_vm1, %v2798_v2 }
0x10a7   : > { %2545 = vmatpush3.bf16.msra.mxu0 %v2957_v39 }
0x10a8   : > { %2574 = vmatprep.subr.bf16.mxu0 %v2798_v2  ;;  %2561 = vmatpush3.bf16.msra.mxu1 %v2939_v32 }
0x10a9   : > { %2566 = vmatprep.subr.bf16.mxu1 %v2798_v2 }
0x10ad   : > { %v1640_v24 = vpop.permute.xlu1 %1639 }
0x10ae   : > { %2547 = vmatmul.mubr.msk.bf16.vlgmr.msra.gmra.mrb[20].mxu0 %vm455_vm2, %v1640_v24 }
0x10af   : > { %2575 = vmatpush3.bf16.msra.mxu0 %v2886_v1  ;;  %2578 = vmatprep.mubr.msk.bf16.mxu0 %vm2799_vm1, %v2798_v2  ;;  %v1586_v1 = vunpack.c.l.bf16 %v2316_v29  ;;  %v1790_v29 = vunpack.c.l.bf16 %v2322_v22 }
0x10b0   : > { %2576 = vmatprep.subr.bf16.mxu0 %v2798_v2 }
0x10b1   : > { %v1587_v40 = vmul.f32 %v1586_v1, %v2915_v9 }
0x10b3   : > { %2577 = vmatpush3.bf16.msra.mxu0 %v2894_v3  ;;  %v1588_v3 = vadd.f32 %v1587_v40, %v2985_v54 }
0x10b4   : > { %2582 = vmatprep.subr.bf16.mxu0 %v2798_v2 }
0x1175   : > { %v1759_v30 = vpop.f32.mrb[24].mxu1 }
0x1176   : > { %v1765_v33 = vadd.f32 %v1759_v30, %v1724_v26  ;;  %v2556_v35 = vpop.f32.mrb[25].mxu1 }
0x1177   : > { %v1762_v36 = vpop.f32.mrb[26].mxu1 }
0x1178   : > { %2741 = vtanh.f32 %v1765_v33  ;;  %v2557_v38 = vpop.f32.mrb[27].mxu1  ;;  %v1766_v48 = vmul.f32 0.5, %v1765_v33 }
0x1181   : > { %v1678_v41 = vpop.f32.mrb[20].mxu0 }
0x1182   : > { %v2742_v42 = vpop.eup %2741  ;;  %v2603_v43 = vadd.f32 %v1678_v41, %v1588_v3  ;;  %v2548_v44 = vpop.f32.mrb[21].mxu0 }
0x1183   : > { %v1681_v45 = vpop.f32.mrb[22].mxu0  ;;  %1773 = vrot.lane.b32.xlu0 %v2742_v42, %s2800_s24 }
0x1184   : > { %2743 = vtanh.f32 %v2603_v43  ;;  %v2549_v46 = vpop.f32.mrb[23].mxu0  ;;  %v1685_v49 = vmul.f32 0.5, %v2603_v43 }
0x1185   : > { %2745 = vtanh.f32 %v1766_v48 }
0x1186   : > { %2747 = vtanh.f32 %v1685_v49 }
0x118e   : > { %v2744_v47 = vpop.eup %2743 }
0x118f   : > { %1692 = vrot.lane.b32.xlu1 %v2744_v47, %s2800_s24  ;;  %v2746_v50 = vpop.eup %2745 }
0x1190   : > { %v1768_v51 = vmul.f32 0.5, %v2746_v50  ;;  %v2748_v56 = vpop.eup %2747 }
0x1191   : > { %v1687_v57 = vmul.f32 0.5, %v2748_v56 }
0x1192   : > { %v1769_v52 = vadd.f32 0.5, %v1768_v51 }
0x1193   : > { %v1688_v58 = vadd.f32 0.5, %v1687_v57 }
0x1194   : > { %v1771_v61 = vmul.f32 %v1769_v52, %v3182_v5 }
0x1195   : > { %v1690_v0 = vmul.f32 %v1688_v58, %v3186_v14 }
0x11f5   : > { %v1774_v53 = vpop.permute.xlu0 %1773 }
0x11f6   : > { %v1776_v55 = vmul.f32 %v1774_v53, %v1769_v52 }
0x11f8   : > { %1778 = vrot.lane.b32.xlu0 %v1776_v55, %s2801_s9 }
0x1201   : > { %v1693_v59 = vpop.permute.xlu1 %1692 }
0x1202   : > { %v1695_v60 = vmul.f32 %v1693_v59, %v1688_v58 }
0x1204   : > { %1697 = vrot.lane.b32.xlu1 %v1695_v60, %s2801_s9 }
0x126a   : > { %v1779_v62 = vpop.permute.xlu0 %1778 }
0x126b   : > { %v3229_v63 = vadd.f32 %v1779_v62, %v1771_v61 }
0x126d   : > { %2749 = vtanh.f32 %v3229_v63 }
0x1276   : > { %v1698_v4 = vpop.permute.xlu1 %1697 }
0x1277   : > { %v2750_v6 = vpop.eup %2749  ;;  %v3233_v8 = vadd.f32 %v1698_v4, %v1690_v0 }
0x1278   : > { %1784 = vrot.lane.b32.xlu0 %v2750_v6, %s2800_s24 }
0x1279   : > { %2751 = vtanh.f32 %v3233_v8 }
0x1283   : > { %v2752_v12 = vpop.eup %2751 }
0x1284   : > { %1703 = vrot.lane.b32.xlu1 %v2752_v12, %s2800_s24  ;;  %v2771_v12 = vld [vmem:[%s3343_s4] sm:$0xff]  }
0x12ea   : > { %v1785_v16 = vpop.permute.xlu0 %1784 }
0x12eb   : > { %v1787_v5 = vmul.f32 %v1785_v16, %v1769_v52  ;;  %v2772_v16 = vld [vmem:[%s3343_s4 + $0x8] sm:$0xff]  }
0x12ed   : > { %v1793_v19 = vpack.c.bf16 %v1787_v5, %v1787_v5 }
0x12ef   : > { %1795 = vrot.lane.b32.xlu0 %v1793_v19, %s2801_s9  ;;  %v2328_v19 = vld [vmem:[%s2875_s14 + $0x7] sm:$0x1]  ;;  %s2803_s14 = smov 96  }
0x12f6   : > { %v1704_v7 = vpop.permute.xlu1 %1703 }
0x12f7   : > { %v3239_v13 = vmul.f32 %v1704_v7, %v1688_v58  ;;  %v1994_v7 = vunpack.c.l.bf16 %v2328_v19 }
0x12f9   : > { %v1841_v14 = vpack.c.bf16 %v3239_v13, %v3239_v13 }
0x12fb   : > { %1843 = vrot.lane.b32.xlu1 %v1841_v14, %s2801_s9  ;;  %v1995_v14 = vmul.f32 %v1994_v7, %v2915_v9 }
0x1361   : > { %v1796_v20 = vpop.permute.xlu0 %1795 }
0x1362   : > { %2563 = vmatmul.mubr.msk.bf16.vlgmr.msra.gmra.mrb[28].mxu1 %vm455_vm2, %v1796_v20  ;;  %2579 = vmatmul.mubr.msk.bf16.vlgmr.msra.gmra.mrb[24].mxu0 %vm455_vm2, %v1796_v20  ;;  %v1996_v20 = vadd.f32 %v1995_v14, %v2985_v54 }
0x1363   : > { %2567 = vmatpush3.bf16.msra.mxu1 %v2949_v37  ;;  %2570 = vmatprep.mubr.msk.bf16.mxu1 %vm2799_vm1, %v2798_v2  ;;  %v2326_v37 = vld [vmem:[%s2870_s11 + $0x7] sm:$0x1] }
0x1364   : > { %2568 = vmatprep.subr.bf16.mxu1 %v2798_v2  ;;  %2583 = vmatpush3.bf16.msra.mxu0 %v2933_v31  ;;  %v1926_v18 = vunpack.c.l.bf16 %v2326_v37 }
0x1365   : > { %2584 = vmatprep.subr.bf16.mxu0 %v2798_v2  ;;  %2586 = vmatprep.mubr.msk.bf16.mxu0 %vm2799_vm1, %v2798_v2 }
0x1366   : > { %v1927_v24 = vmul.f32 %v1926_v18, %v2917_v10 }
0x1367   : > { %2569 = vmatpush3.bf16.msra.mxu1 %v2957_v39 }
0x1368   : > { %2585 = vmatpush3.bf16.msra.mxu0 %v2939_v32  ;;  %v1928_v31 = vadd.f32 %v1927_v24, %v2920_v11  ;;  %v1791_v32 = vmul.f32 %v1790_v29, %v2915_v9  ;;  %v691_v29 = vlaneseq }
0x1369   : > { %2590 = vmatprep.subr.bf16.mxu0 %v2798_v2 }
0x136a   : > { %v1792_v33 = vadd.f32 %v1791_v32, %v2985_v54  ;;  %v692_v9 = vshrl.u32 %v691_v29, 7 }
0x136d   : > { %v1844_v15 = vpop.permute.xlu1 %1843 }
0x136e   : > { %2571 = vmatmul.mubr.msk.bf16.vlgmr.msra.gmra.mrb[28].mxu1 %vm455_vm2, %v1844_v15 }
0x1435   : > { %v1963_v25 = vpop.f32.mrb[24].mxu0 }
0x1436   : > { %v1969_v27 = vadd.f32 %v1963_v25, %v1928_v31  ;;  %v2580_v26 = vpop.f32.mrb[25].mxu0 }
0x1437   : > { %v1966_v30 = vpop.f32.mrb[26].mxu0 }
0x1438   : > { %2753 = vtanh.f32 %v1969_v27  ;;  %v2581_v39 = vpop.f32.mrb[27].mxu0  ;;  %v1970_v3 = vmul.f32 0.5, %v1969_v27  ;;  %v2802_v27 = vmov 1983009808  }
0x1439   : > { %v689_v26 = vunpack.c.l.s4 %v2802_v27 }
0x143b   : > { %v690_v39 = vunpack.c.0.s8 %v689_v26 }
0x1441   : > { %v1882_v35 = vpop.f32.mrb[28].mxu1 }
0x1442   : > { %v2754_v1 = vpop.eup %2753  ;;  %v2604_v36 = vadd.f32 %v1882_v35, %v1792_v33  ;;  %v2572_v38 = vpop.f32.mrb[29].mxu1  ;;  %v693_v33 = vsub.s32 %v690_v39, %v692_v9 }
0x1443   : > { %1977 = vrot.lane.b32.xlu0 %v2754_v1, %s2800_s24  ;;  %v1885_v10 = vpop.f32.mrb[30].mxu1 }
0x1444   : > { %2755 = vtanh.f32 %v2604_v36  ;;  %v2573_v11 = vpop.f32.mrb[31].mxu1  ;;  %v1889_v41 = vmul.f32 0.5, %v2604_v36  ;;  %v694_v1 = vrot.slane %v3004_v34, %v693_v33  ;;  %v1102_v36 = vrot.slane %v3098_v21, %v693_v33 }
0x1445   : > { %2757 = vtanh.f32 %v1970_v3  ;;  %v1510_v38 = vrot.slane %v3192_v17, %v693_v33 }
0x1446   : > { %2759 = vtanh.f32 %v1889_v41 }
0x144e   : > { %v2756_v40 = vpop.eup %2755 }
0x144f   : > { %1896 = vrot.lane.b32.xlu1 %v2756_v40, %s2800_s24  ;;  %v2758_v42 = vpop.eup %2757 }
0x1450   : > { %v1972_v43 = vmul.f32 0.5, %v2758_v42  ;;  %v2760_v47 = vpop.eup %2759 }
0x1451   : > { %v1891_v48 = vmul.f32 0.5, %v2760_v47 }
0x1452   : > { %v1973_v44 = vadd.f32 0.5, %v1972_v43 }
0x1453   : > { %v1892_v49 = vadd.f32 0.5, %v1891_v48  ;;  %v1714_v48 = vrot.slane %v3239_v13, %v693_v33 }
0x1454   : > { %v1975_v52 = vmul.f32 %v1973_v44, %v3229_v63 }
0x1455   : > { %v1894_v56 = vmul.f32 %v1892_v49, %v3233_v8 }
0x14b5   : > { %v1978_v45 = vpop.permute.xlu0 %1977 }
0x14b6   : > { %v1980_v46 = vmul.f32 %v1978_v45, %v1973_v44 }
0x14b8   : > { %1982 = vrot.lane.b32.xlu0 %v1980_v46, %s2801_s9  ;;  %v1306_v46 = vrot.slane %v3145_v23, %v693_v33 }
0x14c1   : > { %v1897_v50 = vpop.permute.xlu1 %1896 }
0x14c2   : > { %v1899_v51 = vmul.f32 %v1897_v50, %v1892_v49 }
0x14c4   : > { %1901 = vrot.lane.b32.xlu1 %v1899_v51, %s2801_s9 }
0x152a   : > { %v1983_v53 = vpop.permute.xlu0 %1982 }
0x152b   : > { %v3269_v55 = vadd.f32 %v1983_v53, %v1975_v52 }
0x152d   : > { %2761 = vtanh.f32 %v3269_v55  ;;  %v2147_v13 = vrot.slane %v3269_v55, %v693_v33 }
0x1536   : > { %v1902_v57 = vpop.permute.xlu1 %1901 }
0x1537   : > { %v2762_v58 = vpop.eup %2761  ;;  %v1904_v59 = vadd.f32 %v1902_v57, %v1894_v56 }
0x1538   : > { %1988 = vrot.lane.b32.xlu0 %v2762_v58, %s2800_s24 }
0x1539   : > { %2763 = vtanh.f32 %v1904_v59 }
0x1543   : > { %v2764_v60 = vpop.eup %2763 }
0x1544   : > { %1907 = vrot.lane.b32.xlu1 %v2764_v60, %s2800_s24 }
0x15aa   : > { %v1989_v61 = vpop.permute.xlu0 %1988 }
0x15ab   : > { %v1991_v62 = vmul.f32 %v1989_v61, %v1973_v44  ;;  %v898_v44 = vrot.slane %v3051_v28, %v693_v33 }
0x15ad   : > { %v1997_v0 = vpack.c.bf16 %v1991_v62, %v1991_v62  ;;  %v2135_v11 = vrot.slane %v1991_v62, %v693_v33 }
0x15af   : > { %1999 = vrot.lane.b32.xlu0 %v1997_v0, %s2801_s9 }
0x15b6   : > { %v1908_v63 = vpop.permute.xlu1 %1907 }
0x15b7   : > { %v1910_v4 = vmul.f32 %v1908_v63, %v1892_v49 }
0x15b9   : > { %v2045_v6 = vpack.c.bf16 %v1910_v4, %v1910_v4  ;;  %v1918_v10 = vrot.slane %v1910_v4, %v693_v33 }
0x15bb   : > { %2047 = vrot.lane.b32.xlu1 %v2045_v6, %s2801_s9 }
0x1621   : > { %v2000_v8 = vpop.permute.xlu0 %1999 }
0x1622   : > { %2587 = vmatmul.mubr.msk.bf16.vlgmr.msra.gmra.mrb[28].mxu0 %vm455_vm2, %v2000_v8 }
0x1623   : > { %2591 = vmatpush3.bf16.msra.mxu0 %v2771_v12  ;;  %2594 = vmatprep.mubr.msk.bf16.mxu0 %vm2799_vm1, %v2798_v2 }
0x1624   : > { %2592 = vmatprep.subr.bf16.mxu0 %v2798_v2 }
0x1627   : > { %2593 = vmatpush3.bf16.msra.mxu0 %v2772_v16 }
0x162d   : > { %v2048_v5 = vpop.permute.xlu1 %2047 }
0x162e   : > { %2595 = vmatmul.mubr.msk.bf16.vlgmr.msra.gmra.mrb[28].mxu0 %vm455_vm2, %v2048_v5 }
0x1701   : > { %v2086_v15 = vpop.f32.mrb[28].mxu0 }
0x1702   : > { %v2605_v37 = vadd.f32 %v2086_v15, %v1996_v20  ;;  %v2596_v18 = vpop.f32.mrb[29].mxu0 }
0x1703   : > { %v2089_v24 = vpop.f32.mrb[30].mxu0 }
0x1704   : > { %2765 = vtanh.f32 %v2605_v37  ;;  %v2597_v2 = vpop.f32.mrb[31].mxu0  ;;  %v2093_v22 = vmul.f32 0.5, %v2605_v37 }
0x1706   : > { %2767 = vtanh.f32 %v2093_v22 }
0x170e   : > { %v2766_v31 = vpop.eup %2765 }
0x170f   : > { %2100 = vrot.lane.b32.xlu0 %v2766_v31, %s2800_s24 }
0x1710   : > { %v2768_v25 = vpop.eup %2767 }
0x1711   : > { %v2095_v30 = vmul.f32 0.5, %v2768_v25 }
0x1713   : > { %v2096_v32 = vadd.f32 0.5, %v2095_v30 }
0x1715   : > { %v2098_v40 = vmul.f32 %v2096_v32, %v1904_v59 }
0x1781   : > { %v2101_v54 = vpop.permute.xlu0 %2100 }
0x1782   : > { %v2103_v35 = vmul.f32 %v2101_v54, %v2096_v32 }
0x1784   : > { %2105 = vrot.lane.b32.xlu1 %v2103_v35, %s2801_s9 }
0x1788   : > { %695 = vrot.lane.b32.xlu1 %v694_v1, %s2801_s9 }
0x178c   : > { %1103 = vrot.lane.b32.xlu1 %v1102_v36, %s2801_s9 }
0x1790   : > { %1511 = vrot.lane.b32.xlu1 %v1510_v38, %s2801_s9 }
0x1794   : > { %1919 = vrot.lane.b32.xlu1 %v1918_v10, %s2801_s9 }
0x1798   : > { %2136 = vrot.lane.b32.xlu1 %v2135_v11, %s2801_s9 }
0x17f6   : > { %v2106_v3 = vpop.permute.xlu1 %2105 }
0x17f7   : > { %v2108_v34 = vadd.f32 %v2106_v3, %v2098_v40 }
0x17f9   : > { %2769 = vtanh.f32 %v2108_v34  ;;  %v2160_v41 = vrot.slane %v2108_v34, %v693_v33 }
0x17fa   : > { %v696_v42 = vpop.permute.xlu1 %695 }
0x17fb   : > { %699 = vst.msk [vmem:[%s2880_s18] sm:$0x3] %vm698_vm3, %v696_v42  ;;  %2161 = vrot.lane.b32.xlu1 %v2160_v41, %s2803_s14 }
0x17fe   : > { %v1104_v21 = vpop.permute.xlu1 %1103 }
0x17ff   : > { %2301 = vst.msk [vmem:[%s2880_s18 + $0x4] sm:$0x3] %vm698_vm3, %v1104_v21 }
0x1802   : > { %v1512_v17 = vpop.permute.xlu1 %1511 }
0x1803   : > { %v2770_v43 = vpop.eup %2769  ;;  %2313 = vst.msk [vmem:[%s2880_s18 + $0x8] sm:$0x3] %vm698_vm3, %v1512_v17 }
0x1804   : > { %2111 = vrot.lane.b32.xlu0 %v2770_v43, %s2800_s24 }
0x1806   : > { %v1920_v45 = vpop.permute.xlu1 %1919 }
0x1807   : > { %2325 = vst.msk [vmem:[%s2880_s18 + $0xc] sm:$0x3] %vm698_vm3, %v1920_v45 }
0x1808   : > { %899 = vrot.lane.b32.xlu0 %v898_v44, %s2801_s9 }
0x180a   : > { %v2137_v47 = vpop.permute.xlu1 %2136 }
0x180b   : > { %2139 = vst.msk [vmem:[#allocation2] sm:$0x3] %vm698_vm3, %v2137_v47 }
0x180c   : > { %1307 = vrot.lane.b32.xlu0 %v1306_v46, %s2801_s9 }
0x1810   : > { %1715 = vrot.lane.b32.xlu0 %v1714_v48, %s2801_s9 }
0x186d   : > { %v2162_v49 = vpop.permute.xlu1 %2161 }
0x186e   : > { %2164 = vst.msk [vmem:[#allocation5] sm:$0x3] %vm698_vm3, %v2162_v49 }
0x1876   : > { %v2112_v28 = vpop.permute.xlu0 %2111 }
0x1877   : > { %v2114_v50 = vmul.f32 %v2112_v28, %v2096_v32 }
0x1879   : > { %v2122_v23 = vrot.slane %v2114_v50, %v693_v33 }
0x187a   : > { %v900_v51 = vpop.permute.xlu0 %899 }
0x187b   : > { %2295 = vst.msk [vmem:[%s2880_s18 + $0x2] sm:$0x3] %vm698_vm3, %v900_v51  ;;  %2123 = vrot.lane.b32.xlu0 %v2122_v23, %s2801_s9 }
0x187e   : > { %v1308_v52 = vpop.permute.xlu0 %1307 }
0x187f   : > { %2307 = vst.msk [vmem:[%s2880_s18 + $0x6] sm:$0x3] %vm698_vm3, %v1308_v52  ;;  %2148 = vrot.lane.b32.xlu0 %v2147_v13, %s2803_s14 }
0x1882   : > { %v1716_v53 = vpop.permute.xlu0 %1715 }
0x1883   : > { %2319 = vst.msk [vmem:[%s2880_s18 + $0xa] sm:$0x3] %vm698_vm3, %v1716_v53 }
0x18ed   : > { %v2124_v56 = vpop.permute.xlu0 %2123 }
0x18ee   : > { %2331 = vst.msk [vmem:[%s2880_s18 + $0xe] sm:$0x3] %vm698_vm3, %v2124_v56  ;;  %2152 = vst.msk [vmem:[#allocation4] sm:$0x3] %vm698_vm3, %v2124_v56 }
0x18f1   : > { %v2149_v57 = vpop.permute.xlu0 %2148 }
0x18f2   : > { %2151 = vst.msk [vmem:[#allocation3] sm:$0x3] %vm698_vm3, %v2149_v57 }
0x18f3 PF: > { %s17_s26 = sadd.s32 1, %s2795_s26   ;;  %s3347_s24 = smov %s2791_s25 }
0x18f4   : > { %p14_p10 = scmp.ge.s32.totalorder %s17_s26, 4   ;;  %s3348_s25 = smov %s3350_s27 }
0x18f6   :  { %16 = sbr.rel (!%p14_p10) target bundleno = 2 (0x2), region = 106 }

</bundles_post_ra>
